<compile_context>
chip_gen: v7x
topology: tpu7x:2x2x1
jax: 0.10.0
libtpu: 0.0.40
codegen_flags: <defaults>
</compile_context>

<pallas_src>
import jax
import jax.numpy as jnp
from jax import lax
from jax.experimental import pallas as pl
from jax.experimental.pallas import tpu as pltpu

_EPS = 1e-5
_HW = 63            # 9 * 7 board positions
_CI = 256           # input channels
_CP = 128           # policy conv channels
_NOUT = 252         # policy outputs (4 * 9 * 7)
_OPAD = 256         # lane-padded policy output width

_VMEM = pl.BlockSpec(memory_space=pltpu.MemorySpace.VMEM)
_SMEM = pl.BlockSpec(memory_space=pltpu.MemorySpace.SMEM)
_ANY = pl.BlockSpec(memory_space=pl.ANY)


def outblock_kernel(x_ref, rmask_ref, wc2_ref, wc1_ref, bn2_ref, wr_hbm,
                    bfc_ref, wfc13_ref, bfc1_ref, wfc2_ref, vs_ref,
                    out_ref, wr_vmem, copy_sem, p_scr, v_scr):
    """Fused OutBlock forward.

    x_ref:    [Rp, 256] bf16, rows ordered (h*7+w)-major, each (h,w) group of
              samples padded to G (multiple of 8) rows; pad rows are zero.
    rmask_ref:[Rp, 1] f32, 1.0 on real rows, 0.0 on padding rows.
    wr_hbm:   [63, 128, 256] bf16 policy-FC weight, left in HBM (pl.ANY) and
              DMA'd manually so the fetch overlaps the conv/BN compute.
    out_ref:  [N, 256] f32; cols 0:252 policy softmax, col 252 value.
    """
    # Kick off the big (~4 MB) policy-FC weight fetch immediately.
    wr_copy = pltpu.make_async_copy(wr_hbm, wr_vmem, copy_sem)
    wr_copy.start()

    HW = wr_vmem.shape[0]                       # 63
    N = out_ref.shape[0]                        # real batch
    Rp = p_scr.shape[0]                         # padded rows (63 * G)
    G = Rp // HW                                # rows per (h, w) group
    r_inv = 1.0 / (N * HW)

    x = x_ref[...]                              # [Rp, 256] bf16
    rmask = rmask_ref[...]                      # [Rp, 1] f32

    # ---- policy head: 1x1 conv (MXU, bf16 -> f32 acc) + train BN + ReLU ----
    # Conv bias is omitted: a per-channel constant cancels exactly under
    # batch-statistics normalization.  Zero pad rows contribute 0 to the sums.
    h2 = jnp.dot(x, wc2_ref[...], preferred_element_type=jnp.float32)  # [Rp,128]
    mu2 = jnp.sum(h2, axis=0, keepdims=True) * r_inv
    d2 = (h2 - mu2) * rmask                      # mask pad rows out of variance
    var2 = jnp.sum(d2 * d2, axis=0, keepdims=True) * r_inv
    sc2 = bn2_ref[0:1, :] * lax.rsqrt(var2 + _EPS)
    sh2 = bn2_ref[1:2, :] - mu2 * sc2
    p_scr[...] = jnp.maximum(h2 * sc2 + sh2, 0.0).astype(p_scr.dtype)

    # ---- value head: 1x1 conv (VPU, f32) + train BN + ReLU -----------------
    h1 = jnp.sum(x.astype(jnp.float32) * wc1_ref[...], axis=1, keepdims=True)
    mu1 = jnp.sum(h1, axis=0, keepdims=True) * r_inv
    d1 = (h1 - mu1) * rmask
    var1 = jnp.sum(d1 * d1, axis=0, keepdims=True) * r_inv
    sc1 = vs_ref[0] * lax.rsqrt(var1 + _EPS)     # g1
    sh1 = vs_ref[1] - mu1 * sc1                  # be1
    v_scr[...] = jnp.maximum(h1 * sc1 + sh1, 0.0)

    # The policy-FC weight is needed from here on.
    wr_copy.wait()

    # ---- policy FC + value fc1 as an accumulation over the 63 positions ----
    def body(hw, carry):
        lacc, vacc = carry
        r0 = pl.multiple_of(hw * G, G)           # G is a multiple of 8
        pa = p_scr[pl.ds(r0, G), :]              # [G, 128] bf16
        lacc = lacc + jnp.dot(pa, wr_vmem[hw],
                              preferred_element_type=jnp.float32)   # [G, 256]
        va = v_scr[pl.ds(r0, G), :]              # [G, 1] f32
        vacc = vacc + va * wfc13_ref[hw]         # [G, 1]*[1, 63] -> [G, 63]
        return lacc, vacc

    lacc, vacc = lax.fori_loop(
        0, HW, body,
        (jnp.zeros((G, _OPAD), jnp.float32), jnp.zeros((G, HW), jnp.float32)))

    # ---- policy softmax (pad lanes carry a -1e30 bias -> exp == 0) ---------
    logits = lacc[:N] + bfc_ref[...]             # [N, 256]
    m = jnp.max(logits, axis=1, keepdims=True)
    e = jnp.exp(logits - m)
    psm = e * pl.reciprocal(jnp.sum(e, axis=1, keepdims=True), approx=True)

    # ---- value MLP tail (tiny, f32) -----------------------------------------
    v1 = jnp.maximum(vacc[:N] + bfc1_ref[...], 0.0)          # [N, 63]
    v2 = jnp.sum(v1 * wfc2_ref[...], axis=1, keepdims=True) + vs_ref[2]
    v = jnp.tanh(v2)                                          # [N, 1]

    # Pack value into lane 252 of the single lane-dense output.
    lane = lax.broadcasted_iota(jnp.int32, (N, _OPAD), 1)
    out_ref[...] = jnp.where(lane == _NOUT, v, psm)


def prepare_outblock_params(params):
    """One-time (per weight update) preparation of all kernel weights."""
    wc2 = params["wc2"][:, :, 0, 0].T.astype(jnp.bfloat16)          # [256,128]
    wc1 = params["wc1"][:, :, 0, 0].reshape(1, _CI).astype(jnp.float32)
    bn2 = jnp.stack([params["g2"], params["be2"]]).astype(jnp.float32)  # [2,128]
    # PyTorch fc weight [252, c*63+hw] -> [hw, c, out], zero-pad out to 256.
    wr3 = params["wfc"].reshape(_NOUT, _CP, _HW).transpose(2, 1, 0)
    wr3 = jnp.pad(wr3, ((0, 0), (0, 0), (0, _OPAD - _NOUT))).astype(jnp.bfloat16)
    bfc = jnp.pad(params["bfc"].astype(jnp.float32), (0, _OPAD - _NOUT),
                  constant_values=-1e30).reshape(1, _OPAD)
    wfc13 = params["wfc1"].T.reshape(_HW, 1, _HW).astype(jnp.float32)  # [63,1,63]
    bfc1 = params["bfc1"].reshape(1, _HW).astype(jnp.float32)
    wfc2 = params["wfc2"].reshape(1, _HW).astype(jnp.float32)          # [1,63]
    vscal = jnp.stack([params["g1"][0], params["be1"][0],
                       params["bfc2"][0]]).astype(jnp.float32)         # (3,)
    # Conv biases bc1 / bc2 cancel exactly under training-mode BN -> dropped.
    return dict(wc2=wc2, wc1=wc1, bn2=bn2, wr3=wr3, bfc=bfc,
                wfc13=wfc13, bfc1=bfc1, wfc2=wfc2, vscal=vscal)


def outblock_forward(s, prep):
    """s: [N, 256, 9, 7] f32 (NCHW). Returns (p [N, 252], v [N, 1])."""
    N, C, H, W = s.shape
    HW = H * W
    G = ((N + 7) // 8) * 8                       # pad each (h,w) group to 8k rows
    Rp = HW * G

    # NCHW -> (h*7+w)-major row slab [Rp, 256], zero-padded per group.
    x = jnp.transpose(s, (2, 3, 0, 1)).reshape(HW, N, C)
    x = jnp.pad(x, ((0, 0), (0, G - N), (0, 0))).reshape(Rp, C).astype(jnp.bfloat16)
    rmask = ((jnp.arange(Rp, dtype=jnp.int32).reshape(Rp, 1) % G) < N
             ).astype(jnp.float32)

    out = pl.pallas_call(
        outblock_kernel,
        out_shape=jax.ShapeDtypeStruct((N, _OPAD), jnp.float32),
        in_specs=[_VMEM, _VMEM, _VMEM, _VMEM, _VMEM,
                  _ANY,                       # wr3 stays in HBM, manual DMA
                  _VMEM, _VMEM, _VMEM, _VMEM, _SMEM],
        out_specs=_VMEM,
        scratch_shapes=[
            pltpu.VMEM((_HW, _CP, _OPAD), jnp.bfloat16),   # policy-FC weight
            pltpu.SemaphoreType.DMA(()),
            pltpu.VMEM((Rp, _CP), jnp.bfloat16),           # policy activations
            pltpu.VMEM((Rp, 1), jnp.float32),              # value activations
        ],
    )(x, rmask, prep["wc2"], prep["wc1"], prep["bn2"], prep["wr3"],
      prep["bfc"], prep["wfc13"], prep["bfc1"], prep["wfc2"], prep["vscal"])

    return out[:, :_NOUT], out[:, _NOUT:_NOUT + 1]


def outblock_ref(s, params):
    """Pure-JAX f32 reference mirroring the PyTorch forward (training BN)."""
    N = s.shape[0]

    def bn(y, g, b):
        mean = jnp.mean(y, axis=(0, 2, 3), keepdims=True)
        var = jnp.mean((y - mean) ** 2, axis=(0, 2, 3), keepdims=True)
        return ((y - mean) * lax.rsqrt(var + _EPS) * g.reshape(1, -1, 1, 1)
                + b.reshape(1, -1, 1, 1))

    # value head
    v = (jnp.einsum("nchw,oc->nohw", s, params["wc1"][:, :, 0, 0])
         + params["bc1"].reshape(1, -1, 1, 1))
    v = jax.nn.relu(bn(v, params["g1"], params["be1"]))
    v = v.reshape(N, _HW)
    v = jax.nn.relu(v @ params["wfc1"].T + params["bfc1"])
    v = jnp.tanh(v @ params["wfc2"].T + params["bfc2"])
    # policy head
    p = (jnp.einsum("nchw,oc->nohw", s, params["wc2"][:, :, 0, 0])
         + params["bc2"].reshape(1, -1, 1, 1))
    p = jax.nn.relu(bn(p, params["g2"], params["be2"]))
    p = p.reshape(N, _CP * _HW)
    p = p @ params["wfc"].T + params["bfc"]
    p = jax.nn.softmax(p, axis=1)
    return p, v


def make_params(key):
    ks = jax.random.split(key, 14)
    n = jax.random.normal
    return {
        "wc1": 0.05 * n(ks[0], (1, 256, 1, 1), jnp.float32),     # OIHW
        "bc1": 0.10 * n(ks[1], (1,), jnp.float32),
        "g1": 1.0 + 0.1 * n(ks[2], (1,), jnp.float32),
        "be1": 0.10 * n(ks[3], (1,), jnp.float32),
        "wc2": 0.05 * n(ks[4], (128, 256, 1, 1), jnp.float32),   # OIHW
        "bc2": 0.10 * n(ks[5], (128,), jnp.float32),
        "g2": 1.0 + 0.1 * n(ks[6], (128,), jnp.float32),
        "be2": 0.10 * n(ks[7], (128,), jnp.float32),
        "wfc1": 0.10 * n(ks[8], (63, 63), jnp.float32),          # [out, in]
        "bfc1": 0.10 * n(ks[9], (63,), jnp.float32),
        "wfc2": 0.10 * n(ks[10], (1, 63), jnp.float32),
        "bfc2": 0.10 * n(ks[11], (1,), jnp.float32),
        "wfc": 0.02 * n(ks[12], (252, 8064), jnp.float32),       # [out, in]
        "bfc": 0.05 * n(ks[13], (252,), jnp.float32),
    }


if __name__ == "__main__":
    N, C, H, W = 2, 256, 9, 7   # shapes implied by the module (9x7 board)
    key = jax.random.PRNGKey(0)
    kx, kp = jax.random.split(key)
    s = jax.random.normal(kx, (N, C, H, W), jnp.float32)
    params = make_params(kp)

    prep = prepare_outblock_params(params)           # hoisted: once per update
    prep = jax.block_until_ready(prep)

    fwd = jax.jit(outblock_forward)
    p, v = fwd(s, prep)
    p, v = jax.block_until_ready((p, v))

    p_ref, v_ref = outblock_ref(s, params)
    assert p.shape == (N, 4 * 9 * 7) and v.shape == (N, 1)
    # bf16 MXU operands in the kernel -> loosened tolerance vs f32 reference.
    ok_p = bool(jnp.allclose(p, p_ref, atol=1e-2, rtol=2e-2))
    ok_v = bool(jnp.allclose(v, v_ref, atol=1e-2, rtol=2e-2))
    if not (ok_p and ok_v):
        raise AssertionError("Pallas OutBlock mismatch vs JAX reference")
    print("KERNEL_OK")
</pallas_src>

<mosaic_0001>
module attributes {stable_mosaic.version = 11 : i64} {
  func.func @outblock_kernel(%arg0: memref<504x256xbf16, #tpu.memory_space<vmem>>, %arg1: memref<504x1xf32, #tpu.memory_space<vmem>>, %arg2: memref<256x128xbf16, #tpu.memory_space<vmem>>, %arg3: memref<1x256xf32, #tpu.memory_space<vmem>>, %arg4: memref<2x128xf32, #tpu.memory_space<vmem>>, %arg5: memref<63x128x256xbf16, #tpu.memory_space<any>>, %arg6: memref<1x256xf32, #tpu.memory_space<vmem>>, %arg7: memref<63x1x63xf32, #tpu.memory_space<vmem>>, %arg8: memref<1x63xf32, #tpu.memory_space<vmem>>, %arg9: memref<1x63xf32, #tpu.memory_space<vmem>>, %arg10: memref<3xf32, #tpu.memory_space<smem>>, %arg11: memref<2x256xf32, #tpu.memory_space<vmem>>, %arg12: memref<63x128x256xbf16, #tpu.memory_space<vmem>>, %arg13: memref<!tpu.dma_semaphore, #tpu.memory_space<semaphore_mem>>, %arg14: memref<504x128xbf16, #tpu.memory_space<vmem>>, %arg15: memref<504x1xf32, #tpu.memory_space<vmem>>) attributes {dimension_semantics = [], scalar_prefetch = 0 : i64, scratch_operands = 4 : i64, tpu.core_type = #tpu.core_type<tc>} {
    tpu.enqueue_dma source(%arg5 : memref<63x128x256xbf16, #tpu.memory_space<any>>) target(%arg12 : memref<63x128x256xbf16, #tpu.memory_space<vmem>>) target_semaphore(%arg13 : memref<!tpu.dma_semaphore, #tpu.memory_space<semaphore_mem>>)
    %c0 = arith.constant 0 : index
    %c0_0 = arith.constant 0 : index
    %0 = vector.load %arg0[%c0, %c0_0] : memref<504x256xbf16, #tpu.memory_space<vmem>>, vector<504x256xbf16>
    %c0_1 = arith.constant 0 : index
    %c0_2 = arith.constant 0 : index
    %1 = vector.load %arg1[%c0_1, %c0_2] : memref<504x1xf32, #tpu.memory_space<vmem>>, vector<504x1xf32>
    %c0_3 = arith.constant 0 : index
    %c0_4 = arith.constant 0 : index
    %2 = vector.load %arg2[%c0_3, %c0_4] : memref<256x128xbf16, #tpu.memory_space<vmem>>, vector<256x128xbf16>
    %cst = arith.constant dense<0.000000e+00> : vector<504x128xf32>
    %3 = tpu.matmul %0, %2, %cst {dimension_numbers = #tpu.dot_dimension_numbers<[1], [0], [0], [1], [0, 0, 1, 1], [], []>} : vector<504x256xbf16>, vector<256x128xbf16>, vector<504x128xf32> -> vector<504x128xf32>
    %cst_5 = arith.constant dense<0.000000e+00> : vector<128xf32>
    %4 = vector.multi_reduction <add>, %3, %cst_5 [0] : vector<504x128xf32> to vector<128xf32>
    %5 = vector.shape_cast %4 : vector<128xf32> to vector<1x128xf32>
    %cst_6 = arith.constant 0.00793650839 : f32
    %6 = vector.broadcast %cst_6 : f32 to vector<1x128xf32>
    %7 = arith.mulf %5, %6 : vector<1x128xf32>
    %8 = vector.broadcast %7 : vector<1x128xf32> to vector<504x128xf32>
    %9 = arith.subf %3, %8 : vector<504x128xf32>
    %10 = vector.broadcast %1 : vector<504x1xf32> to vector<504x128xf32>
    %11 = arith.mulf %9, %10 : vector<504x128xf32>
    %12 = arith.mulf %11, %11 : vector<504x128xf32>
    %cst_7 = arith.constant dense<0.000000e+00> : vector<128xf32>
    %13 = vector.multi_reduction <add>, %12, %cst_7 [0] : vector<504x128xf32> to vector<128xf32>
    %14 = vector.shape_cast %13 : vector<128xf32> to vector<1x128xf32>
    %cst_8 = arith.constant 0.00793650839 : f32
    %15 = vector.broadcast %cst_8 : f32 to vector<1x128xf32>
    %16 = arith.mulf %14, %15 : vector<1x128xf32>
    %c0_9 = arith.constant 0 : index
    %c0_10 = arith.constant 0 : index
    %17 = vector.load %arg4[%c0_9, %c0_10] : memref<2x128xf32, #tpu.memory_space<vmem>>, vector<1x128xf32>
    %cst_11 = arith.constant 9.99999974E-6 : f32
    %18 = vector.broadcast %cst_11 : f32 to vector<1x128xf32>
    %19 = arith.addf %16, %18 : vector<1x128xf32>
    %20 = math.rsqrt %19 : vector<1x128xf32>
    %21 = arith.mulf %17, %20 : vector<1x128xf32>
    %c1 = arith.constant 1 : index
    %c0_12 = arith.constant 0 : index
    %22 = vector.load %arg4[%c1, %c0_12] : memref<2x128xf32, #tpu.memory_space<vmem>>, vector<1x128xf32>
    %23 = arith.mulf %7, %21 : vector<1x128xf32>
    %24 = arith.subf %22, %23 : vector<1x128xf32>
    %25 = vector.broadcast %21 : vector<1x128xf32> to vector<504x128xf32>
    %26 = arith.mulf %3, %25 : vector<504x128xf32>
    %27 = vector.broadcast %24 : vector<1x128xf32> to vector<504x128xf32>
    %28 = arith.addf %26, %27 : vector<504x128xf32>
    %cst_13 = arith.constant 0.000000e+00 : f32
    %29 = vector.broadcast %cst_13 : f32 to vector<504x128xf32>
    %30 = arith.maximumf %28, %29 : vector<504x128xf32>
    %31 = arith.truncf %30 : vector<504x128xf32> to vector<504x128xbf16>
    %c0_14 = arith.constant 0 : index
    %c0_15 = arith.constant 0 : index
    %32 = vector.load %arg14[%c0_14, %c0_15] : memref<504x128xbf16, #tpu.memory_space<vmem>>, vector<504x128xbf16>
    tpu.vector_store %arg14[%c0_14, %c0_15], %31 {strides = array<i32>} : memref<504x128xbf16, #tpu.memory_space<vmem>>, vector<504x128xbf16>,
    %33 = arith.extf %0 : vector<504x256xbf16> to vector<504x256xf32>
    %c0_16 = arith.constant 0 : index
    %c0_17 = arith.constant 0 : index
    %34 = vector.load %arg3[%c0_16, %c0_17] : memref<1x256xf32, #tpu.memory_space<vmem>>, vector<1x256xf32>
    %35 = vector.broadcast %34 : vector<1x256xf32> to vector<504x256xf32>
    %36 = arith.mulf %33, %35 : vector<504x256xf32>
    %cst_18 = arith.constant dense<0.000000e+00> : vector<504xf32>
    %37 = vector.multi_reduction <add>, %36, %cst_18 [1] : vector<504x256xf32> to vector<504xf32>
    %38 = vector.shape_cast %37 : vector<504xf32> to vector<504x1xf32>
    %cst_19 = arith.constant dense<0.000000e+00> : vector<1xf32>
    %39 = vector.multi_reduction <add>, %38, %cst_19 [0] : vector<504x1xf32> to vector<1xf32>
    %40 = vector.shape_cast %39 : vector<1xf32> to vector<1x1xf32>
    %cst_20 = arith.constant 0.00793650839 : f32
    %41 = vector.broadcast %cst_20 : f32 to vector<1x1xf32>
    %42 = arith.mulf %40, %41 : vector<1x1xf32>
    %43 = vector.broadcast %42 : vector<1x1xf32> to vector<504x1xf32>
    %44 = arith.subf %38, %43 : vector<504x1xf32>
    %45 = arith.mulf %44, %1 : vector<504x1xf32>
    %46 = arith.mulf %45, %45 : vector<504x1xf32>
    %cst_21 = arith.constant dense<0.000000e+00> : vector<1xf32>
    %47 = vector.multi_reduction <add>, %46, %cst_21 [0] : vector<504x1xf32> to vector<1xf32>
    %48 = vector.shape_cast %47 : vector<1xf32> to vector<1x1xf32>
    %cst_22 = arith.constant 0.00793650839 : f32
    %49 = vector.broadcast %cst_22 : f32 to vector<1x1xf32>
    %50 = arith.mulf %48, %49 : vector<1x1xf32>
    %c0_23 = arith.constant 0 : index
    %51 = memref.load %arg10[%c0_23] : memref<3xf32, #tpu.memory_space<smem>>
    %cst_24 = arith.constant 9.99999974E-6 : f32
    %52 = vector.broadcast %cst_24 : f32 to vector<1x1xf32>
    %53 = arith.addf %50, %52 : vector<1x1xf32>
    %54 = math.rsqrt %53 : vector<1x1xf32>
    %55 = vector.broadcast %51 : f32 to vector<1x1xf32>
    %56 = arith.mulf %55, %54 : vector<1x1xf32>
    %c1_25 = arith.constant 1 : index
    %57 = memref.load %arg10[%c1_25] : memref<3xf32, #tpu.memory_space<smem>>
    %58 = arith.mulf %42, %56 : vector<1x1xf32>
    %59 = vector.broadcast %57 : f32 to vector<1x1xf32>
    %60 = arith.subf %59, %58 : vector<1x1xf32>
    %61 = vector.broadcast %56 : vector<1x1xf32> to vector<504x1xf32>
    %62 = arith.mulf %38, %61 : vector<504x1xf32>
    %63 = vector.broadcast %60 : vector<1x1xf32> to vector<504x1xf32>
    %64 = arith.addf %62, %63 : vector<504x1xf32>
    %cst_26 = arith.constant 0.000000e+00 : f32
    %65 = vector.broadcast %cst_26 : f32 to vector<504x1xf32>
    %66 = arith.maximumf %64, %65 : vector<504x1xf32>
    %c0_27 = arith.constant 0 : index
    %c0_28 = arith.constant 0 : index
    %67 = vector.load %arg15[%c0_27, %c0_28] : memref<504x1xf32, #tpu.memory_space<vmem>>, vector<504x1xf32>
    tpu.vector_store %arg15[%c0_27, %c0_28], %66 {strides = array<i32>} : memref<504x1xf32, #tpu.memory_space<vmem>>, vector<504x1xf32>,
    tpu.wait_dma2 semaphore(%arg13 : memref<!tpu.dma_semaphore, #tpu.memory_space<semaphore_mem>>) src(%arg5 : memref<63x128x256xbf16, #tpu.memory_space<any>>) dst(%arg12 : memref<63x128x256xbf16, #tpu.memory_space<vmem>>)
    %cst_29 = arith.constant 0.000000e+00 : f32
    %68 = vector.broadcast %cst_29 : f32 to vector<8x256xf32>
    %cst_30 = arith.constant 0.000000e+00 : f32
    %69 = vector.broadcast %cst_30 : f32 to vector<8x63xf32>
    %c0_i32 = arith.constant 0 : i32
    %c63_i32 = arith.constant 63 : i32
    %70 = arith.addi %c0_i32, %c63_i32 : i32
    %c1_i32 = arith.constant 1 : i32
    %71:2 = scf.for %arg16 = %c0_i32 to %70 step %c1_i32 iter_args(%arg17 = %68, %arg18 = %69) -> (vector<8x256xf32>, vector<8x63xf32>)  : i32 {
      %c8_i32 = arith.constant 8 : i32
      %108 = arith.muli %arg16, %c8_i32 : i32
      %109 = tpu.assume_multiple %108, 8 : i32
      %110 = arith.index_cast %109 : i32 to index
      %c0_44 = arith.constant 0 : index
      %111 = vector.load %arg14[%110, %c0_44] : memref<504x128xbf16, #tpu.memory_space<vmem>>, vector<8x128xbf16>
      %112 = arith.index_cast %arg16 : i32 to index
      %c0_45 = arith.constant 0 : index
      %c0_46 = arith.constant 0 : index
      %113 = vector.load %arg12[%112, %c0_45, %c0_46] : memref<63x128x256xbf16, #tpu.memory_space<vmem>>, vector<1x128x256xbf16>
      %114 = vector.shape_cast %113 : vector<1x128x256xbf16> to vector<128x256xbf16>
      %cst_47 = arith.constant dense<0.000000e+00> : vector<8x256xf32>
      %115 = tpu.matmul %111, %114, %cst_47 {dimension_numbers = #tpu.dot_dimension_numbers<[1], [0], [0], [1], [0, 0, 1, 1], [], []>} : vector<8x128xbf16>, vector<128x256xbf16>, vector<8x256xf32> -> vector<8x256xf32>
      %116 = arith.addf %arg17, %115 : vector<8x256xf32>
      %117 = arith.index_cast %109 : i32 to index
      %c0_48 = arith.constant 0 : index
      %118 = vector.load %arg15[%117, %c0_48] : memref<504x1xf32, #tpu.memory_space<vmem>>, vector<8x1xf32>
      %119 = arith.index_cast %arg16 : i32 to index
      %c0_49 = arith.constant 0 : index
      %c0_50 = arith.constant 0 : index
      %120 = vector.load %arg7[%119, %c0_49, %c0_50] : memref<63x1x63xf32, #tpu.memory_space<vmem>>, vector<1x1x63xf32>
      %121 = vector.shape_cast %120 : vector<1x1x63xf32> to vector<1x63xf32>
      %122 = vector.broadcast %118 : vector<8x1xf32> to vector<8x63xf32>
      %123 = vector.broadcast %121 : vector<1x63xf32> to vector<8x63xf32>
      %124 = arith.mulf %122, %123 : vector<8x63xf32>
      %125 = arith.addf %arg18, %124 : vector<8x63xf32>
      scf.yield %116, %125 : vector<8x256xf32>, vector<8x63xf32>
    }
    %c63_i32_31 = arith.constant 63 : i32
    %72 = vector.extract_strided_slice %71#0 {offsets = [0, 0], sizes = [2, 256], strides = [1, 1]} : vector<8x256xf32> to vector<2x256xf32>
    %c0_32 = arith.constant 0 : index
    %c0_33 = arith.constant 0 : index
    %73 = vector.load %arg6[%c0_32, %c0_33] : memref<1x256xf32, #tpu.memory_space<vmem>>, vector<1x256xf32>
    %74 = vector.broadcast %73 : vector<1x256xf32> to vector<2x256xf32>
    %75 = arith.addf %72, %74 : vector<2x256xf32>
    %cst_34 = arith.constant dense<0xFF800000> : vector<2xf32>
    %76 = vector.multi_reduction <maximumf>, %75, %cst_34 [1] : vector<2x256xf32> to vector<2xf32>
    %77 = vector.shape_cast %76 : vector<2xf32> to vector<2x1xf32>
    %78 = vector.broadcast %77 : vector<2x1xf32> to vector<2x256xf32>
    %79 = arith.subf %75, %78 : vector<2x256xf32>
    %80 = math.exp %79 : vector<2x256xf32>
    %cst_35 = arith.constant dense<0.000000e+00> : vector<2xf32>
    %81 = vector.multi_reduction <add>, %80, %cst_35 [1] : vector<2x256xf32> to vector<2xf32>
    %82 = vector.shape_cast %81 : vector<2xf32> to vector<2x1xf32>
    %83 = tpu.reciprocal %82 {approx = true} : vector<2x1xf32> -> vector<2x1xf32>
    %84 = vector.broadcast %83 : vector<2x1xf32> to vector<2x256xf32>
    %85 = arith.mulf %80, %84 : vector<2x256xf32>
    %86 = vector.extract_strided_slice %71#1 {offsets = [0, 0], sizes = [2, 63], strides = [1, 1]} : vector<8x63xf32> to vector<2x63xf32>
    %c0_36 = arith.constant 0 : index
    %c0_37 = arith.constant 0 : index
    %87 = vector.load %arg8[%c0_36, %c0_37] : memref<1x63xf32, #tpu.memory_space<vmem>>, vector<1x63xf32>
    %88 = vector.broadcast %87 : vector<1x63xf32> to vector<2x63xf32>
    %89 = arith.addf %86, %88 : vector<2x63xf32>
    %cst_38 = arith.constant 0.000000e+00 : f32
    %90 = vector.broadcast %cst_38 : f32 to vector<2x63xf32>
    %91 = arith.maximumf %89, %90 : vector<2x63xf32>
    %c0_39 = arith.constant 0 : index
    %c0_40 = arith.constant 0 : index
    %92 = vector.load %arg9[%c0_39, %c0_40] : memref<1x63xf32, #tpu.memory_space<vmem>>, vector<1x63xf32>
    %93 = vector.broadcast %92 : vector<1x63xf32> to vector<2x63xf32>
    %94 = arith.mulf %91, %93 : vector<2x63xf32>
    %cst_41 = arith.constant dense<0.000000e+00> : vector<2xf32>
    %95 = vector.multi_reduction <add>, %94, %cst_41 [1] : vector<2x63xf32> to vector<2xf32>
    %96 = vector.shape_cast %95 : vector<2xf32> to vector<2x1xf32>
    %c2 = arith.constant 2 : index
    %97 = memref.load %arg10[%c2] : memref<3xf32, #tpu.memory_space<smem>>
    %98 = vector.broadcast %97 : f32 to vector<2x1xf32>
    %99 = arith.addf %96, %98 : vector<2x1xf32>
    %100 = math.tanh %99 : vector<2x1xf32>
    %101 = tpu.iota {dimensions = array<i32: 1>} : vector<2x256xi32>
    %c252_i32 = arith.constant 252 : i32
    %102 = vector.broadcast %c252_i32 : i32 to vector<2x256xi32>
    %103 = arith.cmpi eq, %101, %102 : vector<2x256xi32>
    %104 = vector.shape_cast %100 : vector<2x1xf32> to vector<2x1xf32>
    %105 = vector.broadcast %104 : vector<2x1xf32> to vector<2x256xf32>
    %106 = arith.select %103, %105, %85 : vector<2x256xi1>, vector<2x256xf32>
    %c0_42 = arith.constant 0 : index
    %c0_43 = arith.constant 0 : index
    %107 = vector.load %arg11[%c0_42, %c0_43] : memref<2x256xf32, #tpu.memory_space<vmem>>, vector<2x256xf32>
    tpu.vector_store %arg11[%c0_42, %c0_43], %106 {strides = array<i32>} : memref<2x256xf32, #tpu.memory_space<vmem>>, vector<2x256xf32>,
    return
  }
}

</mosaic_0001>

<bundles_post_ra>
// kernel: outblock_forward.1
= control target key start
LH: loop header
LB: loop body
LE: loop exit
PB: predicated region body
PF: predicated region fallthrough
CT: control target
= control target key end

     0   :  { %16 = vsyncpa [#allocation7], 0  ;;  %s7783_s0 = inlined_call_operand.vmem [shape: bf16[504,256], index: 0, kind: input, shape index: {}]   ;;  %s7784_s1 = inlined_call_operand.vmem [shape: f32[504,1], index: 1, kind: input, shape index: {}]   ;;  %s7785_s2 = inlined_call_operand.hbm [shape: bf16[256,128], index: 2, kind: input, shape index: {}]   ;;  %s7786_s3 = inlined_call_operand.hbm [shape: f32[1,256], index: 3, kind: input, shape index: {}]   ;;  %s7787_s4 = inlined_call_operand.hbm [shape: f32[2,128], index: 4, kind: input, shape index: {}]   ;;  %s7788_s5 = inlined_call_operand.hbm [shape: bf16[63,128,256], index: 5, kind: input, shape index: {}]   ;;  %s7789_s6 = inlined_call_operand.hbm [shape: f32[1,256], index: 6, kind: input, shape index: {}]   ;;  %s7790_s7 = inlined_call_operand.hbm [shape: f32[63,1,63], index: 7, kind: input, shape index: {}]   ;;  %s7791_s8 = inlined_call_operand.hbm [shape: f32[1,63], index: 8, kind: input, shape index: {}]   ;;  %s7792_s9 = inlined_call_operand.hbm [shape: f32[1,63], index: 9, kind: input, shape index: {}]   ;;  %s7793_s10 = inlined_call_operand.hbm [shape: f32[3], index: 10, kind: input, shape index: {}]   ;;  %s7794_s11 = inlined_call_operand.vmem [shape: f32[2,256], index: 11, kind: output, shape index: {}]  }
   0x1   :  { %17 = vsyncpa [#allocation10], 0 }
   0x2   :  { %18 = vsyncpa [#allocation13], 0 }
   0x3   :  { %19 = vsyncpa [#allocation16], 0 }
   0x4   :  { %20 = vsyncpa [#allocation8], 0  ;;  %s4306_s17 = smov [#allocation9]   ;;  %s4307_s19 = smov [#allocation12]  }
   0x5   :  { %s43_s18 = sshll.u32 %s4306_s17, 4  ;;  %s63_s20 = sshll.u32 %s4307_s19, 4  ;;  %s44_s18 = int_to_ptr.vmem [resolvable:$true] %s43_s18  ;;  %s64_s20 = int_to_ptr.vmem [resolvable:$true] %s63_s20 }
   0x6   :  { %s4098_s23 = scalar_lea.hbm %s7786_s3, 32 }
   0x7   :  { %p4099_p0 = scmp.ne.s32.totalorder %s7786_s3, %s4098_s23  ;;  %p4102_p1 = scmp.lt.u32.totalorder %s4098_s23, %s7786_s3 }
   0x9   :  { %p4104_p2 = pnand %p4102_p1, %p4099_p0 }
   0xb   :  { %4107 = shalt.err (!%p4104_p2)
}
   0xc   :  { %s4108_s28 = scalar_lea.vmem %s44_s18, 32  ;;  %p4113_p4 = scmp.lt.s32.totalorder %s44_s18, %s44_s18 }
   0xd   :  { %p4109_p3 = scmp.ne.s32.totalorder %s44_s18, %s4108_s28  ;;  %p4114_p5 = scmp.lt.s32.totalorder %s4108_s28, %s4108_s28 }
   0xf   :  { %p4115_p6 = por %p4114_p5, %p4113_p4 }
  0x11   :  { %p4116_p7 = pnand %p4115_p6, %p4109_p3 }
  0x13   :  { %4119 = shalt.err (!%p4116_p7)
}
  0x14   :  { %46 = dma.hbm_to_vmem [thread:$0]  %s7786_s3, 32, %s44_s18, [#allocation10]  }
  0x15   :  { %s4120_s14 = scalar_lea.hbm %s7789_s6, 32 }
  0x16   :  { %p4121_p8 = scmp.ne.s32.totalorder %s7789_s6, %s4120_s14  ;;  %p4124_p9 = scmp.lt.u32.totalorder %s4120_s14, %s7789_s6 }
  0x18   :  { %p4126_p10 = pnand %p4124_p9, %p4121_p8 }
  0x1a   :  { %4129 = shalt.err (!%p4126_p10)
}
  0x1b   :  { %s4130_s21 = scalar_lea.vmem %s64_s20, 32  ;;  %p4135_p12 = scmp.lt.s32.totalorder %s64_s20, %s64_s20 }
  0x1c   :  { %p4131_p11 = scmp.ne.s32.totalorder %s64_s20, %s4130_s21  ;;  %p4136_p13 = scmp.lt.s32.totalorder %s4130_s21, %s4130_s21 }
  0x1e   :  { %p4137_p0 = por %p4136_p13, %p4135_p12 }
  0x20   :  { %p4138_p1 = pnand %p4137_p0, %p4131_p11 }
  0x22   :  { %4141 = shalt.err (!%p4138_p1)
}
  0x23   :  { %66 = dma.hbm_to_vmem [thread:$0]  %s7789_s6, 32, %s64_s20, [#allocation13]  }
  0x24   :  { %s4308_s22 = smov [#allocation15]   ;;  %s4309_s24 = smov [#allocation6]  }
  0x25   :  { %s85_s23 = sshll.u32 %s4308_s22, 4  ;;  %s30_s25 = sshll.u32 %s4309_s24, 4  ;;  %s86_s23 = int_to_ptr.vmem [resolvable:$true] %s85_s23  ;;  %s4410_s25 = int_to_ptr.vmem [resolvable:$true] %s30_s25 }
  0x26   :  { %s4142_s28 = scalar_lea.hbm %s7791_s8, 16 }
  0x27   :  { %p4143_p2 = scmp.ne.s32.totalorder %s7791_s8, %s4142_s28  ;;  %p4146_p3 = scmp.lt.u32.totalorder %s4142_s28, %s7791_s8 }
  0x29   :  { %p4148_p4 = pnand %p4146_p3, %p4143_p2 }
  0x2b   :  { %4151 = shalt.err (!%p4148_p4)
}
  0x2c   :  { %s4152_s6 = scalar_lea.vmem %s86_s23, 16  ;;  %s4156_s20 = scalar_lea.vmem %s86_s23, 32 }
  0x2d   :  { %p4153_p5 = scmp.ne.s32.totalorder %s86_s23, %s4152_s6  ;;  %p4157_p6 = scmp.lt.s32.totalorder %s86_s23, %s86_s23 }
  0x2e   :  { %p4158_p7 = scmp.lt.s32.totalorder %s4156_s20, %s4152_s6 }
  0x30   :  { %p4159_p8 = por %p4158_p7, %p4157_p6 }
  0x32   :  { %p4160_p9 = pnand %p4159_p8, %p4153_p5 }
  0x34   :  { %4163 = shalt.err (!%p4160_p9)
}
  0x35   :  { %88 = dma.hbm_to_vmem [thread:$0]  %s7791_s8, 16, %s86_s23, [#allocation16]  }
  0x36   :  { %s4164_s19 = scalar_lea.hbm %s7785_s2, 2048 }
  0x37   :  { %p4165_p10 = scmp.ne.s32.totalorder %s7785_s2, %s4164_s19  ;;  %p4168_p11 = scmp.lt.u32.totalorder %s4164_s19, %s7785_s2 }
  0x39   :  { %p4170_p12 = pnand %p4168_p11, %p4165_p10 }
  0x3b   :  { %4173 = shalt.err (!%p4170_p12)
}
  0x3c   :  { %s4174_s24 = scalar_lea.vmem %s4410_s25, 2048  ;;  %p4179_p0 = scmp.lt.s32.totalorder %s4410_s25, %s4410_s25 }
  0x3d   :  { %p4175_p13 = scmp.ne.s32.totalorder %s4410_s25, %s4174_s24  ;;  %p4180_p1 = scmp.lt.s32.totalorder %s4174_s24, %s4174_s24 }
  0x3f   :  { %p4181_p2 = por %p4180_p1, %p4179_p0 }
  0x41   :  { %p4182_p3 = pnand %p4181_p2, %p4175_p13 }
  0x43   :  { %4185 = shalt.err (!%p4182_p3)
}
  0x44   :  { %s4310_s8 = smov 64   ;;  %s4311_s23 = smov 4  }
  0x45   :  { %36 = dma.hbm_to_vmem [thread:$0]  %s7785_s2, 2048, %s4410_s25, [#allocation7], %s4310_s8, %s4310_s8, %s4311_s23  }
  0x46   :  { %s4312_s28 = smov [#allocation11]   ;;  %s4313_s30 = smov [#allocation14]  }
  0x47   :  { %s53_s29 = sshll.u32 %s4312_s28, 4  ;;  %s72_s12 = sshll.u32 %s4313_s30, 4  ;;  %s54_s29 = int_to_ptr.vmem [resolvable:$true] %s53_s29  ;;  %s4444_s12 = int_to_ptr.vmem [resolvable:$true] %s72_s12 }
  0x48   :  { %s4186_s20 = scalar_lea.hbm %s7787_s4, 32 }
  0x49   :  { %p4187_p4 = scmp.ne.s32.totalorder %s7787_s4, %s4186_s20  ;;  %p4190_p5 = scmp.lt.u32.totalorder %s4186_s20, %s7787_s4 }
  0x4b   :  { %p4192_p6 = pnand %p4190_p5, %p4187_p4 }
  0x4d   :  { %4195 = shalt.err (!%p4192_p6)
}
  0x4e   :  { %s4196_s2 = scalar_lea.vmem %s54_s29, 32  ;;  %p4201_p8 = scmp.lt.s32.totalorder %s54_s29, %s54_s29 }
  0x4f   :  { %p4197_p7 = scmp.ne.s32.totalorder %s54_s29, %s4196_s2  ;;  %p4202_p9 = scmp.lt.s32.totalorder %s4196_s2, %s4196_s2 }
  0x51   :  { %p4203_p10 = por %p4202_p9, %p4201_p8 }
  0x53   :  { %p4204_p11 = pnand %p4203_p10, %p4197_p7 }
  0x55   :  { %4207 = shalt.err (!%p4204_p11)
}
  0x56   :  { %56 = dma.hbm_to_vmem [thread:$0]  %s7787_s4, 32, %s54_s29, [#allocation10]  }
  0x57   :  { %s4208_s18 = scalar_lea.hbm %s7790_s7, 1008 }
  0x58   :  { %p4209_p12 = scmp.ne.s32.totalorder %s7790_s7, %s4208_s18  ;;  %p4212_p13 = scmp.lt.u32.totalorder %s4208_s18, %s7790_s7 }
  0x5a   :  { %p4214_p0 = pnand %p4212_p13, %p4209_p12 }
  0x5c   :  { %4217 = shalt.err (!%p4214_p0)
}
  0x5d   :  { %s4218_s28 = scalar_lea.vmem %s4444_s12, 1008  ;;  %s4222_s4 = scalar_lea.vmem %s4444_s12, 1024 }
  0x5e   :  { %p4219_p1 = scmp.ne.s32.totalorder %s4444_s12, %s4218_s28  ;;  %p4223_p2 = scmp.lt.s32.totalorder %s4444_s12, %s4444_s12 }
  0x5f   :  { %p4224_p3 = scmp.lt.s32.totalorder %s4222_s4, %s4218_s28 }
  0x61   :  { %p4225_p4 = por %p4224_p3, %p4223_p2 }
  0x63   :  { %p4226_p5 = pnand %p4225_p4, %p4219_p1 }
  0x65   :  { %4229 = shalt.err (!%p4226_p5)
}
  0x66   :  { %s4314_s29 = smov 16   ;;  %s4315_s30 = smov 1  }
  0x67   :  { %78 = dma.hbm_to_vmem [thread:$0]  %s7790_s7, 1008, %s4444_s12, [#allocation13], %s4314_s29, %s4314_s29, %s4315_s30  }
  0x68   :  { %s4316_s20 = smov [#allocation17]   ;;  %s4230_s17 = scalar_lea.hbm %s7792_s9, 16 }
  0x69   :  { %s95_s14 = sshll.u32 %s4316_s20, 4  ;;  %p4231_p6 = scmp.ne.s32.totalorder %s7792_s9, %s4230_s17  ;;  %s96_s14 = int_to_ptr.vmem [resolvable:$true] %s95_s14 }
  0x6a   :  { %p4234_p7 = scmp.lt.u32.totalorder %s4230_s17, %s7792_s9 }
  0x6c   :  { %p4236_p8 = pnand %p4234_p7, %p4231_p6 }
  0x6e   :  { %4239 = shalt.err (!%p4236_p8)
}
  0x6f   :  { %s4240_s3 = scalar_lea.vmem %s96_s14, 16  ;;  %s4244_s7 = scalar_lea.vmem %s96_s14, 32 }
  0x70   :  { %p4241_p9 = scmp.ne.s32.totalorder %s96_s14, %s4240_s3  ;;  %p4245_p10 = scmp.lt.s32.totalorder %s96_s14, %s96_s14 }
  0x71   :  { %p4246_p11 = scmp.lt.s32.totalorder %s4244_s7, %s4240_s3 }
  0x73   :  { %p4247_p12 = por %p4246_p11, %p4245_p10 }
  0x75   :  { %p4248_p13 = pnand %p4247_p12, %p4241_p9 }
  0x77   :  { %4251 = shalt.err (!%p4248_p13)
}
  0x78   :  { %98 = dma.hbm_to_vmem [thread:$0]  %s7792_s9, 16, %s96_s14, [#allocation16]  }
  0x79   :  { %s4252_s26 = scalar_lea.hbm %s7793_s10, 16 }
  0x7a   :  { %p4253_p0 = scmp.ne.s32.totalorder %s7793_s10, %s4252_s26  ;;  %p4256_p1 = scmp.lt.u32.totalorder %s4252_s26, %s7793_s10 }
  0x7c   :  { %p4258_p2 = pnand %p4256_p1, %p4253_p0 }
  0x7e   :  { %4261 = shalt.err (!%p4258_p2)
}
  0x7f   :  { %s4317_s30 = smov [#allocation18]  }
  0x80   :  { %106 = dma.hbm_to_smem %s7793_s10, 16, %s4317_s30, [#allocation8]  }
  0x81   :  { %4278 = dma.done.wait [#allocation7], 2048  }
  0x82   :  { %4279 = vsyncadd [#allocation7], 4294965248 }
  0x83   :  { %4280 = dma.done.wait [#allocation10], 64  }
  0x84   :  { %4281 = vsyncadd [#allocation10], 4294967232 }
  0x85   :  { %4282 = dma.done.wait [#allocation13], 1040  }
  0x86   :  { %4283 = vsyncadd [#allocation13], 4294966256 }
  0x87   :  { %4284 = dma.done.wait [#allocation16], 32  }
  0x88   :  { %4285 = vsyncadd [#allocation16], 4294967264 }
  0x89   :  { %4286 = dma.done.wait [#allocation8], 16  }
  0x8a   :  { %4287 = vsyncadd [#allocation8], 4294967280 }
  0x8b   :  { %131 = sfence }
  0x8c   :  { %s137_s9 = sld [smem:[#allocation0]]   ;;  %s4318_s20 = smov [#allocation2]   ;;  %v4319_v0 = vmov 0   ;;  %v7795_v2 = vlaneseq  ;;  %vm2900_vm0 = vcmask 7168  }
  0x8d   :  { %s145_s14 = sshll.u32 %s4318_s20, 4  ;;  %3996 = vset.pattern.permute.xlu0 %v4319_v0  ;;  %739 = vmatprep.subr.bf16.mxu0 %v4319_v0  ;;  %s4320_s10 = smov 256   ;;  %s146_s14 = int_to_ptr.vmem [resolvable:$true] %s145_s14 }
  0x8e   :  { %149 = sst [smem:[#allocation20]] %s4320_s10  ;;  %3912 = vmatprep.subr.bf16.mxu1 %v4319_v0  ;;  %3997 = vset.pattern.permute.xlu1 %v4319_v0  ;;  %s4321_s15 = smov 2   ;;  %v4518_v6 = vshrl.u32 %v7795_v2, 7 }
  0x8f   :  { %151 = sst [smem:[#allocation20 + $0x1]] %s4320_s10  ;;  %s4322_s17 = smov 128  }
  0x90   :  { %153 = sst [smem:[#allocation20 + $0x2]] %s4321_s15  ;;  %s4323_s25 = smov [#allocation3]   ;;  %v4523_v8 = vsub.s32 0, %v4518_v6  ;;  %v7796_v9 = vsub.s32 1, %v4518_v6 }
  0x91   :  { %155 = sst [smem:[#allocation20 + $0x3]] %s4310_s8  ;;  %s4324_s19 = smov [#allocation19]  }
  0x92   :  { %s3507_s16 = sshll.u32 %s137_s9, 26  ;;  %157 = sst [smem:[#allocation20 + $0x4]] %s4322_s17 }
  0x93   :  { %s3508_s2 = sadd.s32 134217728, %s3507_s16  ;;  %159 = sst [smem:[#allocation20 + $0x5]] %s4321_s15 }
  0x94   :  { %161 = sst [smem:[#allocation20 + $0x6]] %s4322_s17 }
  0x95   :  { %163 = sst [smem:[#allocation20 + $0x7]] %s4310_s8 }
  0x96   :  { %165 = sst [smem:[#allocation20 + $0x8]] %s4311_s23 }
  0x97   :  { %167 = dma.general %s7788_s5, 129024, %s146_s14, %s4323_s25, %s4324_s19, [#allocation20], %s3508_s2, 0  }
  0x98   :  { %v231_v1 = vld [vmem:[%s7784_s1] sm:$0xff]  ;;  %v3998_v3 = vld [vmem:[#allocation6] sm:$0xff]   ;;  %v232_v4 = vld [vmem:[%s7784_s1 + $0x8] sm:$0xff]  ;;  %8035 = vst [vmem:[#allocation27_spill] sm:$0xff] %v4518_v6  ;;  %s3652_s27 = sld [smem:[#allocation18 + $0x1]] }
  0x99   :  { %1161 = vperm.xlu0 %3996, %v231_v1   ;;  %740 = vmatpush1.bf16.msra.mxu0 %v3998_v3  ;;  %v3999_v5 = vld [vmem:[#allocation6 + $0x8] sm:$0xff]   ;;  %v4000_v7 = vld [vmem:[#allocation6 + $0x10] sm:$0xff]   ;;  %8036 = vst [vmem:[#allocation28_spill] sm:$0xff] %v4523_v8  ;;  %v2315_v10 = vld [vmem:[#allocation9] sm:$0x3] }
  0x9a   :  { %3928 = vmatpush1.bf16.msra.mxu1 %v3998_v3  ;;  %741 = vmatprep.subr.bf16.mxu0 %v4319_v0  ;;  %v4001_v11 = vld [vmem:[#allocation6 + $0x18] sm:$0xff]   ;;  %v4536_v13 = vld [vmem:[%s7783_s0] sm:$0xff]  ;;  %v4539_v14 = vrot.slane %v2315_v10, %v4523_v8  ;;  %v4543_v15 = vrot.slane %v2315_v10, %v7796_v9  ;;  %v4002_v20 = vld [vmem:[#allocation6 + $0x20] sm:$0xff]  }
  0x9b   :  { %3913 = vmatprep.subr.bf16.mxu1 %v4319_v0  ;;  %v4530_v12 = vld [vmem:[%s7783_s0 + $0x8] sm:$0xff]  ;;  %v4551_v18 = vld [vmem:[%s7783_s0 + $0x20] sm:$0xff]  ;;  %v4561_v24 = vld [vmem:[%s7783_s0 + $0x30] sm:$0xff]  ;;  %v2189_v46 = vunpack.c.l.bf16 %v4536_v13  ;;  %v2190_v47 = vunpack.c.h.bf16 %v4536_v13 }
  0x9c   :  { %v2191_v16 = vunpack.c.l.bf16 %v4530_v12  ;;  %v2192_v17 = vunpack.c.h.bf16 %v4530_v12  ;;  %v3510_v19 = vcombine.high %v4536_v13, %v4530_v12  ;;  %v2197_v23 = vunpack.c.l.bf16 %v4551_v18  ;;  %v4569_v28 = vld [vmem:[%s7783_s0 + $0x40] sm:$0xff]  ;;  %v4582_v37 = vld [vmem:[%s7783_s0 + $0x50] sm:$0xff]  ;;  %v4621_v60 = vld [vmem:[%s7783_s0 + $0x18] sm:$0xff] }
  0x9d   :  { %1166 = vperm.xlu0 %3996, %v232_v4   ;;  %742 = vmatpush1.bf16.msra.mxu0 %v3999_v5  ;;  %v2198_v26 = vunpack.c.h.bf16 %v4551_v18  ;;  %v2201_v30 = vunpack.c.l.bf16 %v4561_v24  ;;  %v2202_v31 = vunpack.c.h.bf16 %v4561_v24  ;;  %v4003_v32 = vld [vmem:[#allocation6 + $0x28] sm:$0xff]   ;;  %v2205_v36 = vunpack.c.l.bf16 %v4569_v28  ;;  %v4004_v42 = vld [vmem:[#allocation6 + $0x30] sm:$0xff]   ;;  %v4601_v48 = vld [vmem:[%s7783_s0 + $0x10] sm:$0xff] }
  0x9e   :  { %3929 = vmatpush1.bf16.msra.mxu1 %v3999_v5  ;;  %743 = vmatprep.subr.bf16.mxu0 %v4319_v0  ;;  %v2329_v21 = vmul.f32 %v4539_v14, %v2191_v16  ;;  %v2330_v22 = vmul.f32 %v4543_v15, %v2192_v17  ;;  %v2335_v27 = vmul.f32 %v4539_v14, %v2197_v23  ;;  %v2206_v38 = vunpack.c.h.bf16 %v4569_v28  ;;  %v4590_v41 = vld [vmem:[%s7783_s0 + $0x60] sm:$0xff]  ;;  %v4005_v54 = vld [vmem:[#allocation6 + $0x38] sm:$0xff]   ;;  %v4006_v4 = vld [vmem:[#allocation6 + $0x40] sm:$0xff]  }
  0x9f   :  { %3914 = vmatprep.subr.bf16.mxu1 %v4319_v0  ;;  %771 = vmatprep.mubr.bf16.mxu0 %v3510_v19  ;;  %v2336_v29 = vmul.f32 %v4543_v15, %v2198_v26  ;;  %v2339_v34 = vmul.f32 %v4539_v14, %v2201_v30  ;;  %v2340_v35 = vmul.f32 %v4543_v15, %v2202_v31  ;;  %v2209_v44 = vunpack.c.l.bf16 %v4582_v37  ;;  %v4613_v57 = vld [vmem:[%s7783_s0 + $0x70] sm:$0xff]  ;;  %v4633_v10 = vld [vmem:[%s7783_s0 + $0x80] sm:$0xff]  ;;  %v4641_v19 = vld [vmem:[%s7783_s0 + $0x28] sm:$0xff] }
  0xa0   :  { %v2456_v25 = vadd.f32 %v2330_v22, %v2329_v21  ;;  %v2343_v40 = vmul.f32 %v4539_v14, %v2205_v36  ;;  %v2344_v43 = vmul.f32 %v4543_v15, %v2206_v38  ;;  %v2210_v45 = vunpack.c.h.bf16 %v4582_v37  ;;  %v4651_v26 = vld [vmem:[%s7783_s0 + $0x90] sm:$0xff]  ;;  %v5525_v6 = vld [vmem:[%s7784_s1 + $0xd8] sm:$0xff]  ;;  %v5532_v8 = vld [vmem:[%s7784_s1 + $0x120] sm:$0xff] }
  0xa1   :  { %744 = vmatpush1.bf16.msra.mxu0 %v4000_v7  ;;  %v2465_v33 = vadd.f32 %v2336_v29, %v2335_v27  ;;  %v2471_v39 = vadd.f32 %v2340_v35, %v2339_v34  ;;  %v2213_v49 = vunpack.c.l.bf16 %v4590_v41  ;;  %v2347_v51 = vmul.f32 %v4539_v14, %v2209_v44  ;;  %v4007_v27 = vld [vmem:[#allocation6 + $0x48] sm:$0xff]   ;;  %8068 = vst [vmem:[#allocation56_spill] sm:$0xff] %v5525_v6 }
  0xa2   :  { %3930 = vmatpush1.bf16.msra.mxu1 %v4000_v7  ;;  %745 = vmatprep.subr.bf16.mxu0 %v4319_v0  ;;  %v2477_v50 = vadd.f32 %v2344_v43, %v2343_v40  ;;  %v2348_v52 = vmul.f32 %v4543_v15, %v2210_v45  ;;  %v2214_v53 = vunpack.c.h.bf16 %v4590_v41  ;;  %v2193_v55 = vunpack.c.l.bf16 %v4601_v48  ;;  %v4661_v34 = vld [vmem:[%s7783_s0 + $0x38] sm:$0xff]  ;;  %v4672_v45 = vld [vmem:[%s7783_s0 + $0xa0] sm:$0xff]  ;;  %8069 = vst [vmem:[#allocation57_spill] sm:$0xff] %v5532_v8 }
  0xa3   :  { %3915 = vmatprep.subr.bf16.mxu1 %v4319_v0  ;;  %2457 = vadd.xlane.f32.xlu1 %v2456_v25  ;;  %v2194_v56 = vunpack.c.h.bf16 %v4601_v48  ;;  %v2327_v58 = vmul.f32 %v4539_v14, %v2189_v46  ;;  %v2328_v59 = vmul.f32 %v4543_v15, %v2190_v47  ;;  %v2351_v61 = vmul.f32 %v4539_v14, %v2213_v49 }
  0xa4   :  { %v2352_v62 = vmul.f32 %v4543_v15, %v2214_v53  ;;  %v2483_v63 = vadd.f32 %v2348_v52, %v2347_v51  ;;  %v2217_v1 = vunpack.c.l.bf16 %v4613_v57  ;;  %v2218_v3 = vunpack.c.h.bf16 %v4613_v57 }
  0xa5   :  { %746 = vmatpush1.bf16.msra.mxu0 %v4001_v11  ;;  %v2331_v5 = vmul.f32 %v4539_v14, %v2193_v55  ;;  %v2332_v7 = vmul.f32 %v4543_v15, %v2194_v56  ;;  %v2195_v16 = vunpack.c.l.bf16 %v4621_v60  ;;  %v2196_v17 = vunpack.c.h.bf16 %v4621_v60  ;;  %v4009_v56 = vld [vmem:[#allocation6 + $0x58] sm:$0xff]  }
  0xa6   :  { %747 = vmatprep.subr.bf16.mxu0 %v4319_v0  ;;  %3931 = vmatpush1.bf16.msra.mxu1 %v4001_v11  ;;  %v2453_v11 = vadd.f32 %v2328_v59, %v2327_v58  ;;  %v2355_v21 = vmul.f32 %v4539_v14, %v2217_v1  ;;  %v2356_v22 = vmul.f32 %v4543_v15, %v2218_v3  ;;  %v2221_v23 = vunpack.c.l.bf16 %v4633_v10  ;;  %v4701_v3 = vld [vmem:[%s7783_s0 + $0x58] sm:$0xff] }
  0xa7   :  { %3916 = vmatprep.subr.bf16.mxu1 %v4319_v0  ;;  %2466 = vadd.xlane.f32.xlu1 %v2465_v33  ;;  %v2222_v25 = vunpack.c.h.bf16 %v4633_v10  ;;  %v2459_v29 = vadd.f32 %v2332_v7, %v2331_v5  ;;  %v2333_v30 = vmul.f32 %v4539_v14, %v2195_v16  ;;  %v2334_v31 = vmul.f32 %v4543_v15, %v2196_v17  ;;  %v4710_v17 = vld [vmem:[%s7783_s0 + $0xc0] sm:$0xff] }
  0xa8   :  { %v2200_v33 = vunpack.c.h.bf16 %v4641_v19  ;;  %v2225_v35 = vunpack.c.l.bf16 %v4651_v26  ;;  %v2226_v36 = vunpack.c.h.bf16 %v4651_v26  ;;  %v2495_v38 = vadd.f32 %v2356_v22, %v2355_v21 }
  0xa9   :  { %748 = vmatpush1.bf16.msra.mxu0 %v4002_v20  ;;  %v2360_v40 = vmul.f32 %v4543_v15, %v2222_v25  ;;  %v2203_v43 = vunpack.c.l.bf16 %v4661_v34  ;;  %v2204_v44 = vunpack.c.h.bf16 %v4661_v34  ;;  %v2462_v46 = vadd.f32 %v2334_v31, %v2333_v30 }
  0xaa   :  { %749 = vmatprep.subr.bf16.mxu0 %v4319_v0  ;;  %3932 = vmatpush1.bf16.msra.mxu1 %v4002_v20  ;;  %v2489_v20 = vadd.f32 %v2352_v62, %v2351_v61  ;;  %v2338_v49 = vmul.f32 %v4543_v15, %v2200_v33  ;;  %v2363_v51 = vmul.f32 %v4539_v14, %v2225_v35  ;;  %v2230_v55 = vunpack.c.h.bf16 %v4672_v45  ;;  %v4693_v61 = vld [vmem:[%s7783_s0 + $0xb0] sm:$0xff] }
  0xab   :  { %3917 = vmatprep.subr.bf16.mxu1 %v4319_v0  ;;  %2472 = vadd.xlane.f32.xlu1 %v2471_v39  ;;  %v2359_v39 = vmul.f32 %v4539_v14, %v2221_v23  ;;  %v2364_v52 = vmul.f32 %v4543_v15, %v2226_v36  ;;  %v2341_v58 = vmul.f32 %v4539_v14, %v2203_v43  ;;  %v2234_v16 = vunpack.c.h.bf16 %v4693_v61  ;;  %v4011_v36 = vld [vmem:[#allocation6 + $0x68] sm:$0xff]  }
  0xac   :  { %v2342_v59 = vmul.f32 %v4543_v15, %v2204_v44  ;;  %v2368_v7 = vmul.f32 %v4543_v15, %v2230_v55  ;;  %v2211_v25 = vunpack.c.l.bf16 %v4701_v3  ;;  %v2237_v30 = vunpack.c.l.bf16 %v4710_v17  ;;  %v4012_v55 = vld [vmem:[#allocation6 + $0x70] sm:$0xff]  }
  0xad   :  { %750 = vmatpush1.bf16.msra.mxu0 %v4003_v32  ;;  %v2501_v53 = vadd.f32 %v2360_v40, %v2359_v39  ;;  %v2372_v33 = vmul.f32 %v4543_v15, %v2234_v16  ;;  %v2238_v35 = vunpack.c.h.bf16 %v4710_v17  ;;  %v4733_v40 = vld [vmem:[%s7783_s0 + $0xd0] sm:$0xff] }
  0xae   :  { %751 = vmatprep.subr.bf16.mxu0 %v4319_v0  ;;  %3933 = vmatpush1.bf16.msra.mxu1 %v4003_v32  ;;  %v2199_v32 = vunpack.c.l.bf16 %v4641_v19  ;;  %v2474_v21 = vadd.f32 %v2342_v59, %v2341_v58  ;;  %v2349_v43 = vmul.f32 %v4539_v14, %v2211_v25 }
  0xaf   :  { %3918 = vmatprep.subr.bf16.mxu1 %v4319_v0  ;;  %2478 = vadd.xlane.f32.xlu1 %v2477_v50  ;;  %v4681_v50 = vld [vmem:[%s7783_s0 + $0x48] sm:$0xff] }
  0xb0   :  { %v2337_v47 = vmul.f32 %v4539_v14, %v2199_v32  ;;  %v2208_v1 = vunpack.c.h.bf16 %v4681_v50 }
  0xb1   :  { %752 = vmatpush1.bf16.msra.mxu0 %v4004_v42 }
  0xb2   :  { %753 = vmatprep.subr.bf16.mxu0 %v4319_v0  ;;  %3934 = vmatpush1.bf16.msra.mxu1 %v4004_v42  ;;  %v4008_v42 = vld [vmem:[#allocation6 + $0x50] sm:$0xff]   ;;  %v2468_v62 = vadd.f32 %v2338_v49, %v2337_v47  ;;  %v2346_v23 = vmul.f32 %v4543_v15, %v2208_v1  ;;  %v2375_v47 = vmul.f32 %v4539_v14, %v2237_v30 }
  0xb3   :  { %3919 = vmatprep.subr.bf16.mxu1 %v4319_v0  ;;  %2484 = vadd.xlane.f32.xlu1 %v2483_v63  ;;  %v2207_v63 = vunpack.c.l.bf16 %v4681_v50  ;;  %v4761_v1 = vld [vmem:[%s7783_s0 + $0x88] sm:$0xff] }
  0xb4   :  { %v2224_v30 = vunpack.c.h.bf16 %v4761_v1 }
  0xb5   :  { %754 = vmatpush1.bf16.msra.mxu0 %v4005_v54  ;;  %v2345_v22 = vmul.f32 %v4539_v14, %v2207_v63 }
  0xb6   :  { %755 = vmatprep.subr.bf16.mxu0 %v4319_v0  ;;  %3935 = vmatpush1.bf16.msra.mxu1 %v4005_v54  ;;  %v2229_v54 = vunpack.c.l.bf16 %v4672_v45 }
  0xb7   :  { %3920 = vmatprep.subr.bf16.mxu1 %v4319_v0  ;;  %2490 = vadd.xlane.f32.xlu1 %v2489_v20  ;;  %v4010_v20 = vld [vmem:[#allocation6 + $0x60] sm:$0xff]  }
  0xb8   :  { %v2367_v5 = vmul.f32 %v4539_v14, %v2229_v54  ;;  %v4750_v54 = vld [vmem:[%s7783_s0 + $0xe0] sm:$0xff] }
  0xb9   :  { %756 = vmatpush1.bf16.msra.mxu0 %v4006_v4 }
  0xba   :  { %757 = vmatprep.subr.bf16.mxu0 %v4319_v0  ;;  %3936 = vmatpush1.bf16.msra.mxu1 %v4006_v4  ;;  %v2507_v4 = vadd.f32 %v2364_v52, %v2363_v51  ;;  %v2513_v31 = vadd.f32 %v2368_v7, %v2367_v5  ;;  %v2376_v51 = vmul.f32 %v4543_v15, %v2238_v35  ;;  %v2241_v52 = vunpack.c.l.bf16 %v4733_v40 }
  0xbb   :  { %3921 = vmatprep.subr.bf16.mxu1 %v4319_v0  ;;  %2496 = vadd.xlane.f32.xlu1 %v2495_v38  ;;  %v2246_v5 = vunpack.c.h.bf16 %v4750_v54  ;;  %v3509_v35 = vcombine.low %v4536_v13, %v4530_v12  ;;  %v200_v12 = vld [vmem:[%s7783_s0 + $0x100] sm:$0xff] }
  0xbc   :  { %2454 = vadd.xlane.f32.xlu0 %v2453_v11  ;;  %v2233_v11 = vunpack.c.l.bf16 %v4693_v61  ;;  %v2525_v7 = vadd.f32 %v2376_v51, %v2375_v47 }
  0xbd   :  { %758 = vmatpush1.bf16.msra.mxu0 %v4007_v27 }
  0xbe   :  { %759 = vmatprep.subr.bf16.mxu0 %v4319_v0  ;;  %3937 = vmatpush1.bf16.msra.mxu1 %v4007_v27  ;;  %v2212_v27 = vunpack.c.h.bf16 %v4701_v3  ;;  %v2371_v32 = vmul.f32 %v4539_v14, %v2233_v11  ;;  %v2379_v11 = vmul.f32 %v4539_v14, %v2241_v52 }
  0xbf   :  { %3922 = vmatprep.subr.bf16.mxu1 %v4319_v0  ;;  %2502 = vadd.xlane.f32.xlu1 %v2501_v53  ;;  %v2242_v53 = vunpack.c.h.bf16 %v4733_v40 }
  0xc0   :  { %2460 = vadd.xlane.f32.xlu0 %v2459_v29  ;;  %v4721_v29 = vld [vmem:[%s7783_s0 + $0x68] sm:$0xff]  ;;  %v2350_v44 = vmul.f32 %v4543_v15, %v2212_v27  ;;  %v2519_v49 = vadd.f32 %v2372_v33, %v2371_v32  ;;  %v2223_v27 = vunpack.c.l.bf16 %v4761_v1  ;;  %v2384_v33 = vmul.f32 %v4543_v15, %v2246_v5 }
  0xc1   :  { %760 = vmatpush1.bf16.msra.mxu0 %v4008_v42  ;;  %v2215_v38 = vunpack.c.l.bf16 %v4721_v29  ;;  %v2216_v39 = vunpack.c.h.bf16 %v4721_v29  ;;  %v2380_v16 = vmul.f32 %v4543_v15, %v2242_v53 }
  0xc2   :  { %761 = vmatprep.subr.bf16.mxu0 %v4319_v0  ;;  %3938 = vmatpush1.bf16.msra.mxu1 %v4008_v42  ;;  %v2480_v42 = vadd.f32 %v2346_v23, %v2345_v22  ;;  %v2486_v59 = vadd.f32 %v2350_v44, %v2349_v43  ;;  %v4771_v22 = vld [vmem:[%s7783_s0 + $0xf0] sm:$0xff]  ;;  %v2361_v47 = vmul.f32 %v4539_v14, %v2223_v27 }
  0xc3   :  { %3923 = vmatprep.subr.bf16.mxu1 %v4319_v0  ;;  %2508 = vadd.xlane.f32.xlu1 %v2507_v4  ;;  %v2354_v58 = vmul.f32 %v4543_v15, %v2216_v39  ;;  %v2245_v4 = vunpack.c.l.bf16 %v4750_v54  ;;  %v2250_v39 = vunpack.c.h.bf16 %v4771_v22 }
  0xc4   :  { %2463 = vadd.xlane.f32.xlu0 %v2462_v46  ;;  %v4741_v46 = vld [vmem:[%s7783_s0 + $0x78] sm:$0xff] }
  0xc5   :  { %762 = vmatpush1.bf16.msra.mxu0 %v4009_v56  ;;  %v2220_v63 = vunpack.c.h.bf16 %v4741_v46  ;;  %v2383_v32 = vmul.f32 %v4539_v14, %v2245_v4  ;;  %v2388_v53 = vmul.f32 %v4543_v15, %v2250_v39 }
  0xc6   :  { %763 = vmatprep.subr.bf16.mxu0 %v4319_v0  ;;  %3939 = vmatpush1.bf16.msra.mxu1 %v4009_v56  ;;  %v2353_v56 = vmul.f32 %v4539_v14, %v2215_v38  ;;  %v2249_v38 = vunpack.c.l.bf16 %v4771_v22 }
  0xc7   :  { %3924 = vmatprep.subr.bf16.mxu1 %v4319_v0  ;;  %2514 = vadd.xlane.f32.xlu1 %v2513_v31  ;;  %v2358_v25 = vmul.f32 %v4543_v15, %v2220_v63  ;;  %v4781_v31 = vld [vmem:[%s7783_s0 + $0x98] sm:$0xff]  ;;  %v2537_v51 = vadd.f32 %v2384_v33, %v2383_v32  ;;  %v4838_v33 = vld [vmem:[%s7783_s0 + $0x120] sm:$0xff] }
  0xc8   :  { %2469 = vadd.xlane.f32.xlu0 %v2468_v62  ;;  %v2219_v62 = vunpack.c.l.bf16 %v4741_v46  ;;  %v2227_v43 = vunpack.c.l.bf16 %v4781_v31  ;;  %v2228_v44 = vunpack.c.h.bf16 %v4781_v31  ;;  %v2387_v52 = vmul.f32 %v4539_v14, %v2249_v38 }
  0xc9   :  { %764 = vmatpush1.bf16.msra.mxu0 %v4010_v20 }
  0xca   :  { %765 = vmatprep.subr.bf16.mxu0 %v4319_v0  ;;  %3940 = vmatpush1.bf16.msra.mxu1 %v4010_v20  ;;  %v4013_v20 = vld [vmem:[#allocation6 + $0x78] sm:$0xff]   ;;  %v2357_v23 = vmul.f32 %v4539_v14, %v2219_v62  ;;  %v2366_v62 = vmul.f32 %v4543_v15, %v2228_v44 }
  0xcb   :  { %3925 = vmatprep.subr.bf16.mxu1 %v4319_v0  ;;  %2520 = vadd.xlane.f32.xlu1 %v2519_v49  ;;  %v2362_v49 = vmul.f32 %v4543_v15, %v2224_v30 }
  0xcc   :  { %2475 = vadd.xlane.f32.xlu0 %v2474_v21  ;;  %v2492_v21 = vadd.f32 %v2354_v58, %v2353_v56  ;;  %v2498_v13 = vadd.f32 %v2358_v25, %v2357_v23  ;;  %v2254_v56 = vunpack.c.h.bf16 %v200_v12  ;;  %v4809_v58 = vld [vmem:[%s7783_s0 + $0x110] sm:$0xff]  ;;  %v2543_v25 = vadd.f32 %v2388_v53, %v2387_v52 }
  0xcd   :  { %766 = vmatpush1.bf16.msra.mxu0 %v4011_v36  ;;  %v2504_v63 = vadd.f32 %v2362_v49, %v2361_v47  ;;  %v2261_v47 = vunpack.c.l.bf16 %v4838_v33  ;;  %v2262_v49 = vunpack.c.h.bf16 %v4838_v33  ;;  %v4863_v53 = vld [vmem:[%s7783_s0 + $0x130] sm:$0xff] }
  0xce   :  { %767 = vmatprep.subr.bf16.mxu0 %v4319_v0  ;;  %3941 = vmatpush1.bf16.msra.mxu1 %v4011_v36  ;;  %v2531_v36 = vadd.f32 %v2380_v16, %v2379_v11  ;;  %v3511_v11 = vcombine.low %v4601_v48, %v4621_v60  ;;  %v4825_v16 = vld [vmem:[%s7783_s0 + $0xb8] sm:$0xff]  ;;  %v2392_v30 = vmul.f32 %v4543_v15, %v2254_v56 }
  0xcf   :  { %3926 = vmatprep.subr.bf16.mxu1 %v4319_v0  ;;  %2526 = vadd.xlane.f32.xlu1 %v2525_v7  ;;  %v4818_v7 = vld [vmem:[%s7783_s0 + $0x108] sm:$0xff]  ;;  %v2235_v38 = vunpack.c.l.bf16 %v4825_v16  ;;  %v2236_v39 = vunpack.c.h.bf16 %v4825_v16 }
  0xd0   :  { %2481 = vadd.xlane.f32.xlu0 %v2480_v42  ;;  %v3512_v42 = vcombine.high %v4601_v48, %v4621_v60  ;;  %v3542_v23 = vcombine.high %v200_v12, %v4818_v7  ;;  %v3541_v32 = vcombine.low %v200_v12, %v4818_v7  ;;  %v3514_v60 = vcombine.high %v4551_v18, %v4641_v19 }
  0xd1   :  { %768 = vmatpush1.bf16.msra.mxu0 %v4012_v55 }
  0xd2   :  { %769 = vmatprep.subr.bf16.mxu0 %v4319_v0  ;;  %3942 = vmatpush1.bf16.msra.mxu1 %v4012_v55  ;;  %v2253_v55 = vunpack.c.l.bf16 %v200_v12 }
  0xd3   :  { %3927 = vmatprep.subr.bf16.mxu1 %v4319_v0  ;;  %v4802_v0 = vld [vmem:[%s7783_s0 + $0xa8] sm:$0xff]  ;;  %2532 = vadd.xlane.f32.xlu1 %v2531_v36 }
  0xd4   :  { %2487 = vadd.xlane.f32.xlu0 %v2486_v59  ;;  %v2365_v59 = vmul.f32 %v4539_v14, %v2227_v43  ;;  %v2231_v4 = vunpack.c.l.bf16 %v4802_v0  ;;  %v2232_v5 = vunpack.c.h.bf16 %v4802_v0  ;;  %v2391_v27 = vmul.f32 %v4539_v14, %v2253_v55  ;;  %899 = vmatprep.mubr.bf16.mxu1 %v3542_v23 }
  0xd5   :  { %770 = vmatpush1.bf16.msra.mxu0 %v4013_v20  ;;  %v2400_v23 = vmul.f32 %v4543_v15, %v2262_v49  ;;  %v4914_v49 = vld [vmem:[%s7783_s0 + $0x150] sm:$0xff] }
  0xd6   :  { %3943 = vmatpush1.bf16.msra.mxu1 %v4013_v20  ;;  %v2257_v20 = vunpack.c.l.bf16 %v4809_v58  ;;  %v2510_v48 = vadd.f32 %v2366_v62, %v2365_v59  ;;  %v2370_v36 = vmul.f32 %v4543_v15, %v2232_v5  ;;  %v2549_v12 = vadd.f32 %v2392_v30, %v2391_v27 }
  0xd7   :  { %2538 = vadd.xlane.f32.xlu1 %v2537_v51  ;;  %v2373_v59 = vmul.f32 %v4539_v14, %v2235_v38  ;;  %v2374_v62 = vmul.f32 %v4543_v15, %v2236_v39  ;;  %v3513_v5 = vcombine.low %v4551_v18, %v4641_v19  ;;  %v2266_v27 = vunpack.c.h.bf16 %v4863_v53 }
  0xd8   :  { %2493 = vadd.xlane.f32.xlu0 %v2492_v21  ;;  %772 = vmatmul.mubr.bf16.vlgmr.msra.gmra.mrb[0].mxu0 %v3509_v35  ;;  %v2258_v21 = vunpack.c.h.bf16 %v4809_v58  ;;  %v2369_v35 = vmul.f32 %v4539_v14, %v2231_v4  ;;  %v2395_v43 = vmul.f32 %v4539_v14, %v2257_v20 }
  0xd9   :  { %779 = vmatprep.mubr.bf16.mxu0 %v3512_v42  ;;  %v4847_v42 = vld [vmem:[%s7783_s0 + $0xc8] sm:$0xff]  ;;  %900 = vmatmul.mubr.bf16.vlgmr.msra.gmra.mrb[0].mxu1 %v3541_v32  ;;  %v3527_v32 = vcombine.low %v4651_v26, %v4781_v31 }
  0xda   :  { %v2396_v44 = vmul.f32 %v4543_v15, %v2258_v21  ;;  %v2239_v51 = vunpack.c.l.bf16 %v4847_v42  ;;  %v2240_v52 = vunpack.c.h.bf16 %v4847_v42  ;;  %v2516_v56 = vadd.f32 %v2370_v36, %v2369_v35  ;;  %v4898_v35 = vld [vmem:[%s7783_s0 + $0x128] sm:$0xff] }
  0xdb   :  { %2544 = vadd.xlane.f32.xlu1 %v2543_v25  ;;  %v2399_v21 = vmul.f32 %v4539_v14, %v2261_v47  ;;  %v2265_v25 = vunpack.c.l.bf16 %v4863_v53  ;;  %v4903_v36 = vld [vmem:[%s7783_s0 + $0xe8] sm:$0xff]  ;;  %v2404_v47 = vmul.f32 %v4543_v15, %v2266_v27  ;;  %v4937_v27 = vld [vmem:[%s7783_s0 + $0x138] sm:$0xff] }
  0xdc   :  { %2499 = vadd.xlane.f32.xlu0 %v2498_v13  ;;  %v4854_v13 = vld [vmem:[%s7783_s0 + $0x118] sm:$0xff]  ;;  %v2555_v20 = vadd.f32 %v2396_v44, %v2395_v43  ;;  %v2377_v18 = vmul.f32 %v4539_v14, %v2239_v51  ;;  %v2378_v19 = vmul.f32 %v4543_v15, %v2240_v52  ;;  %v3546_v43 = vcombine.high %v4838_v33, %v4898_v35 }
  0xdd   :  { %v3544_v55 = vcombine.high %v4809_v58, %v4854_v13  ;;  %v3543_v4 = vcombine.low %v4809_v58, %v4854_v13  ;;  %v4887_v58 = vld [vmem:[%s7783_s0 + $0x140] sm:$0xff]  ;;  %v2561_v44 = vadd.f32 %v2400_v23, %v2399_v21  ;;  %v3529_v21 = vcombine.low %v4672_v45, %v4802_v0 }
  0xde   :  { %v2269_v38 = vunpack.c.l.bf16 %v4887_v58  ;;  %v2270_v39 = vunpack.c.h.bf16 %v4887_v58  ;;  %v2528_v51 = vadd.f32 %v2378_v19, %v2377_v18  ;;  %v3515_v23 = vcombine.low %v4561_v24, %v4661_v34 }
  0xdf   :  { %907 = vmatprep.mubr.bf16.mxu1 %v3544_v55  ;;  %2550 = vadd.xlane.f32.xlu1 %v2549_v12  ;;  %v2403_v12 = vmul.f32 %v4539_v14, %v2265_v25  ;;  %v3518_v18 = vcombine.high %v4569_v28, %v4681_v50  ;;  %v2267_v2 = vunpack.c.l.bf16 %v4937_v27  ;;  %v2268_v9 = vunpack.c.h.bf16 %v4937_v27 }
  0xe0   :  { %2505 = vadd.xlane.f32.xlu0 %v2504_v63  ;;  %780 = vmatmul.mubr.bf16.gmra.mrb[4].mxu0 %v3511_v11  ;;  %v4872_v63 = vld [vmem:[%s7783_s0 + $0xd8] sm:$0xff]  ;;  %v3516_v11 = vcombine.high %v4561_v24, %v4661_v34  ;;  %v4947_v24 = vld [vmem:[%s7783_s0 + $0x160] sm:$0xff]  ;;  %v3548_v34 = vcombine.high %v4863_v53, %v4937_v27 }
  0xe1   :  { %787 = vmatprep.mubr.bf16.mxu0 %v3514_v60  ;;  %v2243_v30 = vunpack.c.l.bf16 %v4872_v63  ;;  %v2244_v60 = vunpack.c.h.bf16 %v4872_v63  ;;  %908 = vmatmul.mubr.bf16.gmra.mrb[4].mxu1 %v3543_v4  ;;  %v3545_v4 = vcombine.low %v4838_v33, %v4898_v35  ;;  %v2567_v25 = vadd.f32 %v2404_v47, %v2403_v12  ;;  %v4959_v47 = vld [vmem:[%s7783_s0 + $0x170] sm:$0xff] }
  0xe2   :  { %915 = vmatprep.mubr.bf16.mxu1 %v3546_v43  ;;  %v2274_v33 = vunpack.c.h.bf16 %v4914_v49  ;;  %v2256_v43 = vunpack.c.h.bf16 %v4818_v7 }
  0xe3   :  { %2556 = vadd.xlane.f32.xlu1 %v2555_v20  ;;  %v2381_v52 = vmul.f32 %v4539_v14, %v2243_v30  ;;  %v2382_v55 = vmul.f32 %v4543_v15, %v2244_v60  ;;  %v2273_v20 = vunpack.c.l.bf16 %v4914_v49 }
  0xe4   :  { %2511 = vadd.xlane.f32.xlu0 %v2510_v48  ;;  %v2522_v48 = vadd.f32 %v2374_v62, %v2373_v59  ;;  %v2248_v59 = vunpack.c.h.bf16 %v4903_v36  ;;  %v4923_v62 = vld [vmem:[%s7783_s0 + $0xf8] sm:$0xff] }
  0xe5   :  { %v2251_v19 = vunpack.c.l.bf16 %v4923_v62  ;;  %v2252_v30 = vunpack.c.h.bf16 %v4923_v62  ;;  %v2411_v12 = vmul.f32 %v4539_v14, %v2273_v20  ;;  %v2281_v20 = vunpack.c.l.bf16 %v4959_v47 }
  0xe7   :  { %2562 = vadd.xlane.f32.xlu1 %v2561_v44 }
  0xe8   :  { %2517 = vadd.xlane.f32.xlu0 %v2516_v56  ;;  %788 = vmatmul.mubr.bf16.gmra.mrb[8].mxu0 %v3513_v5  ;;  %v2247_v56 = vunpack.c.l.bf16 %v4903_v36  ;;  %v2407_v5 = vmul.f32 %v4539_v14, %v2269_v38  ;;  %v2386_v38 = vmul.f32 %v4543_v15, %v2248_v59  ;;  %v2390_v59 = vmul.f32 %v4543_v15, %v2252_v30 }
  0xe9   :  { %795 = vmatprep.mubr.bf16.mxu0 %v3516_v11  ;;  %v2408_v11 = vmul.f32 %v4543_v15, %v2270_v39  ;;  %916 = vmatmul.mubr.bf16.gmra.mrb[8].mxu1 %v3545_v4  ;;  %v2255_v39 = vunpack.c.l.bf16 %v4818_v7  ;;  %v3532_v7 = vcombine.high %v4693_v61, %v4825_v16  ;;  %v3531_v4 = vcombine.low %v4693_v61, %v4825_v16 }
  0xea   :  { %v2385_v60 = vmul.f32 %v4539_v14, %v2247_v56  ;;  %923 = vmatprep.mubr.bf16.mxu1 %v3548_v34  ;;  %v2389_v56 = vmul.f32 %v4539_v14, %v2251_v19  ;;  %v2394_v19 = vmul.f32 %v4543_v15, %v2256_v43  ;;  %v2259_v34 = vunpack.c.l.bf16 %v4854_v13 }
  0xeb   :  { %v2573_v44 = vadd.f32 %v2408_v11, %v2407_v5  ;;  %2568 = vadd.xlane.f32.xlu1 %v2567_v25  ;;  %v4973_v11 = vld [vmem:[%s7783_s0 + $0x148] sm:$0xff]  ;;  %v3547_v25 = vcombine.low %v4863_v53, %v4937_v27  ;;  %v4991_v53 = vld [vmem:[%s7783_s0 + $0x180] sm:$0xff]  ;;  %v2419_v43 = vmul.f32 %v4539_v14, %v2281_v20  ;;  %v5059_v27 = vld [vmem:[%s7783_s0 + $0x1b0] sm:$0xff] }
  0xec   :  { %2523 = vadd.xlane.f32.xlu0 %v2522_v48  ;;  %v2534_v48 = vadd.f32 %v2382_v55, %v2381_v52  ;;  %v2277_v52 = vunpack.c.l.bf16 %v4947_v24  ;;  %v2278_v55 = vunpack.c.h.bf16 %v4947_v24  ;;  %v2540_v5 = vadd.f32 %v2386_v38, %v2385_v60 }
  0xed   :  { %v3550_v30 = vcombine.high %v4887_v58, %v4973_v11 }
  0xee   :  { %v2415_v60 = vmul.f32 %v4539_v14, %v2277_v52  ;;  %v2416_v38 = vmul.f32 %v4543_v15, %v2278_v55  ;;  %v2285_v52 = vunpack.c.l.bf16 %v4991_v53  ;;  %v2286_v55 = vunpack.c.h.bf16 %v4991_v53 }
  0xef   :  { %2574 = vadd.xlane.f32.xlu1 %v2573_v44 }
  0xf0   :  { %2529 = vadd.xlane.f32.xlu0 %v2528_v51  ;;  %796 = vmatmul.mubr.bf16.gmra.mrb[12].mxu0 %v3515_v23  ;;  %v2412_v51 = vmul.f32 %v4543_v15, %v2274_v33  ;;  %v2282_v23 = vunpack.c.h.bf16 %v4959_v47  ;;  %v3517_v33 = vcombine.low %v4569_v28, %v4681_v50  ;;  %v2546_v28 = vadd.f32 %v2390_v59, %v2389_v56 }
  0xf1   :  { %803 = vmatprep.mubr.bf16.mxu0 %v3518_v18  ;;  %v2393_v18 = vmul.f32 %v4539_v14, %v2255_v39  ;;  %v3520_v50 = vcombine.high %v4582_v37, %v4701_v3  ;;  %v2260_v39 = vunpack.c.h.bf16 %v4854_v13  ;;  %924 = vmatmul.mubr.bf16.gmra.mrb[12].mxu1 %v3547_v25  ;;  %v3533_v13 = vcombine.low %v4710_v17, %v4847_v42 }
  0xf2   :  { %v2420_v44 = vmul.f32 %v4543_v15, %v2282_v23  ;;  %931 = vmatprep.mubr.bf16.mxu1 %v3550_v30  ;;  %v2397_v59 = vmul.f32 %v4539_v14, %v2259_v34  ;;  %v2263_v23 = vunpack.c.l.bf16 %v4898_v35  ;;  %v3536_v25 = vcombine.high %v4733_v40, %v4872_v63 }
  0xf3   :  { %v2552_v56 = vadd.f32 %v2394_v19, %v2393_v18  ;;  %v2398_v20 = vmul.f32 %v4543_v15, %v2260_v39  ;;  %v3549_v19 = vcombine.low %v4887_v58, %v4973_v11  ;;  %v2423_v34 = vmul.f32 %v4539_v14, %v2285_v52 }
  0xf4   :  { %2535 = vadd.xlane.f32.xlu0 %v2534_v48  ;;  %v2579_v48 = vadd.f32 %v2412_v51, %v2411_v12  ;;  %v3534_v12 = vcombine.high %v4710_v17, %v4847_v42  ;;  %v3519_v51 = vcombine.low %v4582_v37, %v4701_v3  ;;  %v2264_v37 = vunpack.c.h.bf16 %v4898_v35  ;;  %v5013_v3 = vld [vmem:[%s7783_s0 + $0x190] sm:$0xff] }
  0xf5   :  { %v2591_v18 = vadd.f32 %v2420_v44, %v2419_v43  ;;  %v3535_v35 = vcombine.low %v4733_v40, %v4872_v63  ;;  %v2290_v58 = vunpack.c.h.bf16 %v5013_v3  ;;  %v2401_v44 = vmul.f32 %v4539_v14, %v2263_v23 }
  0xf6   :  { %2580 = vadd.xlane.f32.xlu1 %v2579_v48  ;;  %v2424_v48 = vmul.f32 %v4543_v15, %v2286_v55  ;;  %v2402_v52 = vmul.f32 %v4543_v15, %v2264_v37  ;;  %v3522_v55 = vcombine.high %v4590_v41, %v4721_v29 }
  0xf7   :  { %v2428_v43 = vmul.f32 %v4543_v15, %v2290_v58 }
  0xf8   :  { %2541 = vadd.xlane.f32.xlu0 %v2540_v5  ;;  %804 = vmatmul.mubr.bf16.gmra.mrb[16].mxu0 %v3517_v33  ;;  %v2585_v5 = vadd.f32 %v2416_v38, %v2415_v60  ;;  %v5020_v33 = vld [vmem:[%s7783_s0 + $0x158] sm:$0xff]  ;;  %v2597_v23 = vadd.f32 %v2424_v48, %v2423_v34  ;;  %v2564_v30 = vadd.f32 %v2402_v52, %v2401_v44 }
  0xf9   :  { %811 = vmatprep.mubr.bf16.mxu0 %v3520_v50  ;;  %v3552_v60 = vcombine.high %v4914_v49, %v5020_v33  ;;  %v5039_v50 = vld [vmem:[%s7783_s0 + $0x1a0] sm:$0xff]  ;;  %932 = vmatmul.mubr.bf16.gmra.mrb[16].mxu1 %v3549_v19  ;;  %v3551_v19 = vcombine.low %v4914_v49, %v5020_v33  ;;  %v3524_v49 = vcombine.high %v4613_v57, %v4741_v46 }
  0xfa   :  { %2586 = vadd.xlane.f32.xlu1 %v2585_v5  ;;  %v2558_v5 = vadd.f32 %v2398_v20, %v2397_v59  ;;  %v2293_v38 = vunpack.c.l.bf16 %v5039_v50  ;;  %v2294_v39 = vunpack.c.h.bf16 %v5039_v50  ;;  %v2405_v59 = vmul.f32 %v4539_v14, %v2267_v2 }
  0xfb   :  { %939 = vmatprep.mubr.bf16.mxu1 %v3552_v60  ;;  %v2272_v20 = vunpack.c.h.bf16 %v4973_v11  ;;  %v3521_v2 = vcombine.low %v4590_v41, %v4721_v29  ;;  %v2275_v29 = vunpack.c.l.bf16 %v5020_v33 }
  0xfc   :  { %2547 = vadd.xlane.f32.xlu0 %v2546_v28  ;;  %v2289_v28 = vunpack.c.l.bf16 %v5013_v3  ;;  %v2431_v34 = vmul.f32 %v4539_v14, %v2293_v38  ;;  %v2432_v48 = vmul.f32 %v4543_v15, %v2294_v39  ;;  %v5082_v38 = vld [vmem:[%s7783_s0 + $0x1c0] sm:$0xff] }
  0xfd   :  { %v2410_v41 = vmul.f32 %v4543_v15, %v2272_v20  ;;  %v215_v20 = vld [vmem:[%s7783_s0 + $0x178] sm:$0xff] }
  0xfe   :  { %2592 = vadd.xlane.f32.xlu1 %v2591_v18  ;;  %v2427_v37 = vmul.f32 %v4539_v14, %v2289_v28  ;;  %v213_v18 = vld [vmem:[%s7783_s0 + $0x168] sm:$0xff]  ;;  %v2298_v28 = vunpack.c.h.bf16 %v5059_v27  ;;  %v2609_v44 = vadd.f32 %v2432_v48, %v2431_v34 }
  0xff   :  { %v3554_v60 = vcombine.high %v4947_v24, %v213_v18 }
 0x100   :  { %2553 = vadd.xlane.f32.xlu0 %v2552_v56  ;;  %812 = vmatmul.mubr.bf16.gmra.mrb[20].mxu0 %v3519_v51  ;;  %v2271_v56 = vunpack.c.l.bf16 %v4973_v11  ;;  %v2406_v51 = vmul.f32 %v4543_v15, %v2268_v9  ;;  %v2603_v9 = vadd.f32 %v2428_v43, %v2427_v37  ;;  %v2297_v11 = vunpack.c.l.bf16 %v5059_v27 }
 0x101   :  { %819 = vmatprep.mubr.bf16.mxu0 %v3522_v55  ;;  %v2276_v43 = vunpack.c.h.bf16 %v5020_v33  ;;  %940 = vmatmul.mubr.bf16.gmra.mrb[20].mxu1 %v3551_v19  ;;  %v2436_v55 = vmul.f32 %v4543_v15, %v2298_v28  ;;  %v2279_v33 = vunpack.c.l.bf16 %v213_v18  ;;  %v2280_v37 = vunpack.c.h.bf16 %v213_v18 }
 0x102   :  { %2598 = vadd.xlane.f32.xlu1 %v2597_v23  ;;  %v2409_v58 = vmul.f32 %v4539_v14, %v2271_v56  ;;  %v2570_v39 = vadd.f32 %v2406_v51, %v2405_v59  ;;  %947 = vmatprep.mubr.bf16.mxu1 %v3554_v60  ;;  %v2435_v52 = vmul.f32 %v4539_v14, %v2297_v11  ;;  %v5094_v23 = vld [vmem:[%s7783_s0 + $0x1d0] sm:$0xff] }
 0x103   :  { %v2413_v59 = vmul.f32 %v4539_v14, %v2275_v29  ;;  %v2414_v51 = vmul.f32 %v4543_v15, %v2276_v43  ;;  %v3553_v19 = vcombine.low %v4947_v24, %v213_v18  ;;  %v2305_v34 = vunpack.c.l.bf16 %v5094_v23 }
 0x104   :  { %2559 = vadd.xlane.f32.xlu0 %v2558_v5  ;;  %v2301_v5 = vunpack.c.l.bf16 %v5082_v38  ;;  %v2576_v56 = vadd.f32 %v2410_v41, %v2409_v58  ;;  %v2306_v48 = vunpack.c.h.bf16 %v5094_v23  ;;  %v3556_v60 = vcombine.high %v4959_v47, %v215_v20  ;;  %v217_v41 = vld [vmem:[%s7783_s0 + $0x188] sm:$0xff] }
 0x105   :  { %v2417_v58 = vmul.f32 %v4539_v14, %v2279_v33  ;;  %v3526_v24 = vcombine.high %v4633_v10, %v4761_v1  ;;  %v2283_v18 = vunpack.c.l.bf16 %v215_v20  ;;  %v2443_v29 = vmul.f32 %v4539_v14, %v2305_v34  ;;  %v5129_v33 = vld [vmem:[%s7783_s0 + $0x1f0] sm:$0xff] }
 0x106   :  { %2604 = vadd.xlane.f32.xlu1 %v2603_v9  ;;  %v2615_v9 = vadd.f32 %v2436_v55, %v2435_v52  ;;  %v2439_v11 = vmul.f32 %v4539_v14, %v2301_v5  ;;  %v2444_v43 = vmul.f32 %v4543_v15, %v2306_v48  ;;  %v3525_v34 = vcombine.low %v4633_v10, %v4761_v1 }
 0x108   :  { %2565 = vadd.xlane.f32.xlu0 %v2564_v30  ;;  %820 = vmatmul.mubr.bf16.gmra.mrb[24].mxu0 %v3521_v2  ;;  %v2302_v30 = vunpack.c.h.bf16 %v5082_v38  ;;  %v3523_v2 = vcombine.low %v4613_v57, %v4741_v46  ;;  %v2582_v57 = vadd.f32 %v2414_v51, %v2413_v59  ;;  %v2284_v46 = vunpack.c.h.bf16 %v215_v20  ;;  %v5135_v51 = vld [vmem:[%s7783_s0 + $0x198] sm:$0xff] }
 0x109   :  { %827 = vmatprep.mubr.bf16.mxu0 %v3524_v49  ;;  %v2418_v49 = vmul.f32 %v4543_v15, %v2280_v37  ;;  %948 = vmatmul.mubr.bf16.gmra.mrb[24].mxu1 %v3553_v19  ;;  %v2288_v59 = vunpack.c.h.bf16 %v217_v41  ;;  %v3555_v19 = vcombine.low %v4959_v47, %v215_v20  ;;  %v2627_v48 = vadd.f32 %v2444_v43, %v2443_v29 }
 0x10a   :  { %2610 = vadd.xlane.f32.xlu1 %v2609_v44  ;;  %v2440_v28 = vmul.f32 %v4543_v15, %v2302_v30  ;;  %955 = vmatprep.mubr.bf16.mxu1 %v3556_v60  ;;  %v2421_v30 = vmul.f32 %v4539_v14, %v2283_v18  ;;  %v2422_v37 = vmul.f32 %v4543_v15, %v2284_v46  ;;  %v2291_v47 = vunpack.c.l.bf16 %v5135_v51 }
 0x10b   :  { %v2588_v5 = vadd.f32 %v2418_v49, %v2417_v58  ;;  %v3558_v60 = vcombine.high %v4991_v53, %v217_v41  ;;  %v3528_v58 = vcombine.high %v4651_v26, %v4781_v31  ;;  %v2292_v20 = vunpack.c.h.bf16 %v5135_v51 }
 0x10c   :  { %2571 = vadd.xlane.f32.xlu0 %v2570_v39  ;;  %v5116_v39 = vld [vmem:[%s7783_s0 + $0x1e0] sm:$0xff]  ;;  %v2621_v44 = vadd.f32 %v2440_v28, %v2439_v11  ;;  %v2313_v11 = vunpack.c.l.bf16 %v5129_v33  ;;  %v2314_v28 = vunpack.c.h.bf16 %v5129_v33  ;;  %v2594_v10 = vadd.f32 %v2422_v37, %v2421_v30  ;;  %v5166_v30 = vld [vmem:[%s7783_s0 + $0x1b8] sm:$0xff] }
 0x10d   :  { %v2309_v52 = vunpack.c.l.bf16 %v5116_v39  ;;  %v2310_v55 = vunpack.c.h.bf16 %v5116_v39  ;;  %v2426_v49 = vmul.f32 %v4543_v15, %v2288_v59  ;;  %v2429_v29 = vmul.f32 %v4539_v14, %v2291_v47  ;;  %v5191_v47 = vld [vmem:[%s7783_s0 + $0x1d8] sm:$0xff] }
 0x10e   :  { %2616 = vadd.xlane.f32.xlu1 %v2615_v9  ;;  %v2452_v46 = vmul.f32 %v4543_v15, %v2314_v28  ;;  %v2430_v43 = vmul.f32 %v4543_v15, %v2292_v20  ;;  %v3560_v37 = vcombine.high %v5013_v3, %v5135_v51  ;;  %v3559_v26 = vcombine.low %v5013_v3, %v5135_v51 }
 0x10f   :  { %v2448_v9 = vmul.f32 %v4543_v15, %v2310_v55  ;;  %v3568_v17 = vcombine.high %v5094_v23, %v5191_v47 }
 0x110   :  { %2577 = vadd.xlane.f32.xlu0 %v2576_v56  ;;  %828 = vmatmul.mubr.bf16.gmra.mrb[28].mxu0 %v3523_v2  ;;  %v2287_v56 = vunpack.c.l.bf16 %v217_v41  ;;  %v2447_v2 = vmul.f32 %v4539_v14, %v2309_v52  ;;  %v2606_v59 = vadd.f32 %v2430_v43, %v2429_v29 }
 0x111   :  { %835 = vmatprep.mubr.bf16.mxu0 %v3526_v24  ;;  %956 = vmatmul.mubr.bf16.gmra.mrb[28].mxu1 %v3555_v19  ;;  %v5154_v24 = vld [vmem:[%s7783_s0 + $0x1a8] sm:$0xff]  ;;  %v3530_v19 = vcombine.high %v4672_v45, %v4802_v0  ;;  %v3564_v45 = vcombine.high %v5059_v27, %v5166_v30 }
 0x112   :  { %2622 = vadd.xlane.f32.xlu1 %v2621_v44  ;;  %v2425_v1 = vmul.f32 %v4539_v14, %v2287_v56  ;;  %963 = vmatprep.mubr.bf16.mxu1 %v3558_v60  ;;  %v2633_v18 = vadd.f32 %v2448_v9, %v2447_v2  ;;  %v2295_v52 = vunpack.c.l.bf16 %v5154_v24  ;;  %v2296_v55 = vunpack.c.h.bf16 %v5154_v24  ;;  %v5179_v60 = vld [vmem:[%s7783_s0 + $0x1c8] sm:$0xff] }
 0x113   :  { %v2303_v2 = vunpack.c.l.bf16 %v5179_v60  ;;  %v2304_v9 = vunpack.c.h.bf16 %v5179_v60  ;;  %v3562_v31 = vcombine.high %v5039_v50, %v5154_v24  ;;  %v3561_v43 = vcombine.low %v5039_v50, %v5154_v24  ;;  %v5239_v50 = vld [vmem:[%s7784_s1 + $0x18] sm:$0xff]  ;;  %v5265_v24 = vld [vmem:[%s7784_s1 + $0x30] sm:$0xff] }
 0x114   :  { %2583 = vadd.xlane.f32.xlu0 %v2582_v57  ;;  %v2451_v57 = vmul.f32 %v4539_v14, %v2313_v11  ;;  %v2600_v44 = vadd.f32 %v2426_v49, %v2425_v1  ;;  %v2308_v49 = vunpack.c.h.bf16 %v5191_v47  ;;  %v3566_v61 = vcombine.high %v5082_v38, %v5179_v60 }
 0x115   :  { %v2442_v20 = vmul.f32 %v4543_v15, %v2304_v9 }
 0x116   :  { %2628 = vadd.xlane.f32.xlu1 %v2627_v48  ;;  %v2639_v56 = vadd.f32 %v2452_v46, %v2451_v57  ;;  %v2434_v48 = vmul.f32 %v4543_v15, %v2296_v55  ;;  %v2446_v57 = vmul.f32 %v4543_v15, %v2308_v49 }
 0x118   :  { %2589 = vadd.xlane.f32.xlu0 %v2588_v5  ;;  %836 = vmatmul.mubr.bf16.gmra.mrb[32].mxu0 %v3525_v34  ;;  %v3557_v5 = vcombine.low %v4991_v53, %v217_v41  ;;  %v2433_v34 = vmul.f32 %v4539_v14, %v2295_v52  ;;  %v2299_v53 = vunpack.c.l.bf16 %v5166_v30  ;;  %v2300_v41 = vunpack.c.h.bf16 %v5166_v30  ;;  %v5267_v52 = vpop.permute.xlu0 %1161 }
 0x119   :  { %843 = vmatprep.mubr.bf16.mxu0 %v3528_v58  ;;  %8039 = vst [vmem:[#allocation31_spill] sm:$0xff] %v5267_v52  ;;  %v5541_v52 = vld [vmem:[%s7784_s1 + $0xe8] sm:$0xff] }
 0x11a   :  { %2634 = vadd.xlane.f32.xlu1 %v2633_v18  ;;  %964 = vmatmul.mubr.bf16.gmra.mrb[32].mxu1 %v3557_v5  ;;  %v2612_v11 = vadd.f32 %v2434_v48, %v2433_v34  ;;  %v2437_v28 = vmul.f32 %v4539_v14, %v2299_v53  ;;  %v2438_v58 = vmul.f32 %v4543_v15, %v2300_v41  ;;  %v5204_v18 = vld [vmem:[%s7783_s0 + $0x1e8] sm:$0xff] }
 0x11b   :  { %971 = vmatprep.mubr.bf16.mxu1 %v3560_v37  ;;  %v2311_v46 = vunpack.c.l.bf16 %v5204_v18  ;;  %v2312_v29 = vunpack.c.h.bf16 %v5204_v18  ;;  %v3567_v5 = vcombine.low %v5094_v23, %v5191_v47  ;;  %v3570_v40 = vcombine.high %v5116_v39, %v5204_v18  ;;  %8071 = vst [vmem:[#allocation59_spill] sm:$0xff] %v5541_v52 }
 0x11c   :  { %2595 = vadd.xlane.f32.xlu0 %v2594_v10  ;;  %v2307_v10 = vunpack.c.l.bf16 %v5191_v47  ;;  %v2618_v1 = vadd.f32 %v2438_v58, %v2437_v28  ;;  %v8045_v23 = vcombine.low %v4750_v54, %v4903_v36  ;;  %v3572_v53 = vcombine.high %v5129_v33, %v5129_v33  ;;  %v5361_v58 = vld [vmem:[%s7784_s1 + $0x48] sm:$0xff] }
 0x11d   :  { %v8049_v28 = vcombine.low %v4771_v22, %v4923_v62 }
 0x11e   :  { %2640 = vadd.xlane.f32.xlu1 %v2639_v56  ;;  %v2445_v51 = vmul.f32 %v4539_v14, %v2307_v10 }
 0x120   :  { %2601 = vadd.xlane.f32.xlu0 %v2600_v44  ;;  %844 = vmatmul.mubr.bf16.gmra.mrb[36].mxu0 %v3527_v32  ;;  %v2441_v32 = vmul.f32 %v4539_v14, %v2303_v2  ;;  %v2630_v0 = vadd.f32 %v2446_v57, %v2445_v51  ;;  %v5225_v44 = vld [vmem:[%s7784_s1 + $0x10] sm:$0xff]  ;;  %v5349_v2 = vld [vmem:[%s7784_s1 + $0x80] sm:$0xff] }
 0x121   :  { %851 = vmatprep.mubr.bf16.mxu0 %v3530_v19  ;;  %v8046_v19 = vcombine.high %v4771_v22, %v4923_v62 }
 0x122   :  { %972 = vmatmul.mubr.bf16.gmra.mrb[36].mxu1 %v3559_v26  ;;  %v2624_v3 = vadd.f32 %v2442_v20, %v2441_v32  ;;  %v5372_v32 = vld [vmem:[%s7784_s1 + $0x90] sm:$0xff]  ;;  %v5381_v20 = vld [vmem:[%s7784_s1 + $0x58] sm:$0xff] }
 0x123   :  { %979 = vmatprep.mubr.bf16.mxu1 %v3562_v31  ;;  %v3571_v31 = vcombine.low %v5129_v33, %v5129_v33 }
 0x124   :  { %2607 = vadd.xlane.f32.xlu0 %v2606_v59  ;;  %v5317_v59 = vld [vmem:[%s7784_s1 + $0x20] sm:$0xff] }
 0x128   :  { %2613 = vadd.xlane.f32.xlu0 %v2612_v11  ;;  %852 = vmatmul.mubr.bf16.gmra.mrb[40].mxu0 %v3529_v21  ;;  %v2449_v21 = vmul.f32 %v4539_v14, %v2311_v46  ;;  %v5408_v46 = vld [vmem:[%s7784_s1 + $0xb0] sm:$0xff] }
 0x129   :  { %859 = vmatprep.mubr.bf16.mxu0 %v3532_v7  ;;  %v2450_v7 = vmul.f32 %v4543_v15, %v2312_v29  ;;  %v3563_v15 = vcombine.low %v5059_v27, %v5166_v30  ;;  %v3565_v27 = vcombine.low %v5082_v38, %v5179_v60  ;;  %v8042_v38 = vcombine.high %v4750_v54, %v4903_v36  ;;  %v5295_v30 = vld [vmem:[%s7784_s1 + $0x50] sm:$0xff]  ;;  %v5341_v60 = vld [vmem:[%s7784_s1 + $0x38] sm:$0xff] }
 0x12a   :  { %980 = vmatmul.mubr.bf16.gmra.mrb[40].mxu1 %v3561_v43  ;;  %v3569_v54 = vcombine.low %v5116_v39, %v5204_v18  ;;  %v5330_v36 = vld [vmem:[%s7784_s1 + $0x70] sm:$0xff]  ;;  %8052 = vst [vmem:[#allocation40_spill] sm:$0xff] %v5408_v46 }
 0x12b   :  { %987 = vmatprep.mubr.bf16.mxu1 %v3564_v45  ;;  %v2636_v14 = vadd.f32 %v2450_v7, %v2449_v21  ;;  %v5417_v45 = vld [vmem:[%s7784_s1 + $0x78] sm:$0xff]  ;;  %v5426_v7 = vld [vmem:[%s7784_s1 + $0xc0] sm:$0xff] }
 0x12c   :  { %2619 = vadd.xlane.f32.xlu0 %v2618_v1  ;;  %v5390_v1 = vld [vmem:[%s7784_s1 + $0xa0] sm:$0xff]  ;;  %8054 = vst [vmem:[#allocation42_spill] sm:$0xff] %v5426_v7 }
 0x12d   :  { %8050 = vst [vmem:[#allocation38_spill] sm:$0xff] %v5390_v1 }
 0x12f   :  { %1171 = vperm.xlu1 %3997, %v5225_v44  }
 0x130   :  { %2625 = vadd.xlane.f32.xlu0 %v2624_v3  ;;  %860 = vmatmul.mubr.bf16.gmra.mrb[44].mxu0 %v3531_v4  ;;  %v5243_v16 = vpop.xlane.xlu1 %2457  ;;  %v5249_v4 = vld [vmem:[%s7784_s1 + $0x28] sm:$0xff] }
 0x131   :  { %867 = vmatprep.mubr.bf16.mxu0 %v3534_v12  ;;  %8037 = vst [vmem:[#allocation29_spill] sm:$0xff] %v5243_v16  ;;  %v5399_v3 = vld [vmem:[%s7784_s1 + $0x68] sm:$0xff] }
 0x132   :  { %988 = vmatmul.mubr.bf16.gmra.mrb[44].mxu1 %v3563_v15 }
 0x133   :  { %1176 = vperm.xlu1 %3997, %v5239_v50   ;;  %995 = vmatprep.mubr.bf16.mxu1 %v3566_v61  ;;  %v5435_v61 = vld [vmem:[%s7784_s1 + $0x88] sm:$0xff] }
 0x134   :  { %2631 = vadd.xlane.f32.xlu0 %v2630_v0  ;;  %v5257_v12 = vpop.xlane.xlu1 %2466 }
 0x135   :  { %8038 = vst [vmem:[#allocation30_spill] sm:$0xff] %v5257_v12 }
 0x137   :  { %1186 = vperm.xlu1 %3997, %v5249_v4  }
 0x138   :  { %2637 = vadd.xlane.f32.xlu0 %v2636_v14  ;;  %868 = vmatmul.mubr.bf16.gmra.mrb[48].mxu0 %v3533_v13  ;;  %v5271_v42 = vpop.xlane.xlu1 %2472  ;;  %v5277_v13 = vld [vmem:[%s7784_s1 + $0x40] sm:$0xff] }
 0x139   :  { %875 = vmatprep.mubr.bf16.mxu0 %v3536_v25  ;;  %8040 = vst [vmem:[#allocation32_spill] sm:$0xff] %v5271_v42  ;;  %v5282_v25 = vpop.permute.xlu0 %1166 }
 0x13a   :  { %996 = vmatmul.mubr.bf16.gmra.mrb[48].mxu1 %v3565_v27  ;;  %8041 = vst [vmem:[#allocation33_spill] sm:$0xff] %v5282_v25 }
 0x13b   :  { %1191 = vperm.xlu1 %3997, %v5265_v24   ;;  %1003 = vmatprep.mubr.bf16.mxu1 %v3568_v17 }
 0x13c   :  { %v5287_v55 = vpop.xlane.xlu1 %2478 }
 0x13d   :  { %8043 = vst [vmem:[#allocation34_spill] sm:$0xff] %v5287_v55 }
 0x13f   :  { %1201 = vperm.xlu1 %3997, %v5277_v13  }
 0x140   :  { %876 = vmatmul.mubr.bf16.gmra.mrb[52].mxu0 %v3535_v35  ;;  %v5299_v63 = vpop.xlane.xlu1 %2484  ;;  %v5305_v35 = vld [vmem:[%s7784_s1 + $0x60] sm:$0xff] }
 0x141   :  { %883 = vmatprep.mubr.bf16.mxu0 %v8042_v38  ;;  %v5444_v38 = vld [vmem:[%s7784_s1 + $0xd0] sm:$0xff] }
 0x142   :  { %1004 = vmatmul.mubr.bf16.gmra.mrb[52].mxu1 %v3567_v5  ;;  %8056 = vst [vmem:[#allocation44_spill] sm:$0xff] %v5444_v38 }
 0x143   :  { %1211 = vperm.xlu1 %3997, %v5295_v30   ;;  %1011 = vmatprep.mubr.bf16.mxu1 %v3570_v40 }
 0x144   :  { %v5322_v34 = vpop.xlane.xlu1 %2490 }
 0x147   :  { %1221 = vperm.xlu1 %3997, %v5305_v35  }
 0x148   :  { %884 = vmatmul.mubr.bf16.gmra.mrb[56].mxu0 %v8045_v23  ;;  %v5343_v39 = vpop.xlane.xlu1 %2496  ;;  %v5453_v23 = vld [vmem:[%s7784_s1 + $0x98] sm:$0xff] }
 0x149   :  { %v5307_v37 = vpop.xlane.xlu0 %2454  ;;  %891 = vmatprep.mubr.bf16.mxu0 %v8046_v19 }
 0x14a   :  { %8044 = vst [vmem:[#allocation35_spill] sm:$0xff] %v5307_v37  ;;  %v2642_v56 = vadd.f32 %v5243_v16, %v5307_v37  ;;  %1012 = vmatmul.mubr.bf16.gmra.mrb[56].mxu1 %v3569_v54  ;;  %v5462_v54 = vld [vmem:[%s7784_s1 + $0xe0] sm:$0xff] }
 0x14b   :  { %1231 = vperm.xlu1 %3997, %v5330_v36   ;;  %1019 = vmatprep.mubr.bf16.mxu1 %v3572_v53  ;;  %8058 = vst [vmem:[#allocation46_spill] sm:$0xff] %v5462_v54 }
 0x14c   :  { %v5363_v47 = vpop.xlane.xlu1 %2502 }
 0x14d   :  { %v5332_v48 = vpop.xlane.xlu0 %2460 }
 0x14e   :  { %8047 = vst [vmem:[#allocation36_spill] sm:$0xff] %v5332_v48  ;;  %v2643_v41 = vadd.f32 %v2642_v56, %v5332_v48  ;;  %1181 = vperm.xlu0 %3996, %v5317_v59  }
 0x14f   :  { %1241 = vperm.xlu1 %3997, %v5349_v2  }
 0x150   :  { %892 = vmatmul.mubr.bf16.gmra.mrb[60].mxu0 %v8049_v28  ;;  %v5383_v10 = vpop.xlane.xlu1 %2508 }
 0x151   :  { %v5351_v9 = vpop.xlane.xlu0 %2463 }
 0x152   :  { %8048 = vst [vmem:[#allocation37_spill] sm:$0xff] %v5351_v9  ;;  %v2644_v11 = vadd.f32 %v2643_v41, %v5351_v9  ;;  %1196 = vperm.xlu0 %3996, %v5341_v60   ;;  %1020 = vmatmul.mubr.bf16.gmra.mrb[60].mxu1 %v3571_v31  ;;  %v5480_v31 = vld [vmem:[%s7784_s1 + $0xf0] sm:$0xff] }
 0x153   :  { %1251 = vperm.xlu1 %3997, %v5372_v32   ;;  %8061 = vst [vmem:[#allocation49_spill] sm:$0xff] %v5480_v31 }
 0x154   :  { %v2645_v26 = vadd.f32 %v2644_v11, %v5257_v12  ;;  %v5401_v51 = vpop.xlane.xlu1 %2514  ;;  %v5471_v11 = vld [vmem:[%s7784_s1 + $0xa8] sm:$0xff] }
 0x155   :  { %v5374_v22 = vpop.xlane.xlu0 %2469  ;;  %8059 = vst [vmem:[#allocation47_spill] sm:$0xff] %v5471_v11 }
 0x156   :  { %v2646_v62 = vadd.f32 %v2645_v26, %v5374_v22  ;;  %1206 = vperm.xlu0 %3996, %v5361_v58  }
 0x157   :  { %1261 = vperm.xlu1 %3997, %v5390_v1  }
 0x158   :  { %v2647_v33 = vadd.f32 %v2646_v62, %v5271_v42  ;;  %v5419_v0 = vpop.xlane.xlu1 %2520 }
 0x159   :  { %v5392_v49 = vpop.xlane.xlu0 %2475  ;;  %8053 = vst [vmem:[#allocation41_spill] sm:$0xff] %v5419_v0 }
 0x15a   :  { %8051 = vst [vmem:[#allocation39_spill] sm:$0xff] %v5392_v49  ;;  %v2648_v18 = vadd.f32 %v2647_v33, %v5392_v49  ;;  %1216 = vperm.xlu0 %3996, %v5381_v20  }
 0x15b   :  { %1271 = vperm.xlu1 %3997, %v5408_v46  }
 0x15c   :  { %v2649_v57 = vadd.f32 %v2648_v18, %v5287_v55  ;;  %v5437_v27 = vpop.xlane.xlu1 %2526  ;;  %v5489_v18 = vld [vmem:[%s7784_s1 + $0xb8] sm:$0xff] }
 0x15d   :  { %v5410_v29 = vpop.xlane.xlu0 %2481  ;;  %8055 = vst [vmem:[#allocation43_spill] sm:$0xff] %v5437_v27  ;;  %8062 = vst [vmem:[#allocation50_spill] sm:$0xff] %v5489_v18 }
 0x15e   :  { %v2650_v43 = vadd.f32 %v2649_v57, %v5410_v29  ;;  %1226 = vperm.xlu0 %3996, %v5399_v3  }
 0x15f   :  { %1281 = vperm.xlu1 %3997, %v5426_v7  }
 0x160   :  { %v2651_v21 = vadd.f32 %v2650_v43, %v5299_v63  ;;  %v5455_v56 = vpop.xlane.xlu1 %2532 }
 0x161   :  { %v5428_v14 = vpop.xlane.xlu0 %2487  ;;  %8057 = vst [vmem:[#allocation45_spill] sm:$0xff] %v5455_v56 }
 0x162   :  { %v2652_v15 = vadd.f32 %v2651_v21, %v5428_v14  ;;  %1236 = vperm.xlu0 %3996, %v5417_v45   ;;  %v5498_v21 = vld [vmem:[%s7784_s1 + $0x100] sm:$0xff] }
 0x163   :  { %1291 = vperm.xlu1 %3997, %v5444_v38   ;;  %8064 = vst [vmem:[#allocation52_spill] sm:$0xff] %v5498_v21 }
 0x164   :  { %v2653_v17 = vadd.f32 %v2652_v15, %v5322_v34  ;;  %v5473_v28 = vpop.xlane.xlu1 %2538 }
 0x165   :  { %v5446_v5 = vpop.xlane.xlu0 %2493  ;;  %8060 = vst [vmem:[#allocation48_spill] sm:$0xff] %v5473_v28 }
 0x166   :  { %v2654_v40 = vadd.f32 %v2653_v17, %v5446_v5  ;;  %1246 = vperm.xlu0 %3996, %v5435_v61  }
 0x167   :  { %1301 = vperm.xlu1 %3997, %v5462_v54   ;;  %v5559_v54 = vld [vmem:[%s7784_s1 + $0xf8] sm:$0xff] }
 0x168   :  { %v2655_v19 = vadd.f32 %v2654_v40, %v5343_v39  ;;  %v5491_v57 = vpop.xlane.xlu1 %2544  ;;  %v5507_v40 = vld [vmem:[%s7784_s1 + $0xc8] sm:$0xff]  ;;  %8075 = vst [vmem:[#allocation63_spill] sm:$0xff] %v5559_v54 }
 0x169   :  { %v5464_v53 = vpop.xlane.xlu0 %2499  ;;  %8063 = vst [vmem:[#allocation51_spill] sm:$0xff] %v5491_v57  ;;  %8065 = vst [vmem:[#allocation53_spill] sm:$0xff] %v5507_v40 }
 0x16a   :  { %v2656_v41 = vadd.f32 %v2655_v19, %v5464_v53  ;;  %1256 = vperm.xlu0 %3996, %v5453_v23  }
 0x16b   :  { %1311 = vperm.xlu1 %3997, %v5480_v31  }
 0x16c   :  { %v2657_v26 = vadd.f32 %v2656_v41, %v5363_v47  ;;  %v5514_v41 = vld [vmem:[%s7784_s1 + $0x110] sm:$0xff] }
 0x16d   :  { %v5482_v62 = vpop.xlane.xlu0 %2505  ;;  %8066 = vst [vmem:[#allocation54_spill] sm:$0xff] %v5514_v41 }
 0x16e   :  { %v2658_v33 = vadd.f32 %v2657_v26, %v5482_v62  ;;  %1266 = vperm.xlu0 %3996, %v5471_v11  }
 0x16f   :  { %1321 = vperm.xlu1 %3997, %v5498_v21  }
 0x170   :  { %v2659_v43 = vadd.f32 %v2658_v33, %v5383_v10  ;;  %v5518_v33 = vpop.xlane.xlu1 %2550 }
 0x171   :  { %v5500_v15 = vpop.xlane.xlu0 %2511  ;;  %8067 = vst [vmem:[#allocation55_spill] sm:$0xff] %v5518_v33 }
 0x172   :  { %v2660_v17 = vadd.f32 %v2659_v43, %v5500_v15  ;;  %1276 = vperm.xlu0 %3996, %v5489_v18  }
 0x173   :  { %1331 = vperm.xlu1 %3997, %v5514_v41   ;;  %v5550_v41 = vld [vmem:[%s7784_s1 + $0x130] sm:$0xff] }
 0x174   :  { %v2661_v19 = vadd.f32 %v2660_v17, %v5401_v51  ;;  %v5543_v21 = vpop.xlane.xlu1 %2556  ;;  %8073 = vst [vmem:[#allocation61_spill] sm:$0xff] %v5550_v41 }
 0x175   :  { %v5516_v26 = vpop.xlane.xlu0 %2517  ;;  %8072 = vst [vmem:[#allocation60_spill] sm:$0xff] %v5543_v21 }
 0x176   :  { %v2662_v43 = vadd.f32 %v2661_v19, %v5516_v26  ;;  %1286 = vperm.xlu0 %3996, %v5507_v40  }
 0x177   :  { %1341 = vperm.xlu1 %3997, %v5532_v8   ;;  %v5566_v8 = vld [vmem:[%s7784_s1 + $0x140] sm:$0xff] }
 0x178   :  { %v2663_v17 = vadd.f32 %v2662_v43, %v5419_v0  ;;  %8076 = vst [vmem:[#allocation64_spill] sm:$0xff] %v5566_v8  ;;  %v5570_v38 = vpop.xlane.xlu1 %2562 }
 0x179   :  { %v5534_v25 = vpop.xlane.xlu0 %2523  ;;  %8078 = vst [vmem:[#allocation66_spill] sm:$0xff] %v5570_v38 }
 0x17a   :  { %8070 = vst [vmem:[#allocation58_spill] sm:$0xff] %v5534_v25  ;;  %v2664_v19 = vadd.f32 %v2663_v17, %v5534_v25  ;;  %1296 = vperm.xlu0 %3996, %v5525_v6  }
 0x17b   :  { %1351 = vperm.xlu1 %3997, %v5550_v41   ;;  %v5584_v41 = vld [vmem:[%s7784_s1 + $0x150] sm:$0xff] }
 0x17c   :  { %v2665_v43 = vadd.f32 %v2664_v19, %v5437_v27  ;;  %8080 = vst [vmem:[#allocation68_spill] sm:$0xff] %v5584_v41 }
 0x17d   :  { %v5552_v31 = vpop.xlane.xlu0 %2529 }
 0x17e   :  { %8074 = vst [vmem:[#allocation62_spill] sm:$0xff] %v5552_v31  ;;  %v2666_v17 = vadd.f32 %v2665_v43, %v5552_v31  ;;  %1306 = vperm.xlu0 %3996, %v5541_v52   ;;  %v5577_v52 = vld [vmem:[%s7784_s1 + $0x108] sm:$0xff] }
 0x17f   :  { %8079 = vst [vmem:[#allocation67_spill] sm:$0xff] %v5577_v52  ;;  %1361 = vperm.xlu1 %3997, %v5566_v8   ;;  %v5602_v8 = vld [vmem:[%s7784_s1 + $0x160] sm:$0xff] }
 0x180   :  { %v2667_v19 = vadd.f32 %v2666_v17, %v5455_v56  ;;  %8084 = vst [vmem:[#allocation72_spill] sm:$0xff] %v5602_v8 }
 0x181   :  { %v5568_v6 = vpop.xlane.xlu0 %2535 }
 0x182   :  { %8077 = vst [vmem:[#allocation65_spill] sm:$0xff] %v5568_v6  ;;  %v2668_v43 = vadd.f32 %v2667_v19, %v5568_v6  ;;  %1316 = vperm.xlu0 %3996, %v5559_v54   ;;  %v5593_v54 = vld [vmem:[%s7784_s1 + $0x118] sm:$0xff]  ;;  %v5595_v6 = vpop.xlane.xlu1 %2568 }
 0x183   :  { %8082 = vst [vmem:[#allocation70_spill] sm:$0xff] %v5593_v54  ;;  %8083 = vst [vmem:[#allocation71_spill] sm:$0xff] %v5595_v6  ;;  %1371 = vperm.xlu1 %3997, %v5584_v41   ;;  %v5618_v41 = vld [vmem:[%s7784_s1 + $0x170] sm:$0xff] }
 0x184   :  { %v2669_v17 = vadd.f32 %v2668_v43, %v5473_v28  ;;  %8087 = vst [vmem:[#allocation75_spill] sm:$0xff] %v5618_v41 }
 0x185   :  { %v5586_v40 = vpop.xlane.xlu0 %2541 }
 0x186   :  { %8081 = vst [vmem:[#allocation69_spill] sm:$0xff] %v5586_v40  ;;  %v2670_v19 = vadd.f32 %v2669_v17, %v5586_v40  ;;  %1326 = vperm.xlu0 %3996, %v5577_v52   ;;  %v5611_v52 = vld [vmem:[%s7784_s1 + $0x128] sm:$0xff]  ;;  %v5622_v40 = vpop.xlane.xlu1 %2574 }
 0x187   :  { %8086 = vst [vmem:[#allocation74_spill] sm:$0xff] %v5611_v52  ;;  %1381 = vperm.xlu1 %3997, %v5602_v8   ;;  %8089 = vst [vmem:[#allocation77_spill] sm:$0xff] %v5622_v40  ;;  %v5636_v8 = vld [vmem:[%s7784_s1 + $0x180] sm:$0xff] }
 0x188   :  { %v2671_v43 = vadd.f32 %v2670_v19, %v5491_v57  ;;  %8091 = vst [vmem:[#allocation79_spill] sm:$0xff] %v5636_v8 }
 0x189   :  { %v5604_v28 = vpop.xlane.xlu0 %2547 }
 0x18a   :  { %8085 = vst [vmem:[#allocation73_spill] sm:$0xff] %v5604_v28  ;;  %v2672_v17 = vadd.f32 %v2671_v43, %v5604_v28  ;;  %1336 = vperm.xlu0 %3996, %v5593_v54   ;;  %v5629_v54 = vld [vmem:[%s7784_s1 + $0x138] sm:$0xff] }
 0x18b   :  { %8090 = vst [vmem:[#allocation78_spill] sm:$0xff] %v5629_v54  ;;  %1391 = vperm.xlu1 %3997, %v5618_v41   ;;  %v5654_v41 = vld [vmem:[%s7784_s1 + $0x190] sm:$0xff] }
 0x18c   :  { %v2673_v19 = vadd.f32 %v2672_v17, %v5518_v33  ;;  %8095 = vst [vmem:[#allocation83_spill] sm:$0xff] %v5654_v41 }
 0x18d   :  { %v5620_v57 = vpop.xlane.xlu0 %2553 }
 0x18e   :  { %8088 = vst [vmem:[#allocation76_spill] sm:$0xff] %v5620_v57  ;;  %v2674_v43 = vadd.f32 %v2673_v19, %v5620_v57  ;;  %1346 = vperm.xlu0 %3996, %v5611_v52   ;;  %v5645_v52 = vld [vmem:[%s7784_s1 + $0x148] sm:$0xff]  ;;  %v5647_v57 = vpop.xlane.xlu1 %2580 }
 0x18f   :  { %8093 = vst [vmem:[#allocation81_spill] sm:$0xff] %v5645_v52  ;;  %8094 = vst [vmem:[#allocation82_spill] sm:$0xff] %v5647_v57  ;;  %1401 = vperm.xlu1 %3997, %v5636_v8   ;;  %v5670_v8 = vld [vmem:[%s7784_s1 + $0x1a0] sm:$0xff] }
 0x190   :  { %v2675_v17 = vadd.f32 %v2674_v43, %v5543_v21  ;;  %8098 = vst [vmem:[#allocation86_spill] sm:$0xff] %v5670_v8 }
 0x191   :  { %v5638_v33 = vpop.xlane.xlu0 %2559 }
 0x192   :  { %8092 = vst [vmem:[#allocation80_spill] sm:$0xff] %v5638_v33  ;;  %v2676_v19 = vadd.f32 %v2675_v17, %v5638_v33  ;;  %1356 = vperm.xlu0 %3996, %v5629_v54   ;;  %v5663_v54 = vld [vmem:[%s7784_s1 + $0x158] sm:$0xff]  ;;  %v5674_v33 = vpop.xlane.xlu1 %2586 }
 0x193   :  { %8097 = vst [vmem:[#allocation85_spill] sm:$0xff] %v5663_v54  ;;  %1411 = vperm.xlu1 %3997, %v5654_v41   ;;  %8100 = vst [vmem:[#allocation88_spill] sm:$0xff] %v5674_v33  ;;  %v285_v41 = vld [vmem:[%s7784_s1 + $0x1b0] sm:$0xff] }
 0x194   :  { %v2677_v43 = vadd.f32 %v2676_v19, %v5570_v38 }
 0x195   :  { %v5656_v21 = vpop.xlane.xlu0 %2565 }
 0x196   :  { %8096 = vst [vmem:[#allocation84_spill] sm:$0xff] %v5656_v21  ;;  %v2678_v17 = vadd.f32 %v2677_v43, %v5656_v21  ;;  %1366 = vperm.xlu0 %3996, %v5645_v52   ;;  %v5681_v52 = vld [vmem:[%s7784_s1 + $0x168] sm:$0xff] }
 0x197   :  { %8101 = vst [vmem:[#allocation89_spill] sm:$0xff] %v5681_v52  ;;  %1421 = vperm.xlu1 %3997, %v5670_v8   ;;  %v287_v8 = vld [vmem:[%s7784_s1 + $0x1c0] sm:$0xff] }
 0x198   :  { %v2679_v19 = vadd.f32 %v2678_v17, %v5595_v6 }
 0x199   :  { %v5672_v38 = vpop.xlane.xlu0 %2571 }
 0x19a   :  { %8099 = vst [vmem:[#allocation87_spill] sm:$0xff] %v5672_v38  ;;  %v2680_v43 = vadd.f32 %v2679_v19, %v5672_v38  ;;  %1376 = vperm.xlu0 %3996, %v5663_v54   ;;  %v5695_v19 = vld [vmem:[%s7784_s1 + $0x178] sm:$0xff]  ;;  %v5697_v54 = vpop.xlane.xlu1 %2592 }
 0x19b   :  { %8103 = vst [vmem:[#allocation91_spill] sm:$0xff] %v5695_v19  ;;  %8104 = vst [vmem:[#allocation92_spill] sm:$0xff] %v5697_v54  ;;  %1431 = vperm.xlu1 %3997, %v285_v41  }
 0x19c   :  { %v2681_v17 = vadd.f32 %v2680_v43, %v5622_v40 }
 0x19d   :  { %v5688_v6 = vpop.xlane.xlu0 %2577 }
 0x19e   :  { %8102 = vst [vmem:[#allocation90_spill] sm:$0xff] %v5688_v6  ;;  %v2682_v21 = vadd.f32 %v2681_v17, %v5688_v6  ;;  %1386 = vperm.xlu0 %3996, %v5681_v52   ;;  %v5710_v52 = vld [vmem:[%s7784_s1 + $0x188] sm:$0xff]  ;;  %v5718_v6 = vpop.xlane.xlu1 %2598 }
 0x19f   :  { %8106 = vst [vmem:[#allocation94_spill] sm:$0xff] %v5710_v52  ;;  %1441 = vperm.xlu1 %3997, %v287_v8   ;;  %8108 = vst [vmem:[#allocation96_spill] sm:$0xff] %v5718_v6 }
 0x1a0   :  { %v2683_v43 = vadd.f32 %v2682_v21, %v5647_v57  ;;  %v289_v21 = vld [vmem:[%s7784_s1 + $0x1d0] sm:$0xff] }
 0x1a1   :  { %v5703_v40 = vpop.xlane.xlu0 %2583 }
 0x1a2   :  { %8105 = vst [vmem:[#allocation93_spill] sm:$0xff] %v5703_v40  ;;  %v2684_v17 = vadd.f32 %v2683_v43, %v5703_v40  ;;  %1396 = vperm.xlu0 %3996, %v5695_v19   ;;  %v5725_v19 = vld [vmem:[%s7784_s1 + $0x198] sm:$0xff] }
 0x1a3   :  { %8109 = vst [vmem:[#allocation97_spill] sm:$0xff] %v5725_v19  ;;  %1451 = vperm.xlu1 %3997, %v289_v21  }
 0x1a4   :  { %v2685_v41 = vadd.f32 %v2684_v17, %v5674_v33  ;;  %v291_v17 = vld [vmem:[%s7784_s1 + $0x1e0] sm:$0xff] }
 0x1a5   :  { %v5716_v57 = vpop.xlane.xlu0 %2589 }
 0x1a6   :  { %8107 = vst [vmem:[#allocation95_spill] sm:$0xff] %v5716_v57  ;;  %v2686_v43 = vadd.f32 %v2685_v41, %v5716_v57  ;;  %1406 = vperm.xlu0 %3996, %v5710_v52   ;;  %v5738_v41 = vld [vmem:[%s7784_s1 + $0x1a8] sm:$0xff]  ;;  %v5740_v52 = vpop.xlane.xlu1 %2604 }
 0x1a7   :  { %8111 = vst [vmem:[#allocation99_spill] sm:$0xff] %v5738_v41  ;;  %8112 = vst [vmem:[#allocation100_spill] sm:$0xff] %v5740_v52  ;;  %1461 = vperm.xlu1 %3997, %v291_v17   ;;  %v5757_v17 = vld [vmem:[%s7784_s1 + $0x1b8] sm:$0xff] }
 0x1a8   :  { %v2687_v8 = vadd.f32 %v2686_v43, %v5697_v54  ;;  %v293_v43 = vld [vmem:[%s7784_s1 + $0x1f0] sm:$0xff]  ;;  %8116 = vst [vmem:[#allocation104_spill] sm:$0xff] %v5757_v17 }
 0x1a9   :  { %v5731_v33 = vpop.xlane.xlu0 %2595 }
 0x1aa   :  { %8110 = vst [vmem:[#allocation98_spill] sm:$0xff] %v5731_v33  ;;  %v2688_v40 = vadd.f32 %v2687_v8, %v5731_v33  ;;  %1416 = vperm.xlu0 %3996, %v5725_v19  }
 0x1ab   :  { %v5748_v57 = vpop.f32.mrb[0].mxu0  ;;  %1471 = vperm.xlu1 %3997, %v293_v43  }
 0x1ac   :  { %v2689_v21 = vadd.f32 %v2688_v40, %v5718_v6  ;;  %8114 = vst [vmem:[#allocation102_spill] sm:$0xff] %v5748_v57  ;;  %v775_v19 = vpop.f32.mrb[1].mxu0 }
 0x1ad   :  { %v5746_v54 = vpop.xlane.xlu0 %2601  ;;  %v5752_v33 = vpop.f32.mrb[2].mxu0 }
 0x1ae   :  { %8113 = vst [vmem:[#allocation101_spill] sm:$0xff] %v5746_v54  ;;  %v2690_v8 = vadd.f32 %v2689_v21, %v5746_v54  ;;  %1426 = vperm.xlu0 %3996, %v5738_v41   ;;  %8115 = vst [vmem:[#allocation103_spill] sm:$0xff] %v5752_v33  ;;  %v1027_v6 = vadd.f32 %v5752_v33, %v5748_v57  ;;  %v778_v38 = vpop.f32.mrb[3].mxu0  ;;  %v5764_v21 = vpop.xlane.xlu1 %2610  ;;  %v5771_v41 = vld [vmem:[%s7784_s1 + $0x1c8] sm:$0xff] }
 0x1af   :  { %8118 = vst [vmem:[#allocation106_spill] sm:$0xff] %v5764_v21  ;;  %8119 = vst [vmem:[#allocation107_spill] sm:$0xff] %v5771_v41 }
 0x1b0   :  { %v2691_v40 = vadd.f32 %v2690_v8, %v5740_v52 }
 0x1b1   :  { %v5762_v28 = vpop.xlane.xlu0 %2607 }
 0x1b2   :  { %8117 = vst [vmem:[#allocation105_spill] sm:$0xff] %v5762_v28  ;;  %v2692_v19 = vadd.f32 %v2691_v40, %v5762_v28  ;;  %1436 = vperm.xlu0 %3996, %v5757_v17   ;;  %v5786_v17 = vld [vmem:[%s7784_s1 + $0x1d8] sm:$0xff]  ;;  %v5788_v28 = vpop.xlane.xlu1 %2616 }
 0x1b3   :  { %v5776_v52 = vpop.f32.mrb[4].mxu0  ;;  %8123 = vst [vmem:[#allocation111_spill] sm:$0xff] %v5786_v17  ;;  %8124 = vst [vmem:[#allocation112_spill] sm:$0xff] %v5788_v28 }
 0x1b4   :  { %v2693_v43 = vadd.f32 %v2692_v19, %v5764_v21  ;;  %8121 = vst [vmem:[#allocation109_spill] sm:$0xff] %v5776_v52  ;;  %v1028_v38 = vadd.f32 %v1027_v6, %v5776_v52  ;;  %v783_v33 = vpop.f32.mrb[5].mxu0 }
 0x1b5   :  { %v5774_v8 = vpop.xlane.xlu0 %2613  ;;  %v5781_v57 = vpop.f32.mrb[6].mxu0  ;;  %v5796_v33 = vld [vmem:[%s7784_s1 + $0x1e8] sm:$0xff] }
 0x1b6   :  { %8120 = vst [vmem:[#allocation108_spill] sm:$0xff] %v5774_v8  ;;  %1446 = vperm.xlu0 %3996, %v5771_v41   ;;  %v2694_v40 = vadd.f32 %v2693_v43, %v5774_v8  ;;  %8122 = vst [vmem:[#allocation110_spill] sm:$0xff] %v5781_v57  ;;  %v1029_v19 = vadd.f32 %v1028_v38, %v5781_v57  ;;  %v786_v21 = vpop.f32.mrb[7].mxu0  ;;  %v5798_v43 = vpop.f32.mrb[0].mxu1 }
 0x1b7   :  { %8125 = vst [vmem:[#allocation113_spill] sm:$0xff] %v5796_v33  ;;  %8126 = vst [vmem:[#allocation114_spill] sm:$0xff] %v5798_v43  ;;  %v903_v41 = vpop.f32.mrb[1].mxu1 }
 0x1b8   :  { %v2695_v6 = vadd.f32 %v2694_v40, %v5788_v28  ;;  %v5806_v38 = vpop.f32.mrb[2].mxu1  ;;  %v5811_v28 = vpop.xlane.xlu1 %2622 }
 0x1b9   :  { %v5800_v52 = vpop.xlane.xlu0 %2619  ;;  %8129 = vst [vmem:[#allocation117_spill] sm:$0xff] %v5806_v38  ;;  %8131 = vst [vmem:[#allocation119_spill] sm:$0xff] %v5811_v28 }
 0x1ba   :  { %1456 = vperm.xlu0 %3996, %v5786_v17   ;;  %8127 = vst [vmem:[#allocation115_spill] sm:$0xff] %v5800_v52  ;;  %v2696_v40 = vadd.f32 %v2695_v6, %v5800_v52  ;;  %v906_v17 = vpop.f32.mrb[3].mxu1 }
 0x1bb   :  { %v5802_v8 = vpop.f32.mrb[8].mxu0  ;;  %v5815_v56 = vpop.f32.mrb[4].mxu1 }
 0x1bc   :  { %8128 = vst [vmem:[#allocation116_spill] sm:$0xff] %v5802_v8  ;;  %v1030_v54 = vadd.f32 %v1029_v19, %v5802_v8  ;;  %v791_v21 = vpop.f32.mrb[9].mxu0  ;;  %v2697_v41 = vadd.f32 %v2696_v40, %v5811_v28  ;;  %8132 = vst [vmem:[#allocation120_spill] sm:$0xff] %v5815_v56  ;;  %v911_v8 = vpop.f32.mrb[5].mxu1 }
 0x1bd   :  { %v5809_v57 = vpop.f32.mrb[10].mxu0  ;;  %v5817_v19 = vpop.xlane.xlu0 %2625 }
 0x1be   :  { %1466 = vperm.xlu0 %3996, %v5796_v33   ;;  %8130 = vst [vmem:[#allocation118_spill] sm:$0xff] %v5809_v57  ;;  %v1031_v43 = vadd.f32 %v1030_v54, %v5809_v57  ;;  %v794_v7 = vpop.f32.mrb[11].mxu0  ;;  %8133 = vst [vmem:[#allocation121_spill] sm:$0xff] %v5817_v19  ;;  %v5822_v52 = vpop.f32.mrb[6].mxu1  ;;  %v2698_v17 = vadd.f32 %v2697_v41, %v5817_v19 }
 0x1bf   :  { %8135 = vst [vmem:[#allocation123_spill] sm:$0xff] %v5822_v52  ;;  %v914_v54 = vpop.f32.mrb[7].mxu1  ;;  %v5827_v7 = vpop.xlane.xlu1 %2628 }
 0x1c0   :  { %8137 = vst [vmem:[#allocation125_spill] sm:$0xff] %v5827_v7  ;;  %v2699_v28 = vadd.f32 %v2698_v17, %v5827_v7  ;;  %v5831_v8 = vpop.f32.mrb[8].mxu1 }
 0x1c1   :  { %8138 = vst [vmem:[#allocation126_spill] sm:$0xff] %v5831_v8  ;;  %v5833_v56 = vpop.xlane.xlu0 %2631 }
 0x1c2   :  { %8139 = vst [vmem:[#allocation127_spill] sm:$0xff] %v5833_v56  ;;  %v2700_v54 = vadd.f32 %v2699_v28, %v5833_v56 }
 0x1c3   :  { %v5819_v21 = vpop.f32.mrb[12].mxu0 }
 0x1c4   :  { %8134 = vst [vmem:[#allocation122_spill] sm:$0xff] %v5819_v21  ;;  %v1032_v33 = vadd.f32 %v1031_v43, %v5819_v21  ;;  %v799_v6 = vpop.f32.mrb[13].mxu0  ;;  %v919_v43 = vpop.f32.mrb[9].mxu1 }
 0x1c5   :  { %v5825_v38 = vpop.f32.mrb[14].mxu0  ;;  %v5838_v19 = vpop.f32.mrb[10].mxu1 }
 0x1c6   :  { %8136 = vst [vmem:[#allocation124_spill] sm:$0xff] %v5825_v38  ;;  %v1033_v40 = vadd.f32 %v1032_v33, %v5825_v38  ;;  %v802_v57 = vpop.f32.mrb[15].mxu0  ;;  %8141 = vst [vmem:[#allocation129_spill] sm:$0xff] %v5838_v19  ;;  %v922_v33 = vpop.f32.mrb[11].mxu1 }
 0x1c7   :  { %v5843_v57 = vpop.xlane.xlu1 %2634  ;;  %v5847_v43 = vpop.f32.mrb[12].mxu1 }
 0x1c8   :  { %8143 = vst [vmem:[#allocation131_spill] sm:$0xff] %v5843_v57  ;;  %v2701_v7 = vadd.f32 %v2700_v54, %v5843_v57  ;;  %8144 = vst [vmem:[#allocation132_spill] sm:$0xff] %v5847_v43  ;;  %v5849_v8 = vpop.xlane.xlu0 %2637 }
 0x1c9   :  { %8145 = vst [vmem:[#allocation133_spill] sm:$0xff] %v5849_v8 }
 0x1ca   :  { %v2702_v33 = vadd.f32 %v2701_v7, %v5849_v8 }
 0x1cb   :  { %v5835_v6 = vpop.f32.mrb[16].mxu0 }
 0x1cc   :  { %8140 = vst [vmem:[#allocation128_spill] sm:$0xff] %v5835_v6  ;;  %v1034_v21 = vadd.f32 %v1033_v40, %v5835_v6  ;;  %v807_v41 = vpop.f32.mrb[17].mxu0  ;;  %v927_v40 = vpop.f32.mrb[13].mxu1 }
 0x1cd   :  { %v5841_v52 = vpop.f32.mrb[18].mxu0  ;;  %v5856_v56 = vpop.f32.mrb[14].mxu1 }
 0x1ce   :  { %8142 = vst [vmem:[#allocation130_spill] sm:$0xff] %v5841_v52  ;;  %v1035_v17 = vadd.f32 %v1034_v21, %v5841_v52  ;;  %v810_v38 = vpop.f32.mrb[19].mxu0  ;;  %8147 = vst [vmem:[#allocation135_spill] sm:$0xff] %v5856_v56  ;;  %v5861_v21 = vpop.xlane.xlu1 %2640 }
 0x1cf   :  { %v930_v38 = vpop.f32.mrb[15].mxu1  ;;  %8149 = vst [vmem:[#allocation137_spill] sm:$0xff] %v5861_v21  ;;  %v2703_v52 = vadd.f32 %v2702_v33, %v5861_v21 }
 0x1d0   :  { %v5864_v57 = vpop.f32.mrb[16].mxu1 }
 0x1d1   :  { %8150 = vst [vmem:[#allocation138_spill] sm:$0xff] %v5864_v57  ;;  %v935_v40 = vpop.f32.mrb[17].mxu1 }
 0x1d3   :  { %v5851_v41 = vpop.f32.mrb[20].mxu0 }
 0x1d4   :  { %8146 = vst [vmem:[#allocation134_spill] sm:$0xff] %v5851_v41  ;;  %v5854_v6 = vadd.f32 %v1035_v17, %v5851_v41  ;;  %v815_v28 = vpop.f32.mrb[21].mxu0  ;;  %v5868_v41 = vpop.f32.mrb[18].mxu1 }
 0x1d5   :  { %v5859_v19 = vpop.f32.mrb[22].mxu0  ;;  %8152 = vst [vmem:[#allocation140_spill] sm:$0xff] %v5868_v41  ;;  %v2704_v28 = vrot.slane %v2703_v52, 4  ;;  %v938_v7 = vpop.f32.mrb[19].mxu1 }
 0x1d6   :  { %8148 = vst [vmem:[#allocation136_spill] sm:$0xff] %v5859_v19  ;;  %v818_v54 = vpop.f32.mrb[23].mxu0  ;;  %v5872_v38 = vpop.f32.mrb[20].mxu1 }
 0x1d7   :  { %v2705_v18 = vadd.f32 %v2704_v28, %v2703_v52  ;;  %8154 = vst [vmem:[#allocation142_spill] sm:$0xff] %v5872_v38  ;;  %v943_v31 = vpop.f32.mrb[21].mxu1 }
 0x1d8   :  { %v5876_v21 = vpop.f32.mrb[22].mxu1 }
 0x1d9   :  { %8156 = vst [vmem:[#allocation144_spill] sm:$0xff] %v5876_v21  ;;  %v2706_v40 = vrot.slane %v2705_v18, 2 }
 0x1db   :  { %v5866_v43 = vpop.f32.mrb[24].mxu0  ;;  %v2707_v41 = vadd.f32 %v2706_v40, %v2705_v18 }
 0x1dc   :  { %8151 = vst [vmem:[#allocation139_spill] sm:$0xff] %v5866_v43  ;;  %v823_v17 = vpop.f32.mrb[25].mxu0 }
 0x1dd   :  { %v5870_v56 = vpop.f32.mrb[26].mxu0  ;;  %v946_v17 = vpop.f32.mrb[23].mxu1  ;;  %v2708_v31 = vrot.slane %v2707_v41, 1 }
 0x1de   :  { %8153 = vst [vmem:[#allocation141_spill] sm:$0xff] %v5870_v56  ;;  %v826_v8 = vpop.f32.mrb[27].mxu0  ;;  %v5880_v27 = vpop.f32.mrb[24].mxu1 }
 0x1df   :  { %8158 = vst [vmem:[#allocation146_spill] sm:$0xff] %v5880_v27  ;;  %v951_v11 = vpop.f32.mrb[25].mxu1  ;;  %v2709_v21 = vadd.f32 %v2708_v31, %v2707_v41 }
 0x1e0   :  { %v5884_v8 = vpop.f32.mrb[26].mxu1 }
 0x1e1   :  { %8160 = vst [vmem:[#allocation148_spill] sm:$0xff] %v5884_v8  ;;  %v5894_v11 = vmul.f32 0.007936508, %v2709_v21 }
 0x1e3   :  { %v5874_v54 = vpop.f32.mrb[28].mxu0  ;;  %v2711_v27 = vsub.f32 %v5307_v37, %v5894_v11  ;;  %v2712_v41 = vsub.f32 %v5243_v16, %v5894_v11  ;;  %v2714_v21 = vsub.f32 %v5351_v9, %v5894_v11  ;;  %v4082_v16 = vld [vmem:[%s7784_s1] sm:$0xff] }
 0x1e4   :  { %8155 = vst [vmem:[#allocation143_spill] sm:$0xff] %v5874_v54  ;;  %v831_v33 = vpop.f32.mrb[29].mxu0 }
 0x1e5   :  { %v5878_v57 = vpop.f32.mrb[30].mxu0  ;;  %v954_v33 = vpop.f32.mrb[27].mxu1  ;;  %v2774_v37 = vmul.f32 %v4082_v16, %v2711_v27 }
 0x1e6   :  { %8157 = vst [vmem:[#allocation145_spill] sm:$0xff] %v5878_v57  ;;  %v834_v46 = vpop.f32.mrb[31].mxu0  ;;  %v5888_v25 = vpop.f32.mrb[28].mxu1 }
 0x1e7   :  { %8162 = vst [vmem:[#allocation150_spill] sm:$0xff] %v5888_v25  ;;  %v959_v1 = vpop.f32.mrb[29].mxu1  ;;  %v2717_v25 = vsub.f32 %v5271_v42, %v5894_v11  ;;  %v2837_v27 = vmul.f32 %v2774_v37, %v2774_v37 }
 0x1e8   :  { %v5892_v18 = vpop.f32.mrb[30].mxu1  ;;  %v2713_v1 = vsub.f32 %v5332_v48, %v5894_v11 }
 0x1e9   :  { %8164 = vst [vmem:[#allocation152_spill] sm:$0xff] %v5892_v18 }
 0x1ea   :  { %v2776_v9 = vmul.f32 %v2713_v1, %v5225_v44 }
 0x1eb   :  { %v5882_v7 = vpop.f32.mrb[32].mxu0 }
 0x1ec   :  { %8159 = vst [vmem:[#allocation147_spill] sm:$0xff] %v5882_v7  ;;  %v839_v52 = vpop.f32.mrb[33].mxu0 }
 0x1ed   :  { %v5886_v28 = vpop.f32.mrb[34].mxu0  ;;  %v962_v52 = vpop.f32.mrb[31].mxu1 }
 0x1ee   :  { %8161 = vst [vmem:[#allocation149_spill] sm:$0xff] %v5886_v28  ;;  %v842_v38 = vpop.f32.mrb[35].mxu0 }
 0x1ef   :  { %v5904_v38 = vpop.f32.mrb[32].mxu1 }
 0x1f0   :  { %8166 = vst [vmem:[#allocation154_spill] sm:$0xff] %v5904_v38  ;;  %v967_v31 = vpop.f32.mrb[33].mxu1 }
 0x1f1   :  { %v5910_v52 = vpop.f32.mrb[34].mxu1  ;;  %v4083_v31 = vld [vmem:[%s7784_s1 + $0x8] sm:$0xff] }
 0x1f2   :  { %8168 = vst [vmem:[#allocation156_spill] sm:$0xff] %v5910_v52  ;;  %v2775_v48 = vmul.f32 %v4083_v31, %v2712_v41  ;;  %v2716_v52 = vsub.f32 %v5374_v22, %v5894_v11 }
 0x1f3   :  { %v5890_v17 = vpop.f32.mrb[36].mxu0 }
 0x1f4   :  { %8163 = vst [vmem:[#allocation151_spill] sm:$0xff] %v5890_v17  ;;  %v847_v46 = vpop.f32.mrb[37].mxu0  ;;  %v2779_v1 = vmul.f32 %v2716_v52, %v5249_v4 }
 0x1f5   :  { %v5896_v40 = vpop.f32.mrb[38].mxu0 }
 0x1f6   :  { %8165 = vst [vmem:[#allocation153_spill] sm:$0xff] %v5896_v40  ;;  %v850_v8 = vpop.f32.mrb[39].mxu0  ;;  %v2839_v40 = vmul.f32 %v2776_v9, %v2776_v9 }
 0x1f7   :  { %v2715_v8 = vsub.f32 %v5257_v12, %v5894_v11  ;;  %v2777_v12 = vmul.f32 %v2714_v21, %v5239_v50  ;;  %v2719_v50 = vsub.f32 %v5287_v55, %v5894_v11  ;;  %v2901_v21 = vsel %vm2900_vm0, %v2837_v27, 0.0 }
 0x1f8   :  { %v2720_v55 = vsub.f32 %v5410_v29, %v5894_v11  ;;  %v2721_v27 = vsub.f32 %v5299_v63, %v5894_v11 }
 0x1f9   :  { %v2778_v16 = vmul.f32 %v2715_v8, %v5317_v59  ;;  %v2840_v31 = vmul.f32 %v2777_v12, %v2777_v12  ;;  %v2780_v59 = vmul.f32 %v2717_v25, %v5265_v24  ;;  %v2842_v25 = vmul.f32 %v2779_v1, %v2779_v1 }
 0x1fb   :  { %v5908_v33 = vpop.f32.mrb[40].mxu0  ;;  %v2841_v9 = vmul.f32 %v2778_v16, %v2778_v16  ;;  %v2910_v1 = vsel %vm2900_vm0, %v2842_v25, 0.0  ;;  %v2724_v25 = vsub.f32 %v5446_v5, %v5894_v11 }
 0x1fc   :  { %8167 = vst [vmem:[#allocation155_spill] sm:$0xff] %v5908_v33  ;;  %v855_v46 = vpop.f32.mrb[41].mxu0  ;;  %v2838_v33 = vmul.f32 %v2775_v48, %v2775_v48 }
 0x1fd   :  { %v5921_v38 = vpop.f32.mrb[42].mxu0  ;;  %v970_v46 = vpop.f32.mrb[35].mxu1  ;;  %v2908_v42 = vsel %vm2900_vm0, %v2841_v9, 0.0 }
 0x1fe   :  { %8169 = vst [vmem:[#allocation157_spill] sm:$0xff] %v5921_v38  ;;  %v858_v18 = vpop.f32.mrb[43].mxu0  ;;  %v5929_v41 = vpop.f32.mrb[36].mxu1  ;;  %v2902_v8 = vsel %vm2900_vm0, %v2838_v33, 0.0  ;;  %v2782_v33 = vmul.f32 %v2719_v50, %v5277_v13  ;;  %v2723_v50 = vsub.f32 %v5322_v34, %v5894_v11 }
 0x1ff   :  { %8170 = vst [vmem:[#allocation158_spill] sm:$0xff] %v5929_v41  ;;  %v975_v44 = vpop.f32.mrb[37].mxu1  ;;  %v2718_v18 = vsub.f32 %v5392_v49, %v5894_v11  ;;  %v2903_v12 = vadd.f32 %v2902_v8, %v2901_v21 }
 0x200   :  { %v5939_v48 = vpop.f32.mrb[38].mxu1  ;;  %v2904_v44 = vsel %vm2900_vm0, %v2839_v40, 0.0  ;;  %v2843_v40 = vmul.f32 %v2780_v59, %v2780_v59  ;;  %v2784_v59 = vmul.f32 %v2721_v27, %v5295_v30  ;;  %v2845_v9 = vmul.f32 %v2782_v33, %v2782_v33 }
 0x201   :  { %8172 = vst [vmem:[#allocation160_spill] sm:$0xff] %v5939_v48  ;;  %v978_v4 = vpop.f32.mrb[39].mxu1  ;;  %v2781_v24 = vmul.f32 %v2718_v18, %v5341_v60  ;;  %v2905_v16 = vadd.f32 %v2904_v44, %v2903_v12  ;;  %v2783_v60 = vmul.f32 %v2720_v55, %v5361_v58  ;;  %v2725_v30 = vsub.f32 %v5343_v39, %v5894_v11 }
 0x202   :  { %v5954_v4 = vpop.f32.mrb[40].mxu1  ;;  %v2786_v27 = vmul.f32 %v2723_v50, %v5305_v35  ;;  %v2847_v33 = vmul.f32 %v2784_v59, %v2784_v59  ;;  %v2727_v50 = vsub.f32 %v5363_v47, %v5894_v11 }
 0x203   :  { %v5934_v46 = vpop.f32.mrb[44].mxu0  ;;  %8174 = vst [vmem:[#allocation162_spill] sm:$0xff] %v5954_v4  ;;  %v983_v8 = vpop.f32.mrb[41].mxu1  ;;  %v2844_v18 = vmul.f32 %v2781_v24, %v2781_v24  ;;  %v2788_v59 = vmul.f32 %v2725_v30, %v5330_v36  ;;  %v2729_v36 = vsub.f32 %v5383_v10, %v5894_v11 }
 0x204   :  { %8171 = vst [vmem:[#allocation159_spill] sm:$0xff] %v5934_v46  ;;  %v863_v37 = vpop.f32.mrb[45].mxu0  ;;  %v5962_v13 = vpop.f32.mrb[42].mxu1 }
 0x205   :  { %v5944_v49 = vpop.f32.mrb[46].mxu0  ;;  %v2906_v37 = vsel %vm2900_vm0, %v2840_v31, 0.0  ;;  %8176 = vst [vmem:[#allocation164_spill] sm:$0xff] %v5962_v13  ;;  %v986_v55 = vpop.f32.mrb[43].mxu1  ;;  %v2914_v8 = vsel %vm2900_vm0, %v2844_v18, 0.0 }
 0x206   :  { %8173 = vst [vmem:[#allocation161_spill] sm:$0xff] %v5944_v49  ;;  %v866_v52 = vpop.f32.mrb[47].mxu0  ;;  %v2907_v21 = vadd.f32 %v2906_v37, %v2905_v16  ;;  %v2912_v37 = vsel %vm2900_vm0, %v2843_v40, 0.0  ;;  %v2916_v40 = vsel %vm2900_vm0, %v2845_v9, 0.0  ;;  %v5978_v55 = vpop.f32.mrb[44].mxu1  ;;  %v2849_v9 = vmul.f32 %v2786_v27, %v2786_v27 }
 0x207   :  { %v2722_v52 = vsub.f32 %v5428_v14, %v5894_v11  ;;  %8178 = vst [vmem:[#allocation166_spill] sm:$0xff] %v5978_v55  ;;  %v2790_v27 = vmul.f32 %v2727_v50, %v5349_v2  ;;  %v2731_v50 = vsub.f32 %v5401_v51, %v5894_v11 }
 0x208   :  { %v2909_v44 = vadd.f32 %v2908_v42, %v2907_v21  ;;  %v2846_v21 = vmul.f32 %v2783_v60, %v2783_v60 }
 0x209   :  { %v2785_v42 = vmul.f32 %v2722_v52, %v5381_v20  ;;  %v2787_v20 = vmul.f32 %v2724_v25, %v5399_v3  ;;  %v2728_v25 = vsub.f32 %v5482_v62, %v5894_v11 }
 0x20a   :  { %v2911_v58 = vadd.f32 %v2910_v1, %v2909_v44  ;;  %v991_v44 = vpop.f32.mrb[45].mxu1  ;;  %v2918_v60 = vsel %vm2900_vm0, %v2846_v21, 0.0 }
 0x20b   :  { %v5960_v31 = vpop.f32.mrb[48].mxu0  ;;  %v2848_v52 = vmul.f32 %v2785_v42, %v2785_v42  ;;  %v5986_v35 = vpop.f32.mrb[46].mxu1 }
 0x20c   :  { %8175 = vst [vmem:[#allocation163_spill] sm:$0xff] %v5960_v31  ;;  %v871_v12 = vpop.f32.mrb[49].mxu0  ;;  %8180 = vst [vmem:[#allocation168_spill] sm:$0xff] %v5986_v35  ;;  %v994_v3 = vpop.f32.mrb[47].mxu1 }
 0x20d   :  { %v5968_v16 = vpop.f32.mrb[50].mxu0  ;;  %v2913_v12 = vadd.f32 %v2912_v37, %v2911_v58  ;;  %v2922_v44 = vsel %vm2900_vm0, %v2848_v52, 0.0  ;;  %v2924_v3 = vsel %vm2900_vm0, %v2849_v9, 0.0 }
 0x20e   :  { %8177 = vst [vmem:[#allocation165_spill] sm:$0xff] %v5968_v16  ;;  %v874_v24 = vpop.f32.mrb[51].mxu0 }
 0x20f   :  { %v2915_v1 = vadd.f32 %v2914_v8, %v2913_v12  ;;  %v2726_v24 = vsub.f32 %v5464_v53, %v5894_v11  ;;  %v2920_v8 = vsel %vm2900_vm0, %v2847_v33, 0.0  ;;  %v2851_v33 = vmul.f32 %v2788_v59, %v2788_v59 }
 0x211   :  { %v2917_v37 = vadd.f32 %v2916_v40, %v2915_v1  ;;  %v2789_v40 = vmul.f32 %v2726_v24, %v5417_v45  ;;  %v2850_v1 = vmul.f32 %v2787_v20, %v2787_v20  ;;  %v2730_v45 = vsub.f32 %v5500_v15, %v5894_v11 }
 0x213   :  { %v5984_v18 = vpop.f32.mrb[52].mxu0  ;;  %v2919_v42 = vadd.f32 %v2918_v60, %v2917_v37  ;;  %v6005_v37 = vpop.f32.mrb[48].mxu1  ;;  %v2852_v52 = vmul.f32 %v2789_v40, %v2789_v40 }
 0x214   :  { %8179 = vst [vmem:[#allocation167_spill] sm:$0xff] %v5984_v18  ;;  %v879_v58 = vpop.f32.mrb[53].mxu0  ;;  %8182 = vst [vmem:[#allocation170_spill] sm:$0xff] %v6005_v37  ;;  %v999_v20 = vpop.f32.mrb[49].mxu1 }
 0x215   :  { %v5992_v12 = vpop.f32.mrb[54].mxu0  ;;  %v1037_v58 = vadd.f32 %v5854_v6, %v5859_v19  ;;  %v2921_v30 = vadd.f32 %v2920_v8, %v2919_v42  ;;  %v2791_v6 = vmul.f32 %v2728_v25, %v5435_v61  ;;  %v6016_v42 = vpop.f32.mrb[50].mxu1  ;;  %v8196_v19 = vld [vmem:[#allocation50_spill] sm:$0xff] }
 0x216   :  { %8181 = vst [vmem:[#allocation169_spill] sm:$0xff] %v5992_v12  ;;  %v882_v21 = vpop.f32.mrb[55].mxu0  ;;  %8184 = vst [vmem:[#allocation172_spill] sm:$0xff] %v6016_v42  ;;  %v1002_v40 = vpop.f32.mrb[51].mxu1 }
 0x217   :  { %v1038_v60 = vadd.f32 %v1037_v58, %v5866_v43  ;;  %v2923_v24 = vadd.f32 %v2922_v44, %v2921_v30  ;;  %v2926_v21 = vsel %vm2900_vm0, %v2850_v1, 0.0  ;;  %v2792_v58 = vmul.f32 %v2729_v36, %v5372_v32 }
 0x218   :  { %v2853_v44 = vmul.f32 %v2790_v27, %v2790_v27  ;;  %v2928_v30 = vsel %vm2900_vm0, %v2851_v33, 0.0  ;;  %v2732_v1 = vsub.f32 %v5516_v26, %v5894_v11  ;;  %v2733_v36 = vsub.f32 %v5419_v0, %v5894_v11  ;;  %v8186_v33 = vld [vmem:[#allocation38_spill] sm:$0xff]  ;;  %v8200_v0 = vld [vmem:[#allocation155_spill] sm:$0xff] }
 0x219   :  { %v1039_v8 = vadd.f32 %v1038_v60, %v5870_v56  ;;  %v2925_v59 = vadd.f32 %v2924_v3, %v2923_v24  ;;  %v2793_v3 = vmul.f32 %v2730_v45, %v5453_v23  ;;  %v2854_v24 = vmul.f32 %v2791_v6, %v2791_v6  ;;  %v8188_v23 = vld [vmem:[#allocation58_spill] sm:$0xff] }
 0x21a   :  { %v2932_v40 = vsel %vm2900_vm0, %v2853_v44, 0.0  ;;  %v2734_v45 = vsub.f32 %v8188_v23, %v5894_v11 }
 0x21b   :  { %v6012_v2 = vpop.f32.mrb[56].mxu0  ;;  %v1040_v61 = vadd.f32 %v1039_v8, %v5874_v54  ;;  %v2927_v60 = vadd.f32 %v2926_v21, %v2925_v59  ;;  %v2794_v8 = vmul.f32 %v2731_v50, %v8186_v33  ;;  %v2855_v54 = vmul.f32 %v2792_v58, %v2792_v58  ;;  %v6033_v21 = vpop.f32.mrb[52].mxu1  ;;  %v8189_v59 = vld [vmem:[#allocation47_spill] sm:$0xff] }
 0x21c   :  { %8183 = vst [vmem:[#allocation171_spill] sm:$0xff] %v6012_v2  ;;  %v887_v9 = vpop.f32.mrb[57].mxu0  ;;  %8187 = vst [vmem:[#allocation38_spill] sm:$0xff] %v6033_v21  ;;  %v8191_v58 = vld [vmem:[#allocation43_spill] sm:$0xff] }
 0x21d   :  { %v6021_v25 = vpop.f32.mrb[58].mxu0  ;;  %v2930_v9 = vsel %vm2900_vm0, %v2852_v52, 0.0  ;;  %v1041_v32 = vadd.f32 %v1040_v61, %v5878_v57  ;;  %v2929_v27 = vadd.f32 %v2928_v30, %v2927_v60  ;;  %v1007_v52 = vpop.f32.mrb[53].mxu1  ;;  %v2795_v61 = vmul.f32 %v2732_v1, %v8189_v59 }
 0x21e   :  { %8185 = vst [vmem:[#allocation173_spill] sm:$0xff] %v6021_v25  ;;  %v890_v20 = vpop.f32.mrb[59].mxu0  ;;  %v2934_v57 = vsel %vm2900_vm0, %v2854_v24, 0.0  ;;  %v2735_v44 = vsub.f32 %v8191_v58, %v5894_v11  ;;  %v6044_v33 = vpop.f32.mrb[54].mxu1  ;;  %v8197_v58 = vld [vmem:[#allocation153_spill] sm:$0xff] }
 0x21f   :  { %v1042_v56 = vadd.f32 %v1041_v32, %v5882_v7  ;;  %v2931_v6 = vadd.f32 %v2930_v9, %v2929_v27  ;;  %v2856_v20 = vmul.f32 %v2793_v3, %v2793_v3  ;;  %8192 = vst [vmem:[#allocation174_spill] sm:$0xff] %v6044_v33  ;;  %v8193_v7 = vld [vmem:[#allocation40_spill] sm:$0xff]  ;;  %v2857_v9 = vmul.f32 %v2794_v8, %v2794_v8  ;;  %v1010_v24 = vpop.f32.mrb[55].mxu1 }
 0x220   :  { %v2796_v43 = vmul.f32 %v2733_v36, %v8193_v7  ;;  %v2936_v27 = vsel %vm2900_vm0, %v2855_v54, 0.0  ;;  %v8198_v36 = vld [vmem:[#allocation45_spill] sm:$0xff] }
 0x221   :  { %v1043_v30 = vadd.f32 %v1042_v56, %v5886_v28  ;;  %v2933_v60 = vadd.f32 %v2932_v40, %v2931_v6  ;;  %v8195_v56 = vld [vmem:[#allocation62_spill] sm:$0xff]  ;;  %v2797_v40 = vmul.f32 %v2734_v45, %v8196_v19  ;;  %v2858_v6 = vmul.f32 %v2795_v61, %v2795_v61  ;;  %v8202_v19 = vld [vmem:[#allocation65_spill] sm:$0xff] }
 0x222   :  { %v2736_v52 = vsub.f32 %v8195_v56, %v5894_v11  ;;  %v2737_v54 = vsub.f32 %v8198_v36, %v5894_v11  ;;  %v2859_v23 = vmul.f32 %v2796_v43, %v2796_v43  ;;  %v2940_v24 = vsel %vm2900_vm0, %v2857_v9, 0.0  ;;  %v8205_v43 = vld [vmem:[#allocation48_spill] sm:$0xff] }
 0x223   :  { %v6040_v50 = vpop.f32.mrb[60].mxu0  ;;  %v1044_v1 = vadd.f32 %v1043_v30, %v5890_v17  ;;  %v2935_v59 = vadd.f32 %v2934_v57, %v2933_v60  ;;  %v8199_v30 = vld [vmem:[#allocation42_spill] sm:$0xff]  ;;  %v6061_v57 = vpop.f32.mrb[56].mxu1  ;;  %v2739_v9 = vsub.f32 %v8205_v43, %v5894_v11 }
 0x224   :  { %8190 = vst [vmem:[#allocation47_spill] sm:$0xff] %v6040_v50  ;;  %v895_v32 = vpop.f32.mrb[61].mxu0  ;;  %v2798_v17 = vmul.f32 %v2735_v44, %v8199_v30  ;;  %8201 = vst [vmem:[#allocation50_spill] sm:$0xff] %v6061_v57  ;;  %v1015_v61 = vpop.f32.mrb[57].mxu1  ;;  %v8206_v30 = vld [vmem:[#allocation44_spill] sm:$0xff] }
 0x225   :  { %v6049_v3 = vpop.f32.mrb[62].mxu0  ;;  %v2938_v32 = vsel %vm2900_vm0, %v2856_v20, 0.0  ;;  %v1045_v7 = vadd.f32 %v1044_v1, %v8197_v58  ;;  %v2937_v8 = vadd.f32 %v2936_v27, %v2935_v59  ;;  %v8203_v20 = vld [vmem:[#allocation53_spill] sm:$0xff]  ;;  %v2860_v1 = vmul.f32 %v2797_v40, %v2797_v40  ;;  %v6068_v44 = vpop.f32.mrb[58].mxu1  ;;  %v8208_v61 = vld [vmem:[#allocation56_spill] sm:$0xff] }
 0x226   :  { %8194 = vst [vmem:[#allocation40_spill] sm:$0xff] %v6049_v3  ;;  %v898_v28 = vpop.f32.mrb[63].mxu0  ;;  %v2799_v60 = vmul.f32 %v2736_v52, %v8203_v20  ;;  %v2942_v58 = vsel %vm2900_vm0, %v2858_v6, 0.0  ;;  %8204 = vst [vmem:[#allocation42_spill] sm:$0xff] %v6068_v44  ;;  %v2861_v36 = vmul.f32 %v2798_v17, %v2798_v17  ;;  %v8207_v52 = vld [vmem:[#allocation69_spill] sm:$0xff]  ;;  %v8210_v17 = vld [vmem:[#allocation46_spill] sm:$0xff] }
 0x227   :  { %v1046_v56 = vadd.f32 %v1045_v7, %v8200_v0  ;;  %v2738_v28 = vsub.f32 %v8202_v19, %v5894_v11  ;;  %v2939_v45 = vadd.f32 %v2938_v32, %v2937_v8  ;;  %v1018_v7 = vpop.f32.mrb[59].mxu1  ;;  %v2800_v0 = vmul.f32 %v2737_v54, %v8206_v30 }
 0x228   :  { %v2944_v32 = vsel %vm2900_vm0, %v2859_v23, 0.0  ;;  %v2740_v40 = vsub.f32 %v8207_v52, %v5894_v11  ;;  %v2862_v20 = vmul.f32 %v2799_v60, %v2799_v60  ;;  %v2802_v7 = vmul.f32 %v2739_v9, %v8210_v17  ;;  %v8215_v17 = vld [vmem:[#allocation49_spill] sm:$0xff] }
 0x229   :  { %v1047_v27 = vadd.f32 %v1046_v56, %v5921_v38  ;;  %v2941_v59 = vadd.f32 %v2940_v24, %v2939_v45  ;;  %v2801_v56 = vmul.f32 %v2738_v28, %v8208_v61  ;;  %v2946_v38 = vsel %vm2900_vm0, %v2860_v1, 0.0  ;;  %v8209_v24 = vld [vmem:[#allocation51_spill] sm:$0xff] }
 0x22a   :  { %v2741_v45 = vsub.f32 %v8209_v24, %v5894_v11  ;;  %v2863_v23 = vmul.f32 %v2800_v0, %v2800_v0  ;;  %v8214_v0 = vld [vmem:[#allocation55_spill] sm:$0xff]  ;;  %v2865_v24 = vmul.f32 %v2802_v7, %v2802_v7  ;;  %v8219_v7 = vld [vmem:[#allocation52_spill] sm:$0xff] }
 0x22b   :  { %v1048_v8 = vadd.f32 %v1047_v27, %v5934_v46  ;;  %v2943_v6 = vadd.f32 %v2942_v58, %v2941_v59  ;;  %v2948_v27 = vsel %vm2900_vm0, %v2861_v36, 0.0  ;;  %v6085_v46 = vpop.f32.mrb[60].mxu1  ;;  %v8212_v58 = vld [vmem:[#allocation73_spill] sm:$0xff]  ;;  %v8213_v59 = vld [vmem:[#allocation59_spill] sm:$0xff]  ;;  %v2864_v61 = vmul.f32 %v2801_v56, %v2801_v56 }
 0x22c   :  { %8211 = vst [vmem:[#allocation65_spill] sm:$0xff] %v6085_v46  ;;  %v2742_v28 = vsub.f32 %v8212_v58, %v5894_v11  ;;  %v1023_v1 = vpop.f32.mrb[61].mxu1  ;;  %v2743_v36 = vsub.f32 %v8214_v0, %v5894_v11  ;;  %v2952_v58 = vsel %vm2900_vm0, %v2863_v23, 0.0 }
 0x22d   :  { %v1049_v43 = vadd.f32 %v1048_v8, %v5944_v49  ;;  %v2945_v54 = vadd.f32 %v2944_v32, %v2943_v6  ;;  %v2803_v8 = vmul.f32 %v2740_v40, %v8213_v59  ;;  %v2950_v49 = vsel %vm2900_vm0, %v2862_v20, 0.0  ;;  %v1024_v9 = vpop.f32.mrb[62].mxu1  ;;  %v8216_v40 = vld [vmem:[#allocation76_spill] sm:$0xff]  ;;  %v8217_v20 = vld [vmem:[#allocation63_spill] sm:$0xff] }
 0x22e   :  { %v2744_v56 = vsub.f32 %v8216_v40, %v5894_v11  ;;  %v2805_v1 = vmul.f32 %v2742_v28, %v8217_v20  ;;  %v2954_v59 = vsel %vm2900_vm0, %v2864_v61, 0.0 }
 0x22f   :  { %v1050_v30 = vadd.f32 %v1049_v43, %v5960_v31  ;;  %v2947_v60 = vadd.f32 %v2946_v38, %v2945_v54  ;;  %v1025_v43 = vpop.f32.mrb[63].mxu1  ;;  %v2804_v31 = vmul.f32 %v2741_v45, %v8215_v17 }
 0x230   :  { %v2806_v43 = vmul.f32 %v2743_v36, %v8219_v7  ;;  %v2868_v61 = vmul.f32 %v2805_v1, %v2805_v1  ;;  %v8225_v1 = vld [vmem:[#allocation70_spill] sm:$0xff] }
 0x231   :  { %v1051_v32 = vadd.f32 %v1050_v30, %v5968_v16  ;;  %v2949_v6 = vadd.f32 %v2948_v27, %v2947_v60  ;;  %v2866_v30 = vmul.f32 %v2803_v8, %v2803_v8  ;;  %v8218_v27 = vld [vmem:[#allocation60_spill] sm:$0xff]  ;;  %v2867_v23 = vmul.f32 %v2804_v31, %v2804_v31  ;;  %v8221_v8 = vld [vmem:[#allocation67_spill] sm:$0xff]  ;;  %v8223_v31 = vld [vmem:[#allocation54_spill] sm:$0xff] }
 0x232   :  { %v2745_v60 = vsub.f32 %v8218_v27, %v5894_v11  ;;  %v2807_v20 = vmul.f32 %v2744_v56, %v8221_v8 }
 0x233   :  { %v1052_v38 = vadd.f32 %v1051_v32, %v5984_v18  ;;  %v2951_v54 = vadd.f32 %v2950_v49, %v2949_v6  ;;  %v2956_v32 = vsel %vm2900_vm0, %v2865_v24, 0.0  ;;  %v8220_v49 = vld [vmem:[#allocation80_spill] sm:$0xff]  ;;  %v2869_v24 = vmul.f32 %v2806_v43, %v2806_v43  ;;  %v8227_v43 = vld [vmem:[#allocation57_spill] sm:$0xff] }
 0x234   :  { %v2746_v6 = vsub.f32 %v8220_v49, %v5894_v11  ;;  %v2808_v7 = vmul.f32 %v2745_v60, %v8223_v31 }
 0x235   :  { %v1053_v9 = vadd.f32 %v1052_v38, %v5992_v12  ;;  %v2953_v45 = vadd.f32 %v2952_v58, %v2951_v54  ;;  %v2958_v38 = vsel %vm2900_vm0, %v2866_v30, 0.0  ;;  %v8222_v58 = vld [vmem:[#allocation66_spill] sm:$0xff]  ;;  %v2870_v30 = vmul.f32 %v2807_v20, %v2807_v20 }
 0x236   :  { %v2747_v54 = vsub.f32 %v8222_v58, %v5894_v11  ;;  %v2809_v8 = vmul.f32 %v2746_v6, %v8225_v1  ;;  %v8230_v20 = vld [vmem:[#allocation74_spill] sm:$0xff] }
 0x237   :  { %v1054_v17 = vadd.f32 %v1053_v9, %v6012_v2  ;;  %v2955_v28 = vadd.f32 %v2954_v59, %v2953_v45  ;;  %v2960_v9 = vsel %vm2900_vm0, %v2867_v23, 0.0  ;;  %v8224_v59 = vld [vmem:[#allocation84_spill] sm:$0xff]  ;;  %v2871_v23 = vmul.f32 %v2808_v7, %v2808_v7  ;;  %v8233_v7 = vld [vmem:[#allocation61_spill] sm:$0xff] }
 0x238   :  { %v2748_v45 = vsub.f32 %v8224_v59, %v5894_v11  ;;  %v2810_v31 = vmul.f32 %v2747_v54, %v8227_v43 }
 0x239   :  { %v1055_v12 = vadd.f32 %v1054_v17, %v6021_v25  ;;  %v2957_v36 = vadd.f32 %v2956_v32, %v2955_v28  ;;  %v2962_v17 = vsel %vm2900_vm0, %v2868_v61, 0.0  ;;  %v8226_v32 = vld [vmem:[#allocation71_spill] sm:$0xff]  ;;  %v2872_v61 = vmul.f32 %v2809_v8, %v2809_v8  ;;  %v8236_v8 = vld [vmem:[#allocation78_spill] sm:$0xff] }
 0x23a   :  { %v2749_v28 = vsub.f32 %v8226_v32, %v5894_v11  ;;  %v2811_v1 = vmul.f32 %v2748_v45, %v8230_v20 }
 0x23b   :  { %v1056_v2 = vadd.f32 %v1055_v12, %v6040_v50  ;;  %v2959_v56 = vadd.f32 %v2958_v38, %v2957_v36  ;;  %v2964_v12 = vsel %vm2900_vm0, %v2869_v24, 0.0  ;;  %v8228_v50 = vld [vmem:[#allocation114_spill] sm:$0xff]  ;;  %v8229_v38 = vld [vmem:[#allocation87_spill] sm:$0xff]  ;;  %v2873_v24 = vmul.f32 %v2810_v31, %v2810_v31  ;;  %v8239_v31 = vld [vmem:[#allocation64_spill] sm:$0xff] }
 0x23c   :  { %v2750_v36 = vsub.f32 %v8229_v38, %v5894_v11  ;;  %v2812_v43 = vmul.f32 %v2749_v28, %v8233_v7 }
 0x23d   :  { %v1057_v25 = vadd.f32 %v1056_v2, %v6049_v3  ;;  %v2961_v60 = vadd.f32 %v2960_v9, %v2959_v56  ;;  %v2966_v2 = vsel %vm2900_vm0, %v2870_v30, 0.0  ;;  %v8231_v3 = vld [vmem:[#allocation117_spill] sm:$0xff]  ;;  %v2874_v30 = vmul.f32 %v2811_v1, %v2811_v1 }
 0x23e   :  { %v8232_v9 = vld [vmem:[#allocation77_spill] sm:$0xff]  ;;  %v2813_v20 = vmul.f32 %v2750_v36, %v8236_v8 }
 0x23f   :  { %v1058_v18 = vadd.f32 %v1057_v25, %v8228_v50  ;;  %v2963_v6 = vadd.f32 %v2962_v17, %v2961_v60  ;;  %v2751_v56 = vsub.f32 %v8232_v9, %v5894_v11  ;;  %v2968_v25 = vsel %vm2900_vm0, %v2871_v23, 0.0  ;;  %v8234_v50 = vld [vmem:[#allocation120_spill] sm:$0xff]  ;;  %v8235_v17 = vld [vmem:[#allocation90_spill] sm:$0xff]  ;;  %v8242_v1 = vld [vmem:[#allocation81_spill] sm:$0xff] }
 0x240   :  { %v2752_v60 = vsub.f32 %v8235_v17, %v5894_v11  ;;  %v2875_v23 = vmul.f32 %v2812_v43, %v2812_v43  ;;  %v8245_v43 = vld [vmem:[#allocation68_spill] sm:$0xff] }
 0x241   :  { %v1059_v16 = vadd.f32 %v1058_v18, %v8231_v3  ;;  %v2965_v54 = vadd.f32 %v2964_v12, %v2963_v6  ;;  %v2970_v18 = vsel %vm2900_vm0, %v2872_v61, 0.0  ;;  %v8237_v3 = vld [vmem:[#allocation123_spill] sm:$0xff]  ;;  %v8238_v12 = vld [vmem:[#allocation82_spill] sm:$0xff]  ;;  %v2814_v7 = vmul.f32 %v2751_v56, %v8239_v31 }
 0x242   :  { %v2753_v6 = vsub.f32 %v8238_v12, %v5894_v11  ;;  %v2815_v8 = vmul.f32 %v2752_v60, %v8242_v1  ;;  %v2876_v61 = vmul.f32 %v2813_v20, %v2813_v20  ;;  %v8248_v20 = vld [vmem:[#allocation85_spill] sm:$0xff] }
 0x243   :  { %v1060_v32 = vadd.f32 %v1059_v16, %v8234_v50  ;;  %v2967_v45 = vadd.f32 %v2966_v2, %v2965_v54  ;;  %v2972_v16 = vsel %vm2900_vm0, %v2873_v24, 0.0  ;;  %v8240_v50 = vld [vmem:[#allocation126_spill] sm:$0xff]  ;;  %v8241_v2 = vld [vmem:[#allocation93_spill] sm:$0xff]  ;;  %v2877_v24 = vmul.f32 %v2814_v7, %v2814_v7  ;;  %v8251_v7 = vld [vmem:[#allocation72_spill] sm:$0xff] }
 0x244   :  { %v2754_v54 = vsub.f32 %v8241_v2, %v5894_v11  ;;  %v2816_v31 = vmul.f32 %v2753_v6, %v8245_v43 }
 0x245   :  { %v1061_v38 = vadd.f32 %v1060_v32, %v8237_v3  ;;  %v2969_v28 = vadd.f32 %v2968_v25, %v2967_v45  ;;  %v2974_v32 = vsel %vm2900_vm0, %v2874_v30, 0.0  ;;  %v8243_v3 = vld [vmem:[#allocation129_spill] sm:$0xff]  ;;  %v8244_v25 = vld [vmem:[#allocation88_spill] sm:$0xff]  ;;  %v2878_v30 = vmul.f32 %v2815_v8, %v2815_v8 }
 0x246   :  { %v2755_v45 = vsub.f32 %v8244_v25, %v5894_v11  ;;  %v2817_v1 = vmul.f32 %v2754_v54, %v8248_v20  ;;  %v8254_v8 = vld [vmem:[#allocation89_spill] sm:$0xff] }
 0x247   :  { %v1062_v9 = vadd.f32 %v1061_v38, %v8240_v50  ;;  %v2971_v36 = vadd.f32 %v2970_v18, %v2969_v28  ;;  %v2976_v38 = vsel %vm2900_vm0, %v2875_v23, 0.0  ;;  %v8246_v50 = vld [vmem:[#allocation132_spill] sm:$0xff]  ;;  %v8247_v18 = vld [vmem:[#allocation95_spill] sm:$0xff]  ;;  %v2879_v23 = vmul.f32 %v2816_v31, %v2816_v31 }
 0x248   :  { %v2756_v28 = vsub.f32 %v8247_v18, %v5894_v11  ;;  %v2818_v43 = vmul.f32 %v2755_v45, %v8251_v7  ;;  %v8257_v31 = vld [vmem:[#allocation75_spill] sm:$0xff] }
 0x249   :  { %v1063_v17 = vadd.f32 %v1062_v9, %v8243_v3  ;;  %v2973_v56 = vadd.f32 %v2972_v16, %v2971_v36  ;;  %v2978_v9 = vsel %vm2900_vm0, %v2876_v61, 0.0  ;;  %v8249_v3 = vld [vmem:[#allocation135_spill] sm:$0xff]  ;;  %v8250_v16 = vld [vmem:[#allocation92_spill] sm:$0xff]  ;;  %v2880_v61 = vmul.f32 %v2817_v1, %v2817_v1 }
 0x24a   :  { %v2757_v36 = vsub.f32 %v8250_v16, %v5894_v11  ;;  %v2819_v20 = vmul.f32 %v2756_v28, %v8254_v8  ;;  %v8260_v1 = vld [vmem:[#allocation91_spill] sm:$0xff] }
 0x24b   :  { %v1064_v12 = vadd.f32 %v1063_v17, %v8246_v50  ;;  %v2975_v60 = vadd.f32 %v2974_v32, %v2973_v56  ;;  %v2980_v17 = vsel %vm2900_vm0, %v2877_v24, 0.0  ;;  %v8252_v50 = vld [vmem:[#allocation138_spill] sm:$0xff]  ;;  %v2881_v24 = vmul.f32 %v2818_v43, %v2818_v43  ;;  %v8263_v43 = vld [vmem:[#allocation79_spill] sm:$0xff] }
 0x24c   :  { %v8253_v32 = vld [vmem:[#allocation98_spill] sm:$0xff]  ;;  %v2820_v7 = vmul.f32 %v2757_v36, %v8257_v31 }
 0x24d   :  { %v1065_v2 = vadd.f32 %v1064_v12, %v8249_v3  ;;  %v2977_v6 = vadd.f32 %v2976_v38, %v2975_v60  ;;  %v2758_v56 = vsub.f32 %v8253_v32, %v5894_v11  ;;  %v2982_v12 = vsel %vm2900_vm0, %v2878_v30, 0.0  ;;  %v8255_v3 = vld [vmem:[#allocation140_spill] sm:$0xff] }
 0x24e   :  { %v8256_v38 = vld [vmem:[#allocation96_spill] sm:$0xff]  ;;  %v2882_v30 = vmul.f32 %v2819_v20, %v2819_v20  ;;  %v8266_v20 = vld [vmem:[#allocation94_spill] sm:$0xff] }
 0x24f   :  { %v1066_v25 = vadd.f32 %v1065_v2, %v8252_v50  ;;  %v2979_v54 = vadd.f32 %v2978_v9, %v2977_v6  ;;  %v2759_v60 = vsub.f32 %v8256_v38, %v5894_v11  ;;  %v2984_v2 = vsel %vm2900_vm0, %v2879_v23, 0.0  ;;  %v8258_v50 = vld [vmem:[#allocation142_spill] sm:$0xff]  ;;  %v8259_v9 = vld [vmem:[#allocation101_spill] sm:$0xff] }
 0x250   :  { %v2760_v6 = vsub.f32 %v8259_v9, %v5894_v11  ;;  %v2821_v8 = vmul.f32 %v2758_v56, %v8260_v1  ;;  %v2883_v23 = vmul.f32 %v2820_v7, %v2820_v7  ;;  %v8269_v7 = vld [vmem:[#allocation83_spill] sm:$0xff] }
 0x251   :  { %v1067_v18 = vadd.f32 %v1066_v25, %v8255_v3  ;;  %v2981_v45 = vadd.f32 %v2980_v17, %v2979_v54  ;;  %v2986_v25 = vsel %vm2900_vm0, %v2880_v61, 0.0  ;;  %v8261_v3 = vld [vmem:[#allocation144_spill] sm:$0xff]  ;;  %v2822_v31 = vmul.f32 %v2759_v60, %v8263_v43 }
 0x252   :  { %v8262_v17 = vld [vmem:[#allocation100_spill] sm:$0xff]  ;;  %v2823_v1 = vmul.f32 %v2760_v6, %v8266_v20  ;;  %v2884_v61 = vmul.f32 %v2821_v8, %v2821_v8  ;;  %v8272_v8 = vld [vmem:[#allocation97_spill] sm:$0xff] }
 0x253   :  { %v1068_v16 = vadd.f32 %v1067_v18, %v8258_v50  ;;  %v2983_v28 = vadd.f32 %v2982_v12, %v2981_v45  ;;  %v2761_v54 = vsub.f32 %v8262_v17, %v5894_v11  ;;  %v2988_v18 = vsel %vm2900_vm0, %v2881_v24, 0.0  ;;  %v8264_v50 = vld [vmem:[#allocation146_spill] sm:$0xff]  ;;  %v8265_v12 = vld [vmem:[#allocation105_spill] sm:$0xff] }
 0x254   :  { %v2762_v45 = vsub.f32 %v8265_v12, %v5894_v11  ;;  %v2885_v24 = vmul.f32 %v2822_v31, %v2822_v31  ;;  %v8275_v31 = vld [vmem:[#allocation86_spill] sm:$0xff] }
 0x255   :  { %v1069_v32 = vadd.f32 %v1068_v16, %v8261_v3  ;;  %v2985_v36 = vadd.f32 %v2984_v2, %v2983_v28  ;;  %v2990_v16 = vsel %vm2900_vm0, %v2882_v30, 0.0  ;;  %v8267_v3 = vld [vmem:[#allocation148_spill] sm:$0xff]  ;;  %v8268_v2 = vld [vmem:[#allocation106_spill] sm:$0xff]  ;;  %v2824_v43 = vmul.f32 %v2761_v54, %v8269_v7 }
 0x256   :  { %v2763_v28 = vsub.f32 %v8268_v2, %v5894_v11  ;;  %v2825_v20 = vmul.f32 %v2762_v45, %v8272_v8  ;;  %v2886_v30 = vmul.f32 %v2823_v1, %v2823_v1  ;;  %v8278_v1 = vld [vmem:[#allocation99_spill] sm:$0xff] }
 0x257   :  { %v1070_v38 = vadd.f32 %v1069_v32, %v8264_v50  ;;  %v2987_v56 = vadd.f32 %v2986_v25, %v2985_v36  ;;  %v2992_v32 = vsel %vm2900_vm0, %v2883_v23, 0.0  ;;  %v8270_v50 = vld [vmem:[#allocation150_spill] sm:$0xff]  ;;  %v8271_v25 = vld [vmem:[#allocation108_spill] sm:$0xff]  ;;  %v2887_v23 = vmul.f32 %v2824_v43, %v2824_v43 }
 0x258   :  { %v2764_v36 = vsub.f32 %v8271_v25, %v5894_v11  ;;  %v2826_v7 = vmul.f32 %v2763_v28, %v8275_v31  ;;  %v4084_v43 = vld [vmem:[%s7784_s1 + $0x1b0] sm:$0xff] }
 0x259   :  { %v1071_v9 = vadd.f32 %v1070_v38, %v8267_v3  ;;  %v2989_v60 = vadd.f32 %v2988_v18, %v2987_v56  ;;  %v2994_v38 = vsel %vm2900_vm0, %v2884_v61, 0.0  ;;  %v8273_v3 = vld [vmem:[#allocation152_spill] sm:$0xff]  ;;  %v2888_v61 = vmul.f32 %v2825_v20, %v2825_v20 }
 0x25a   :  { %v8274_v18 = vld [vmem:[#allocation112_spill] sm:$0xff]  ;;  %v2827_v8 = vmul.f32 %v2764_v36, %v8278_v1  ;;  %v3000_v31 = vsel %vm2900_vm0, %v2887_v23, 0.0  ;;  %v8281_v36 = vld [vmem:[#allocation121_spill] sm:$0xff] }
 0x25b   :  { %v1072_v17 = vadd.f32 %v1071_v9, %v8270_v50  ;;  %v2991_v6 = vadd.f32 %v2990_v16, %v2989_v60  ;;  %v2765_v56 = vsub.f32 %v8274_v18, %v5894_v11  ;;  %v2996_v9 = vsel %vm2900_vm0, %v2885_v24, 0.0  ;;  %v8276_v50 = vld [vmem:[#allocation154_spill] sm:$0xff]  ;;  %v8277_v16 = vld [vmem:[#allocation115_spill] sm:$0xff] }
 0x25c   :  { %v2766_v60 = vsub.f32 %v8277_v16, %v5894_v11  ;;  %v2889_v24 = vmul.f32 %v2826_v7, %v2826_v7  ;;  %v2768_v20 = vsub.f32 %v8281_v36, %v5894_v11  ;;  %v2890_v1 = vmul.f32 %v2827_v8, %v2827_v8  ;;  %v4085_v7 = vld [vmem:[%s7784_s1 + $0x1c0] sm:$0xff] }
 0x25d   :  { %v1073_v12 = vadd.f32 %v1072_v17, %v8273_v3  ;;  %v2993_v54 = vadd.f32 %v2992_v32, %v2991_v6  ;;  %v2998_v17 = vsel %vm2900_vm0, %v2886_v30, 0.0  ;;  %v8279_v3 = vld [vmem:[#allocation156_spill] sm:$0xff]  ;;  %v8280_v32 = vld [vmem:[#allocation119_spill] sm:$0xff] }
 0x25e   :  { %v2767_v6 = vsub.f32 %v8280_v32, %v5894_v11 }
 0x25f   :  { %v1074_v2 = vadd.f32 %v1073_v12, %v8276_v50  ;;  %v2995_v45 = vadd.f32 %v2994_v38, %v2993_v54  ;;  %v2828_v12 = vmul.f32 %v4084_v43, %v2765_v56  ;;  %v8282_v54 = vld [vmem:[#allocation104_spill] sm:$0xff]  ;;  %v3004_v43 = vsel %vm2900_vm0, %v2889_v24, 0.0 }
 0x261   :  { %v1075_v25 = vadd.f32 %v1074_v2, %v8279_v3  ;;  %v2997_v28 = vadd.f32 %v2996_v9, %v2995_v45  ;;  %v2829_v2 = vmul.f32 %v2766_v60, %v8282_v54  ;;  %v3002_v3 = vsel %vm2900_vm0, %v2888_v61, 0.0  ;;  %v8283_v45 = vld [vmem:[#allocation125_spill] sm:$0xff]  ;;  %v8284_v60 = vld [vmem:[#allocation127_spill] sm:$0xff] }
 0x262   :  { %v2769_v50 = vsub.f32 %v8283_v45, %v5894_v11  ;;  %v2891_v23 = vmul.f32 %v2828_v12, %v2828_v12  ;;  %v2770_v8 = vsub.f32 %v8284_v60, %v5894_v11  ;;  %v4086_v12 = vld [vmem:[%s7784_s1 + $0x1d0] sm:$0xff] }
 0x263   :  { %v1076_v38 = vadd.f32 %v1075_v25, %v5929_v41  ;;  %v2999_v30 = vadd.f32 %v2998_v17, %v2997_v28  ;;  %v2830_v25 = vmul.f32 %v4085_v7, %v2767_v6  ;;  %v8285_v28 = vld [vmem:[#allocation107_spill] sm:$0xff]  ;;  %v2892_v54 = vmul.f32 %v2829_v2, %v2829_v2 }
 0x264   :  { %v2832_v24 = vmul.f32 %v4086_v12, %v2769_v50  ;;  %v3008_v7 = vsel %vm2900_vm0, %v2891_v23, 0.0 }
 0x265   :  { %v1077_v9 = vadd.f32 %v1076_v38, %v5939_v48  ;;  %v3001_v56 = vadd.f32 %v3000_v31, %v2999_v30  ;;  %v2831_v38 = vmul.f32 %v2768_v20, %v8285_v28  ;;  %v3006_v48 = vsel %vm2900_vm0, %v2890_v1, 0.0  ;;  %v8286_v30 = vld [vmem:[#allocation131_spill] sm:$0xff]  ;;  %v8287_v20 = vld [vmem:[#allocation133_spill] sm:$0xff] }
 0x266   :  { %v2771_v41 = vsub.f32 %v8286_v30, %v5894_v11  ;;  %v2772_v2 = vsub.f32 %v8287_v20, %v5894_v11 }
 0x267   :  { %v1078_v17 = vadd.f32 %v1077_v9, %v5954_v4  ;;  %v3003_v61 = vadd.f32 %v3002_v3, %v3001_v56  ;;  %v2893_v9 = vmul.f32 %v2830_v25, %v2830_v25  ;;  %v8288_v56 = vld [vmem:[#allocation111_spill] sm:$0xff]  ;;  %v2894_v28 = vmul.f32 %v2831_v38, %v2831_v38  ;;  %v8290_v38 = vld [vmem:[#allocation113_spill] sm:$0xff] }
 0x268   :  { %v4087_v25 = vld [vmem:[%s7784_s1 + $0x1e0] sm:$0xff] }
 0x269   :  { %v1079_v31 = vadd.f32 %v1078_v17, %v5962_v13  ;;  %v3005_v6 = vadd.f32 %v3004_v43, %v3003_v61  ;;  %v2833_v17 = vmul.f32 %v2770_v8, %v8288_v56  ;;  %v3010_v13 = vsel %vm2900_vm0, %v2892_v54, 0.0  ;;  %v8289_v61 = vld [vmem:[#allocation137_spill] sm:$0xff] }
 0x26a   :  { %v2773_v4 = vsub.f32 %v8289_v61, %v5894_v11  ;;  %v2834_v23 = vmul.f32 %v4087_v25, %v2771_v41  ;;  %v3012_v12 = vsel %vm2900_vm0, %v2893_v9, 0.0 }
 0x26b   :  { %v1080_v3 = vadd.f32 %v1079_v31, %v5978_v55  ;;  %v3007_v1 = vadd.f32 %v3006_v48, %v3005_v6  ;;  %v2895_v31 = vmul.f32 %v2832_v24, %v2832_v24  ;;  %v2835_v6 = vmul.f32 %v2772_v2, %v8290_v38  ;;  %v8318_v55 = vld [vmem:[#allocation88_spill] sm:$0xff] }
 0x26c   :  { %v2896_v54 = vmul.f32 %v2833_v17, %v2833_v17  ;;  %v2897_v41 = vmul.f32 %v2834_v23, %v2834_v23 }
 0x26d   :  { %v1081_v43 = vadd.f32 %v1080_v3, %v5986_v35  ;;  %v3009_v50 = vadd.f32 %v3008_v7, %v3007_v1  ;;  %v3014_v3 = vsel %vm2900_vm0, %v2894_v28, 0.0  ;;  %v4088_v7 = vld [vmem:[%s7784_s1 + $0x1f0] sm:$0xff]  ;;  %v3016_v24 = vsel %vm2900_vm0, %v2895_v31, 0.0  ;;  %s3033_s1 = sld [smem:[#allocation18]] }
 0x26e   :  { %v2836_v1 = vmul.f32 %v4088_v7, %v2773_v4  ;;  %v3018_v2 = vsel %vm2900_vm0, %v2896_v54, 0.0  ;;  %v3020_v25 = vsel %vm2900_vm0, %v2897_v41, 0.0 }
 0x26f   :  { %v1082_v48 = vadd.f32 %v1081_v43, %v6005_v37  ;;  %v3011_v8 = vadd.f32 %v3010_v13, %v3009_v50  ;;  %v2898_v13 = vmul.f32 %v2835_v6, %v2835_v6  ;;  %v8316_v37 = vld [vmem:[#allocation93_spill] sm:$0xff] }
 0x270   :  { %v2899_v50 = vmul.f32 %v2836_v1, %v2836_v1 }
 0x271   :  { %v1083_v56 = vadd.f32 %v1082_v48, %v6016_v42  ;;  %v3013_v35 = vadd.f32 %v3012_v12, %v3011_v8  ;;  %v3022_v4 = vsel %vm2900_vm0, %v2898_v13, 0.0  ;;  %v8314_v42 = vld [vmem:[#allocation82_spill] sm:$0xff] }
 0x272   :  { %v3024_v8 = vsel %vm2900_vm0, %v2899_v50, 0.0 }
 0x273   :  { %v1084_v9 = vadd.f32 %v1083_v56, %v6033_v21  ;;  %v3015_v43 = vadd.f32 %v3014_v3, %v3013_v35  ;;  %v8313_v21 = vld [vmem:[#allocation90_spill] sm:$0xff] }
 0x275   :  { %v1085_v17 = vadd.f32 %v1084_v9, %v6044_v33  ;;  %v3017_v28 = vadd.f32 %v3016_v24, %v3015_v43  ;;  %v8312_v33 = vld [vmem:[#allocation77_spill] sm:$0xff] }
 0x277   :  { %v1086_v12 = vadd.f32 %v1085_v17, %v6061_v57  ;;  %v3019_v48 = vadd.f32 %v3018_v2, %v3017_v28  ;;  %v3036_v2 = vstv %s3033_s1  ;;  %v8311_v57 = vld [vmem:[#allocation87_spill] sm:$0xff] }
 0x279   :  { %v1087_v23 = vadd.f32 %v1086_v12, %v6068_v44  ;;  %v3021_v31 = vadd.f32 %v3020_v25, %v3019_v48  ;;  %v3040_v25 = vstv %s3652_s27  ;;  %v8310_v44 = vld [vmem:[#allocation71_spill] sm:$0xff] }
 0x27b   :  { %v1088_v35 = vadd.f32 %v1087_v23, %v6085_v46  ;;  %v3023_v38 = vadd.f32 %v3022_v4, %v3021_v31  ;;  %v8292_v4 = vld [vmem:[#allocation35_spill] sm:$0xff]  ;;  %v8293_v31 = vld [vmem:[#allocation29_spill] sm:$0xff] }
 0x27d   :  { %v3025_v6 = vadd.f32 %v3024_v8, %v3023_v38  ;;  %v1089_v43 = vrot.slane %v1088_v35, 4 }
 0x27f   :  { %v3026_v54 = vrot.slane %v3025_v6, 4  ;;  %v1090_v13 = vadd.f32 %v1089_v43, %v1088_v35  ;;  %v8294_v35 = vld [vmem:[#allocation36_spill] sm:$0xff] }
 0x281   :  { %v3027_v3 = vadd.f32 %v3026_v54, %v3025_v6  ;;  %v1091_v17 = vrot.slane %v1090_v13, 2  ;;  %v8295_v6 = vld [vmem:[#allocation37_spill] sm:$0xff] }
 0x283   :  { %v3028_v56 = vrot.slane %v3027_v3, 2  ;;  %v6273_v12 = vadd.f32 %v1091_v17, %v1090_v13  ;;  %v8300_v13 = vld [vmem:[#allocation34_spill] sm:$0xff] }
 0x285   :  { %v3029_v7 = vadd.f32 %v3028_v56, %v3027_v3  ;;  %8291 = vst [vmem:[#allocation53_spill] sm:$0xff] %v6273_v12  ;;  %v8296_v3 = vld [vmem:[#allocation30_spill] sm:$0xff] }
 0x286   :  { %v8324_v12 = vld [vmem:[#allocation98_spill] sm:$0xff] }
 0x287   :  { %v3030_v1 = vrot.slane %v3029_v7, 1 }
 0x289   :  { %v3031_v41 = vadd.f32 %v3030_v1, %v3029_v7  ;;  %v8297_v7 = vld [vmem:[#allocation32_spill] sm:$0xff] }
 0x28b   :  { %v3032_v24 = vmul.f32 0.007936508, %v3031_v41  ;;  %v6305_v41 = vpop.permute.xlu1 %1171 }
 0x28c   :  { %8298 = vst [vmem:[#allocation44_spill] sm:$0xff] %v6305_v41  ;;  %v8322_v41 = vld [vmem:[#allocation92_spill] sm:$0xff] }
 0x28d   :  { %v3034_v9 = vadd.f32 1e-05, %v3032_v24 }
 0x28f   :  { %4078 = vrsqrt.f32 %v3034_v9  ;;  %v8299_v9 = vld [vmem:[#allocation39_spill] sm:$0xff] }
 0x299   :  { %v4079_v28 = vpop.eup %4078 }
 0x29a   :  { %v6271_v50 = vmul.f32 %v4079_v28, %v3036_v2 }
 0x29c   :  { %v3039_v48 = vmul.f32 %v6271_v50, %v5894_v11  ;;  %v6279_v23 = vmul.f32 %v6271_v50, %v8292_v4  ;;  %v6283_v8 = vmul.f32 %v6271_v50, %v8293_v31  ;;  %v6287_v38 = vmul.f32 %v6271_v50, %v8294_v35  ;;  %v8301_v4 = vld [vmem:[#allocation41_spill] sm:$0xff]  ;;  %v8302_v31 = vld [vmem:[#allocation58_spill] sm:$0xff]  ;;  %v8303_v35 = vld [vmem:[#allocation43_spill] sm:$0xff] }
 0x29d   :  { %v6291_v54 = vmul.f32 %v6271_v50, %v8295_v6  ;;  %v6295_v56 = vmul.f32 %v6271_v50, %v8296_v3  ;;  %v6299_v11 = vmul.f32 %v6271_v50, %v5374_v22  ;;  %v6303_v1 = vmul.f32 %v6271_v50, %v8297_v7  ;;  %v8304_v6 = vld [vmem:[#allocation62_spill] sm:$0xff]  ;;  %v8305_v3 = vld [vmem:[#allocation45_spill] sm:$0xff] }
 0x29e   :  { %v6307_v24 = vsub.f32 %v3040_v25, %v3039_v48  ;;  %v6311_v43 = vmul.f32 %v6271_v50, %v8299_v9  ;;  %v6315_v2 = vmul.f32 %v6271_v50, %v8300_v13  ;;  %v6319_v22 = vmul.f32 %v6271_v50, %v5410_v29  ;;  %v8306_v9 = vld [vmem:[#allocation48_spill] sm:$0xff] }
 0x29f   :  { %v6323_v17 = vmul.f32 %v6271_v50, %v5299_v63  ;;  %v6327_v28 = vmul.f32 %v6271_v50, %v5428_v14  ;;  %v6331_v25 = vmul.f32 %v6271_v50, %v5322_v34  ;;  %v6335_v48 = vmul.f32 %v6271_v50, %v5446_v5 }
 0x2a0   :  { %v6339_v29 = vmul.f32 %v6271_v50, %v5343_v39  ;;  %v6343_v63 = vmul.f32 %v6271_v50, %v5464_v53  ;;  %v6347_v14 = vmul.f32 %v6271_v50, %v5363_v47  ;;  %v6351_v34 = vmul.f32 %v6271_v50, %v5482_v62 }
 0x2a1   :  { %v6355_v5 = vmul.f32 %v6271_v50, %v5383_v10  ;;  %v6359_v39 = vmul.f32 %v6271_v50, %v5500_v15  ;;  %v6363_v53 = vmul.f32 %v6271_v50, %v5401_v51  ;;  %v6367_v47 = vmul.f32 %v6271_v50, %v5516_v26 }
 0x2a2   :  { %v6371_v62 = vmul.f32 %v6271_v50, %v8301_v4  ;;  %v6375_v10 = vmul.f32 %v6271_v50, %v8302_v31  ;;  %v6379_v15 = vmul.f32 %v6271_v50, %v8303_v35  ;;  %v6383_v51 = vmul.f32 %v6271_v50, %v8304_v6  ;;  %v6401_v31 = vpop.permute.xlu1 %1176  ;;  %v8308_v35 = vld [vmem:[#allocation51_spill] sm:$0xff] }
 0x2a3   :  { %v6387_v26 = vmul.f32 %v6271_v50, %v8305_v3  ;;  %v6391_v7 = vmul.f32 %v6271_v50, %v8202_v19  ;;  %v6395_v13 = vmul.f32 %v6271_v50, %v8306_v9  ;;  %v6399_v4 = vmul.f32 %v6271_v50, %v8207_v52  ;;  %8307 = vst [vmem:[#allocation69_spill] sm:$0xff] %v6401_v31  ;;  %v8309_v3 = vld [vmem:[#allocation73_spill] sm:$0xff]  ;;  %v8320_v31 = vld [vmem:[#allocation95_spill] sm:$0xff] }
 0x2a4   :  { %v6405_v6 = vmul.f32 %v6271_v50, %v8308_v35  ;;  %v6409_v46 = vmul.f32 %v6271_v50, %v8309_v3  ;;  %v6413_v19 = vmul.f32 %v6271_v50, %v8214_v0  ;;  %v6417_v9 = vmul.f32 %v6271_v50, %v8216_v40 }
 0x2a5   :  { %v6421_v52 = vmul.f32 %v6271_v50, %v8218_v27  ;;  %v6425_v35 = vmul.f32 %v6271_v50, %v8220_v49  ;;  %v6429_v3 = vmul.f32 %v6271_v50, %v8222_v58  ;;  %v6433_v0 = vmul.f32 %v6271_v50, %v8224_v59 }
 0x2a6   :  { %v6437_v40 = vmul.f32 %v6271_v50, %v8310_v44  ;;  %v6441_v27 = vmul.f32 %v6271_v50, %v8311_v57  ;;  %v6445_v49 = vmul.f32 %v6271_v50, %v8312_v33  ;;  %v6449_v58 = vmul.f32 %v6271_v50, %v8313_v21 }
 0x2a7   :  { %v6453_v59 = vmul.f32 %v6271_v50, %v8314_v42  ;;  %v6457_v44 = vmul.f32 %v6271_v50, %v8316_v37  ;;  %v6461_v57 = vmul.f32 %v6271_v50, %v8318_v55  ;;  %v6465_v33 = vmul.f32 %v6271_v50, %v8320_v31 }
 0x2a8   :  { %v6469_v21 = vmul.f32 %v6271_v50, %v8322_v41  ;;  %v6473_v42 = vmul.f32 %v6271_v50, %v8324_v12 }
 0x2a9   :  { %8315 = vst [vmem:[#allocation56_spill] sm:$0xff] %v6453_v59  ;;  %8317 = vst [vmem:[#allocation46_spill] sm:$0xff] %v6457_v44  ;;  %v8326_v59 = vld [vmem:[#allocation96_spill] sm:$0xff]  ;;  %v8328_v44 = vld [vmem:[#allocation101_spill] sm:$0xff] }
 0x2aa   :  { %8319 = vst [vmem:[#allocation59_spill] sm:$0xff] %v6461_v57  ;;  %8321 = vst [vmem:[#allocation55_spill] sm:$0xff] %v6465_v33  ;;  %v6477_v37 = vmul.f32 %v6271_v50, %v8326_v59  ;;  %v6481_v55 = vmul.f32 %v6271_v50, %v8328_v44  ;;  %v8329_v57 = vld [vmem:[#allocation100_spill] sm:$0xff]  ;;  %v8330_v33 = vld [vmem:[#allocation105_spill] sm:$0xff]  ;;  %v6503_v44 = vmul.f32 %v6271_v50, %v8274_v18 }
 0x2ab   :  { %8323 = vst [vmem:[#allocation49_spill] sm:$0xff] %v6469_v21  ;;  %8325 = vst [vmem:[#allocation76_spill] sm:$0xff] %v6473_v42  ;;  %v6485_v31 = vmul.f32 %v6271_v50, %v8329_v57  ;;  %v6489_v41 = vmul.f32 %v6271_v50, %v8330_v33  ;;  %v8331_v21 = vld [vmem:[#allocation106_spill] sm:$0xff]  ;;  %v8332_v42 = vld [vmem:[#allocation108_spill] sm:$0xff]  ;;  %v6507_v57 = vmul.f32 %v6271_v50, %v8277_v16 }
 0x2ac   :  { %8327 = vst [vmem:[#allocation63_spill] sm:$0xff] %v6477_v37  ;;  %v6493_v12 = vmul.f32 %v6271_v50, %v8331_v21  ;;  %v6497_v59 = vmul.f32 %v6271_v50, %v8332_v42  ;;  %v6499_v37 = vpop.permute.xlu1 %1186  ;;  %v6511_v33 = vmul.f32 %v6271_v50, %v8280_v32  ;;  %v6515_v21 = vmul.f32 %v6271_v50, %v8281_v36 }
 0x2ad   :  { %8333 = vst [vmem:[#allocation60_spill] sm:$0xff] %v6499_v37  ;;  %v6519_v42 = vmul.f32 %v6271_v50, %v8283_v45  ;;  %v6523_v18 = vmul.f32 %v6271_v50, %v8284_v60  ;;  %v6527_v16 = vmul.f32 %v6271_v50, %v8286_v30  ;;  %v6531_v32 = vmul.f32 %v6271_v50, %v8287_v20 }
 0x2ae   :  { %v6535_v36 = vmul.f32 %v6271_v50, %v8289_v61  ;;  %v6539_v45 = vadd.f32 %v6279_v23, %v6307_v24  ;;  %v6543_v60 = vadd.f32 %v6283_v8, %v6307_v24  ;;  %v6547_v30 = vadd.f32 %v6287_v38, %v6307_v24  ;;  %v6565_v8 = vpop.permute.xlu0 %1181 }
 0x2af   :  { %v6551_v20 = vadd.f32 %v6291_v54, %v6307_v24  ;;  %v6555_v61 = vadd.f32 %v6295_v56, %v6307_v24  ;;  %v6559_v50 = vadd.f32 %v6299_v11, %v6307_v24  ;;  %v6563_v23 = vadd.f32 %v6303_v1, %v6307_v24  ;;  %8334 = vst [vmem:[#allocation52_spill] sm:$0xff] %v6565_v8 }
 0x2b0   :  { %v6569_v38 = vadd.f32 %v6311_v43, %v6307_v24  ;;  %v6573_v54 = vadd.f32 %v6315_v2, %v6307_v24  ;;  %v6577_v56 = vadd.f32 %v6319_v22, %v6307_v24  ;;  %v6581_v11 = vadd.f32 %v6323_v17, %v6307_v24  ;;  %v6599_v37 = vpop.permute.xlu1 %1191 }
 0x2b1   :  { %v6585_v1 = vadd.f32 %v6327_v28, %v6307_v24  ;;  %v6589_v43 = vadd.f32 %v6331_v25, %v6307_v24  ;;  %v6593_v2 = vadd.f32 %v6335_v48, %v6307_v24  ;;  %v6597_v22 = vadd.f32 %v6339_v29, %v6307_v24  ;;  %8335 = vst [vmem:[#allocation80_spill] sm:$0xff] %v6599_v37 }
 0x2b2   :  { %v6603_v17 = vadd.f32 %v6343_v63, %v6307_v24  ;;  %v6607_v28 = vadd.f32 %v6347_v14, %v6307_v24  ;;  %v6611_v25 = vadd.f32 %v6351_v34, %v6307_v24  ;;  %v6615_v48 = vadd.f32 %v6355_v5, %v6307_v24  ;;  %v6665_v37 = vpop.permute.xlu0 %1196 }
 0x2b3   :  { %v6619_v29 = vadd.f32 %v6359_v39, %v6307_v24  ;;  %v6623_v63 = vadd.f32 %v6363_v53, %v6307_v24  ;;  %v6627_v14 = vadd.f32 %v6367_v47, %v6307_v24  ;;  %v6631_v34 = vadd.f32 %v6371_v62, %v6307_v24  ;;  %8336 = vst [vmem:[#allocation67_spill] sm:$0xff] %v6665_v37 }
 0x2b4   :  { %v6635_v5 = vadd.f32 %v6375_v10, %v6307_v24  ;;  %v6639_v39 = vadd.f32 %v6379_v15, %v6307_v24  ;;  %v6643_v53 = vadd.f32 %v6383_v51, %v6307_v24  ;;  %v6647_v47 = vadd.f32 %v6387_v26, %v6307_v24  ;;  %v6699_v37 = vpop.permute.xlu1 %1201 }
 0x2b5   :  { %v6651_v62 = vadd.f32 %v6391_v7, %v6307_v24  ;;  %v6655_v10 = vadd.f32 %v6395_v13, %v6307_v24  ;;  %v6659_v15 = vadd.f32 %v6399_v4, %v6307_v24  ;;  %v6663_v51 = vadd.f32 %v6405_v6, %v6307_v24  ;;  %8338 = vst [vmem:[#allocation54_spill] sm:$0xff] %v6699_v37  ;;  %v8345_v37 = vld [vmem:[#allocation59_spill] sm:$0xff] }
 0x2b6   :  { %v6669_v26 = vadd.f32 %v6409_v46, %v6307_v24  ;;  %v6673_v7 = vadd.f32 %v6413_v19, %v6307_v24  ;;  %v6677_v13 = vadd.f32 %v6417_v9, %v6307_v24  ;;  %v6681_v4 = vadd.f32 %v6421_v52, %v6307_v24 }
 0x2b7   :  { %v6685_v6 = vadd.f32 %v6425_v35, %v6307_v24  ;;  %v6689_v46 = vadd.f32 %v6429_v3, %v6307_v24  ;;  %v6693_v19 = vadd.f32 %v6433_v0, %v6307_v24  ;;  %v6697_v9 = vadd.f32 %v6437_v40, %v6307_v24  ;;  %v8342_v0 = vld [vmem:[#allocation56_spill] sm:$0xff]  ;;  %v8344_v40 = vld [vmem:[#allocation46_spill] sm:$0xff] }
 0x2b8   :  { %v6703_v52 = vadd.f32 %v6441_v27, %v6307_v24  ;;  %v6707_v35 = vadd.f32 %v6445_v49, %v6307_v24  ;;  %v6711_v3 = vadd.f32 %v6449_v58, %v6307_v24  ;;  %v6715_v8 = vadd.f32 %v8342_v0, %v6307_v24 }
 0x2b9   :  { %8337 = vst [vmem:[#allocation66_spill] sm:$0xff] %v6697_v9  ;;  %v6719_v9 = vadd.f32 %v8344_v40, %v6307_v24  ;;  %v6723_v27 = vadd.f32 %v8345_v37, %v6307_v24  ;;  %v6743_v37 = vadd.f32 %v6481_v55, %v6307_v24  ;;  %v6763_v55 = vadd.f32 %v6503_v44, %v6307_v24 }
 0x2ba   :  { %8339 = vst [vmem:[#allocation84_spill] sm:$0xff] %v6703_v52  ;;  %8340 = vst [vmem:[#allocation70_spill] sm:$0xff] %v6707_v35  ;;  %v8346_v52 = vld [vmem:[#allocation55_spill] sm:$0xff]  ;;  %v8347_v35 = vld [vmem:[#allocation49_spill] sm:$0xff]  ;;  %v6785_v44 = vadd.f32 %v6523_v18, %v6307_v24  ;;  %v3170_v18 = vmax.f32 %v6547_v30, 0.0  ;;  %v3180_v30 = vmax.f32 %v6589_v43, 0.0 }
 0x2bb   :  { %8341 = vst [vmem:[#allocation57_spill] sm:$0xff] %v6711_v3  ;;  %8343 = vst [vmem:[#allocation74_spill] sm:$0xff] %v6715_v8  ;;  %v6727_v49 = vadd.f32 %v8346_v52, %v6307_v24  ;;  %v6731_v58 = vadd.f32 %v8347_v35, %v6307_v24  ;;  %v8348_v3 = vld [vmem:[#allocation76_spill] sm:$0xff]  ;;  %v8349_v8 = vld [vmem:[#allocation63_spill] sm:$0xff]  ;;  %v6747_v52 = vadd.f32 %v6485_v31, %v6307_v24  ;;  %v3189_v43 = vmax.f32 %v6627_v14, 0.0 }
 0x2bc   :  { %v6735_v0 = vadd.f32 %v8348_v3, %v6307_v24  ;;  %v6739_v40 = vadd.f32 %v8349_v8, %v6307_v24  ;;  %8350 = vst [vmem:[#allocation61_spill] sm:$0xff] %v6743_v37  ;;  %v6751_v35 = vadd.f32 %v6489_v41, %v6307_v24  ;;  %v6755_v3 = vadd.f32 %v6493_v12, %v6307_v24  ;;  %v6765_v37 = vpop.permute.xlu0 %1206 }
 0x2bd   :  { %v6759_v8 = vadd.f32 %v6497_v59, %v6307_v24  ;;  %8351 = vst [vmem:[#allocation78_spill] sm:$0xff] %v6765_v37  ;;  %v6769_v31 = vadd.f32 %v6507_v57, %v6307_v24  ;;  %v6773_v41 = vadd.f32 %v6511_v33, %v6307_v24  ;;  %v6777_v12 = vadd.f32 %v6515_v21, %v6307_v24  ;;  %v6799_v37 = vpop.permute.xlu1 %1211 }
 0x2be   :  { %v6781_v59 = vadd.f32 %v6519_v42, %v6307_v24  ;;  %8353 = vst [vmem:[#allocation81_spill] sm:$0xff] %v6785_v44  ;;  %v6789_v57 = vadd.f32 %v6527_v16, %v6307_v24  ;;  %v6793_v33 = vadd.f32 %v6531_v32, %v6307_v24  ;;  %v6797_v21 = vadd.f32 %v6535_v36, %v6307_v24 }
 0x2bf   :  { %v3168_v42 = vmax.f32 %v6539_v45, 0.0  ;;  %v3171_v44 = vmax.f32 %v6551_v20, 0.0  ;;  %v3172_v16 = vmax.f32 %v6555_v61, 0.0  ;;  %v3174_v32 = vmax.f32 %v6563_v23, 0.0  ;;  %3233 = vst.msk [vmem:[#allocation5 + $0x10] sm:$0xff] %vm2900_vm0, %v3170_v18  ;;  %3243 = vst.msk [vmem:[#allocation5 + $0x60] sm:$0xff] %vm2900_vm0, %v3180_v30 }
 0x2c0   :  { %8352 = vst [vmem:[#allocation64_spill] sm:$0xff] %v6781_v59  ;;  %8354 = vst [vmem:[#allocation68_spill] sm:$0xff] %v6789_v57  ;;  %v3169_v59 = vmax.f32 %v6543_v60, 0.0  ;;  %v3173_v57 = vmax.f32 %v6559_v50, 0.0  ;;  %v3176_v24 = vmax.f32 %v6573_v54, 0.0  ;;  %v3177_v36 = vmax.f32 %v6577_v56, 0.0  ;;  %v6825_v23 = vpop.permute.xlu0 %1216 }
 0x2c1   :  { %8355 = vst [vmem:[#allocation85_spill] sm:$0xff] %v6793_v33  ;;  %v3175_v33 = vmax.f32 %v6569_v38, 0.0  ;;  %v3178_v45 = vmax.f32 %v6581_v11, 0.0  ;;  %v3179_v60 = vmax.f32 %v6585_v1, 0.0  ;;  %3231 = vst.msk [vmem:[#allocation5] sm:$0xff] %vm2900_vm0, %v3168_v42  ;;  %v3181_v20 = vmax.f32 %v6593_v2, 0.0 }
 0x2c2   :  { %3232 = vst.msk [vmem:[#allocation5 + $0x8] sm:$0xff] %vm2900_vm0, %v3169_v59  ;;  %3234 = vst.msk [vmem:[#allocation5 + $0x18] sm:$0xff] %vm2900_vm0, %v3171_v44  ;;  %v3182_v61 = vmax.f32 %v6597_v22, 0.0  ;;  %v3183_v50 = vmax.f32 %v6603_v17, 0.0  ;;  %v3184_v38 = vmax.f32 %v6607_v28, 0.0  ;;  %v3185_v54 = vmax.f32 %v6611_v25, 0.0  ;;  %v6843_v17 = vpop.permute.xlu1 %1221 }
 0x2c3   :  { %3235 = vst.msk [vmem:[#allocation5 + $0x20] sm:$0xff] %vm2900_vm0, %v3172_v16  ;;  %3236 = vst.msk [vmem:[#allocation5 + $0x28] sm:$0xff] %vm2900_vm0, %v3173_v57  ;;  %v3186_v56 = vmax.f32 %v6615_v48, 0.0  ;;  %v3187_v11 = vmax.f32 %v6619_v29, 0.0  ;;  %v3188_v1 = vmax.f32 %v6623_v63, 0.0  ;;  %v3190_v2 = vmax.f32 %v6631_v34, 0.0 }
 0x2c4   :  { %3237 = vst.msk [vmem:[#allocation5 + $0x30] sm:$0xff] %vm2900_vm0, %v3174_v32  ;;  %3238 = vst.msk [vmem:[#allocation5 + $0x38] sm:$0xff] %vm2900_vm0, %v3175_v33  ;;  %v3191_v22 = vmax.f32 %v6635_v5, 0.0  ;;  %v3192_v28 = vmax.f32 %v6639_v39, 0.0  ;;  %v3193_v25 = vmax.f32 %v6643_v53, 0.0  ;;  %v3194_v48 = vmax.f32 %v6647_v47, 0.0 }
 0x2c5   :  { %3239 = vst.msk [vmem:[#allocation5 + $0x40] sm:$0xff] %vm2900_vm0, %v3176_v24  ;;  %3240 = vst.msk [vmem:[#allocation5 + $0x48] sm:$0xff] %vm2900_vm0, %v3177_v36  ;;  %v3195_v29 = vmax.f32 %v6651_v62, 0.0  ;;  %v3196_v63 = vmax.f32 %v6655_v10, 0.0  ;;  %v3197_v14 = vmax.f32 %v6659_v15, 0.0  ;;  %v3198_v34 = vmax.f32 %v6663_v51, 0.0 }
 0x2c6   :  { %3241 = vst.msk [vmem:[#allocation5 + $0x50] sm:$0xff] %vm2900_vm0, %v3178_v45  ;;  %3242 = vst.msk [vmem:[#allocation5 + $0x58] sm:$0xff] %vm2900_vm0, %v3179_v60  ;;  %v3199_v5 = vmax.f32 %v6669_v26, 0.0  ;;  %v3200_v39 = vmax.f32 %v6673_v7, 0.0  ;;  %v3201_v53 = vmax.f32 %v6677_v13, 0.0  ;;  %v3202_v47 = vmax.f32 %v6681_v4, 0.0  ;;  %v6877_v4 = vpop.permute.xlu0 %1226 }
 0x2c7   :  { %3244 = vst.msk [vmem:[#allocation5 + $0x68] sm:$0xff] %vm2900_vm0, %v3181_v20  ;;  %3245 = vst.msk [vmem:[#allocation5 + $0x70] sm:$0xff] %vm2900_vm0, %v3182_v61  ;;  %v3203_v62 = vmax.f32 %v6685_v6, 0.0  ;;  %v3204_v10 = vmax.f32 %v6689_v46, 0.0  ;;  %v3205_v15 = vmax.f32 %v6693_v19, 0.0  ;;  %v8356_v51 = vld [vmem:[#allocation66_spill] sm:$0xff] }
 0x2c8   :  { %3246 = vst.msk [vmem:[#allocation5 + $0x78] sm:$0xff] %vm2900_vm0, %v3183_v50  ;;  %3247 = vst.msk [vmem:[#allocation5 + $0x80] sm:$0xff] %vm2900_vm0, %v3184_v38  ;;  %v3206_v26 = vmax.f32 %v8356_v51, 0.0  ;;  %v8357_v7 = vld [vmem:[#allocation84_spill] sm:$0xff]  ;;  %v8358_v6 = vld [vmem:[#allocation70_spill] sm:$0xff]  ;;  %v3211_v33 = vmax.f32 %v6719_v9, 0.0  ;;  %v6895_v9 = vpop.permute.xlu1 %1231 }
 0x2c9   :  { %3248 = vst.msk [vmem:[#allocation5 + $0x88] sm:$0xff] %vm2900_vm0, %v3185_v54  ;;  %3249 = vst.msk [vmem:[#allocation5 + $0x90] sm:$0xff] %vm2900_vm0, %v3186_v56  ;;  %v3207_v13 = vmax.f32 %v8357_v7, 0.0  ;;  %v3208_v59 = vmax.f32 %v8358_v6, 0.0  ;;  %v8359_v44 = vld [vmem:[#allocation57_spill] sm:$0xff]  ;;  %v8360_v57 = vld [vmem:[#allocation74_spill] sm:$0xff] }
 0x2ca   :  { %3250 = vst.msk [vmem:[#allocation5 + $0x98] sm:$0xff] %vm2900_vm0, %v3187_v11  ;;  %3251 = vst.msk [vmem:[#allocation5 + $0xa0] sm:$0xff] %vm2900_vm0, %v3188_v1  ;;  %v3209_v46 = vmax.f32 %v8359_v44, 0.0  ;;  %v3210_v19 = vmax.f32 %v8360_v57, 0.0  ;;  %v3212_v42 = vmax.f32 %v6723_v27, 0.0  ;;  %v3213_v18 = vmax.f32 %v6727_v49, 0.0 }
 0x2cb   :  { %3252 = vst.msk [vmem:[#allocation5 + $0xa8] sm:$0xff] %vm2900_vm0, %v3189_v43  ;;  %3253 = vst.msk [vmem:[#allocation5 + $0xb0] sm:$0xff] %vm2900_vm0, %v3190_v2  ;;  %v3214_v16 = vmax.f32 %v6731_v58, 0.0  ;;  %v3215_v32 = vmax.f32 %v6735_v0, 0.0  ;;  %v3216_v24 = vmax.f32 %v6739_v40, 0.0  ;;  %v8361_v36 = vld [vmem:[#allocation61_spill] sm:$0xff] }
 0x2cc   :  { %3254 = vst.msk [vmem:[#allocation5 + $0xb8] sm:$0xff] %vm2900_vm0, %v3191_v22  ;;  %3255 = vst.msk [vmem:[#allocation5 + $0xc0] sm:$0xff] %vm2900_vm0, %v3192_v28  ;;  %v3217_v27 = vmax.f32 %v8361_v36, 0.0  ;;  %v3218_v49 = vmax.f32 %v6747_v52, 0.0  ;;  %v3219_v58 = vmax.f32 %v6751_v35, 0.0  ;;  %v3220_v0 = vmax.f32 %v6755_v3, 0.0  ;;  %v6938_v54 = vpop.permute.xlu1 %1241 }
 0x2cd   :  { %3256 = vst.msk [vmem:[#allocation5 + $0xc8] sm:$0xff] %vm2900_vm0, %v3193_v25  ;;  %3257 = vst.msk [vmem:[#allocation5 + $0xd0] sm:$0xff] %vm2900_vm0, %v3194_v48  ;;  %v3221_v45 = vmax.f32 %v6759_v8, 0.0  ;;  %v3222_v40 = vmax.f32 %v6763_v55, 0.0  ;;  %v3223_v60 = vmax.f32 %v6769_v31, 0.0  ;;  %v3224_v52 = vmax.f32 %v6773_v41, 0.0 }
 0x2ce   :  { %3258 = vst.msk [vmem:[#allocation5 + $0xd8] sm:$0xff] %vm2900_vm0, %v3195_v29  ;;  %3259 = vst.msk [vmem:[#allocation5 + $0xe0] sm:$0xff] %vm2900_vm0, %v3196_v63  ;;  %v3225_v35 = vmax.f32 %v6777_v12, 0.0  ;;  %v8362_v30 = vld [vmem:[#allocation64_spill] sm:$0xff]  ;;  %v8363_v20 = vld [vmem:[#allocation81_spill] sm:$0xff]  ;;  %v3230_v41 = vmax.f32 %v6797_v21, 0.0  ;;  %v6928_v12 = vpop.permute.xlu0 %1236 }
 0x2cf   :  { %3260 = vst.msk [vmem:[#allocation5 + $0xe8] sm:$0xff] %vm2900_vm0, %v3197_v14  ;;  %3261 = vst.msk [vmem:[#allocation5 + $0xf0] sm:$0xff] %vm2900_vm0, %v3198_v34  ;;  %v3226_v3 = vmax.f32 %v8362_v30, 0.0  ;;  %v3227_v8 = vmax.f32 %v8363_v20, 0.0  ;;  %v8364_v55 = vld [vmem:[#allocation68_spill] sm:$0xff]  ;;  %v8365_v61 = vld [vmem:[#allocation85_spill] sm:$0xff] }
 0x2d0   :  { %3262 = vst.msk [vmem:[#allocation5 + $0xf8] sm:$0xff] %vm2900_vm0, %v3199_v5  ;;  %3263 = vst.msk [vmem:[#allocation5 + $0x100] sm:$0xff] %vm2900_vm0, %v3200_v39  ;;  %v3228_v31 = vmax.f32 %v8364_v55, 0.0  ;;  %v3229_v50 = vmax.f32 %v8365_v61, 0.0  ;;  %v8366_v38 = vld [vmem:[#allocation53_spill] sm:$0xff]  ;;  %v6943_v1 = vpop.permute.xlu1 %1251  ;;  %v8367_v22 = vld [vmem:[#allocation102_spill] sm:$0xff] }
 0x2d1   :  { %3264 = vst.msk [vmem:[#allocation5 + $0x108] sm:$0xff] %vm2900_vm0, %v3201_v53  ;;  %3265 = vst.msk [vmem:[#allocation5 + $0x110] sm:$0xff] %vm2900_vm0, %v3202_v47  ;;  %v1093_v21 = vrot.slane %v8366_v38, 1  ;;  %v8368_v25 = vld [vmem:[#allocation103_spill] sm:$0xff]  ;;  %v8369_v63 = vld [vmem:[#allocation109_spill] sm:$0xff] }
 0x2d2   :  { %3266 = vst.msk [vmem:[#allocation5 + $0x118] sm:$0xff] %vm2900_vm0, %v3203_v62  ;;  %3267 = vst.msk [vmem:[#allocation5 + $0x120] sm:$0xff] %vm2900_vm0, %v3204_v10  ;;  %v6941_v11 = vpop.permute.xlu0 %1246  ;;  %v8370_v34 = vld [vmem:[#allocation31_spill] sm:$0xff]  ;;  %v8371_v39 = vld [vmem:[#allocation33_spill] sm:$0xff] }
 0x2d3   :  { %3268 = vst.msk [vmem:[#allocation5 + $0x128] sm:$0xff] %vm2900_vm0, %v3205_v15  ;;  %3269 = vst.msk [vmem:[#allocation5 + $0x130] sm:$0xff] %vm2900_vm0, %v3206_v26  ;;  %v1094_v56 = vadd.f32 %v1093_v21, %v8366_v38  ;;  %v8372_v62 = vld [vmem:[#allocation110_spill] sm:$0xff]  ;;  %v8373_v51 = vld [vmem:[#allocation116_spill] sm:$0xff] }
 0x2d4   :  { %3270 = vst.msk [vmem:[#allocation5 + $0x138] sm:$0xff] %vm2900_vm0, %v3207_v13  ;;  %3271 = vst.msk [vmem:[#allocation5 + $0x140] sm:$0xff] %vm2900_vm0, %v3208_v59  ;;  %v6953_v29 = vpop.permute.xlu1 %1261  ;;  %v8374_v7 = vld [vmem:[#allocation44_spill] sm:$0xff]  ;;  %v8375_v44 = vld [vmem:[#allocation118_spill] sm:$0xff] }
 0x2d5   :  { %3272 = vst.msk [vmem:[#allocation5 + $0x148] sm:$0xff] %vm2900_vm0, %v3209_v46  ;;  %3273 = vst.msk [vmem:[#allocation5 + $0x150] sm:$0xff] %vm2900_vm0, %v3210_v19  ;;  %v6945_v43 = vmul.f32 0.007936508, %v1094_v56  ;;  %v8376_v57 = vld [vmem:[#allocation69_spill] sm:$0xff]  ;;  %v8382_v30 = vld [vmem:[#allocation80_spill] sm:$0xff] }
 0x2d6   :  { %3274 = vst.msk [vmem:[#allocation5 + $0x158] sm:$0xff] %vm2900_vm0, %v3211_v33  ;;  %3275 = vst.msk [vmem:[#allocation5 + $0x160] sm:$0xff] %vm2900_vm0, %v3212_v42  ;;  %v6947_v2 = vpop.permute.xlu0 %1256  ;;  %v8377_v42 = vld [vmem:[#allocation122_spill] sm:$0xff] }
 0x2d7   :  { %3276 = vst.msk [vmem:[#allocation5 + $0x168] sm:$0xff] %vm2900_vm0, %v3213_v18  ;;  %3277 = vst.msk [vmem:[#allocation5 + $0x170] sm:$0xff] %vm2900_vm0, %v3214_v16  ;;  %v1096_v28 = vsub.f32 %v8367_v22, %v6945_v43  ;;  %v1097_v48 = vsub.f32 %v8368_v25, %v6945_v43  ;;  %v1098_v14 = vsub.f32 %v8369_v63, %v6945_v43  ;;  %v8378_v16 = vld [vmem:[#allocation52_spill] sm:$0xff] }
 0x2d8   :  { %3278 = vst.msk [vmem:[#allocation5 + $0x178] sm:$0xff] %vm2900_vm0, %v3215_v32  ;;  %3279 = vst.msk [vmem:[#allocation5 + $0x180] sm:$0xff] %vm2900_vm0, %v3216_v24  ;;  %v1099_v10 = vsub.f32 %v8372_v62, %v6945_v43  ;;  %v6963_v15 = vpop.permute.xlu1 %1271  ;;  %v1100_v26 = vsub.f32 %v8373_v51, %v6945_v43  ;;  %v1101_v46 = vsub.f32 %v8375_v44, %v6945_v43 }
 0x2d9   :  { %3280 = vst.msk [vmem:[#allocation5 + $0x188] sm:$0xff] %vm2900_vm0, %v3217_v27  ;;  %3281 = vst.msk [vmem:[#allocation5 + $0x190] sm:$0xff] %vm2900_vm0, %v3218_v49  ;;  %v1474_v5 = vmul.f32 %v8370_v34, %v1096_v28  ;;  %v1475_v53 = vmul.f32 %v8371_v39, %v1097_v48  ;;  %v1476_v13 = vmul.f32 %v8374_v7, %v1098_v14  ;;  %v8379_v49 = vld [vmem:[#allocation124_spill] sm:$0xff]  ;;  %v8385_v28 = vld [vmem:[#allocation134_spill] sm:$0xff] }
 0x2da   :  { %3282 = vst.msk [vmem:[#allocation5 + $0x198] sm:$0xff] %vm2900_vm0, %v3219_v58  ;;  %3283 = vst.msk [vmem:[#allocation5 + $0x1a0] sm:$0xff] %vm2900_vm0, %v3220_v0  ;;  %v6959_v47 = vpop.permute.xlu0 %1266  ;;  %v1477_v19 = vmul.f32 %v8376_v57, %v1099_v10  ;;  %v1102_v18 = vsub.f32 %v8377_v42, %v6945_v43  ;;  %v1478_v32 = vmul.f32 %v8378_v16, %v1100_v26  ;;  %v8380_v0 = vld [vmem:[#allocation60_spill] sm:$0xff]  ;;  %v8386_v14 = vld [vmem:[#allocation54_spill] sm:$0xff] }
 0x2db   :  { %3284 = vst.msk [vmem:[#allocation5 + $0x1a8] sm:$0xff] %vm2900_vm0, %v3221_v45  ;;  %3285 = vst.msk [vmem:[#allocation5 + $0x1b0] sm:$0xff] %vm2900_vm0, %v3222_v40  ;;  %v1537_v6 = vmul.f32 %v1474_v5, %v1474_v5  ;;  %v1538_v59 = vmul.f32 %v1475_v53, %v1475_v53  ;;  %v1539_v24 = vmul.f32 %v1476_v13, %v1476_v13  ;;  %v8387_v53 = vld [vmem:[#allocation136_spill] sm:$0xff]  ;;  %v8388_v26 = vld [vmem:[#allocation78_spill] sm:$0xff] }
 0x2dc   :  { %3286 = vst.msk [vmem:[#allocation5 + $0x1b8] sm:$0xff] %vm2900_vm0, %v3223_v60  ;;  %3287 = vst.msk [vmem:[#allocation5 + $0x1c0] sm:$0xff] %vm2900_vm0, %v3224_v52  ;;  %v6976_v27 = vpop.permute.xlu1 %1281  ;;  %v1103_v58 = vsub.f32 %v8379_v49, %v6945_v43  ;;  %v1479_v45 = vmul.f32 %v8380_v0, %v1101_v46  ;;  %v1540_v40 = vmul.f32 %v1477_v19, %v1477_v19  ;;  %v8381_v52 = vld [vmem:[#allocation128_spill] sm:$0xff]  ;;  %v8389_v46 = vld [vmem:[#allocation139_spill] sm:$0xff] }
 0x2dd   :  { %3288 = vst.msk [vmem:[#allocation5 + $0x1c8] sm:$0xff] %vm2900_vm0, %v3225_v35  ;;  %3289 = vst.msk [vmem:[#allocation5 + $0x1d0] sm:$0xff] %vm2900_vm0, %v3226_v3  ;;  %v1600_v36 = vadd.f32 %v1538_v59, %v1537_v6  ;;  %v1104_v35 = vsub.f32 %v8381_v52, %v6945_v43  ;;  %v1480_v3 = vmul.f32 %v8382_v30, %v1102_v18 }
 0x2de   :  { %3290 = vst.msk [vmem:[#allocation5 + $0x1d8] sm:$0xff] %vm2900_vm0, %v3227_v8  ;;  %3291 = vst.msk [vmem:[#allocation5 + $0x1e0] sm:$0xff] %vm2900_vm0, %v3228_v31  ;;  %v6971_v33 = vpop.permute.xlu0 %1276  ;;  %v1541_v20 = vmul.f32 %v1478_v32, %v1478_v32  ;;  %v8383_v31 = vld [vmem:[#allocation130_spill] sm:$0xff]  ;;  %v1542_v38 = vmul.f32 %v1479_v45, %v1479_v45  ;;  %v1106_v48 = vsub.f32 %v8385_v28, %v6945_v43 }
 0x2df   :  { %3292 = vst.msk [vmem:[#allocation5 + $0x1e8] sm:$0xff] %vm2900_vm0, %v3229_v50  ;;  %3293 = vst.msk [vmem:[#allocation5 + $0x1f0] sm:$0xff] %vm2900_vm0, %v3230_v41  ;;  %v1601_v60 = vadd.f32 %v1600_v36, %v1539_v24  ;;  %v1105_v61 = vsub.f32 %v8383_v31, %v6945_v43  ;;  %v8384_v50 = vld [vmem:[#allocation67_spill] sm:$0xff]  ;;  %v1482_v34 = vmul.f32 %v8386_v14, %v1104_v35  ;;  %v8390_v24 = vld [vmem:[#allocation141_spill] sm:$0xff] }
 0x2e0   :  { %v1481_v41 = vmul.f32 %v8384_v50, %v1103_v58  ;;  %v6989_v56 = vpop.permute.xlu1 %1291  ;;  %v1543_v5 = vmul.f32 %v1480_v3, %v1480_v3  ;;  %v1107_v10 = vsub.f32 %v8387_v53, %v6945_v43  ;;  %v1108_v57 = vsub.f32 %v8389_v46, %v6945_v43 }
 0x2e1   :  { %v1602_v8 = vadd.f32 %v1601_v60, %v1540_v40  ;;  %v1483_v7 = vmul.f32 %v8388_v26, %v1105_v61  ;;  %v1484_v19 = vmul.f32 %v6799_v37, %v1106_v48  ;;  %v1545_v18 = vmul.f32 %v1482_v34, %v1482_v34  ;;  %v8391_v40 = vld [vmem:[#allocation143_spill] sm:$0xff]  ;;  %v8392_v37 = vld [vmem:[#allocation145_spill] sm:$0xff] }
 0x2e2   :  { %v6984_v55 = vpop.permute.xlu0 %1286  ;;  %v1544_v13 = vmul.f32 %v1481_v41, %v1481_v41  ;;  %v1109_v36 = vsub.f32 %v8390_v24, %v6945_v43  ;;  %v1485_v58 = vmul.f32 %v6825_v23, %v1107_v10  ;;  %v1110_v60 = vsub.f32 %v8391_v40, %v6945_v43  ;;  %v8393_v23 = vld [vmem:[#allocation147_spill] sm:$0xff]  ;;  %v8394_v34 = vld [vmem:[#allocation149_spill] sm:$0xff] }
 0x2e3   :  { %v1603_v21 = vadd.f32 %v1602_v8, %v1541_v20  ;;  %v1546_v0 = vmul.f32 %v1483_v7, %v1483_v7  ;;  %v1486_v35 = vmul.f32 %v6843_v17, %v1108_v57  ;;  %v1547_v30 = vmul.f32 %v1484_v19, %v1484_v19 }
 0x2e4   :  { %v7002_v32 = vpop.permute.xlu1 %1301  ;;  %v1111_v8 = vsub.f32 %v8392_v37, %v6945_v43  ;;  %v1487_v61 = vmul.f32 %v6877_v4, %v1109_v36  ;;  %v1548_v50 = vmul.f32 %v1485_v58, %v1485_v58  ;;  %v1488_v48 = vmul.f32 %v6895_v9, %v1110_v60  ;;  %v8395_v4 = vld [vmem:[#allocation151_spill] sm:$0xff]  ;;  %v8396_v9 = vld [vmem:[#allocation153_spill] sm:$0xff] }
 0x2e5   :  { %v1604_v39 = vadd.f32 %v1603_v21, %v1542_v38  ;;  %v1112_v21 = vsub.f32 %v8393_v23, %v6945_v43  ;;  %v1549_v14 = vmul.f32 %v1486_v35, %v1486_v35 }
 0x2e6   :  { %v6997_v59 = vpop.permute.xlu0 %1296  ;;  %v1550_v10 = vmul.f32 %v1487_v61, %v1487_v61  ;;  %v1551_v57 = vmul.f32 %v1488_v48, %v1488_v48 }
 0x2e7   :  { %v1605_v6 = vadd.f32 %v1604_v39, %v1543_v5  ;;  %v1113_v5 = vsub.f32 %v8394_v34, %v6945_v43  ;;  %v1489_v39 = vmul.f32 %v6928_v12, %v1111_v8 }
 0x2e8   :  { %v7015_v38 = vpop.permute.xlu1 %1311 }
 0x2e9   :  { %v1606_v16 = vadd.f32 %v1605_v6, %v1544_v13  ;;  %v1114_v13 = vsub.f32 %v8395_v4, %v6945_v43  ;;  %v1490_v6 = vmul.f32 %v6938_v54, %v1112_v21  ;;  %v1491_v36 = vmul.f32 %v6941_v11, %v1113_v5  ;;  %v8398_v54 = vld [vmem:[#allocation157_spill] sm:$0xff]  ;;  %v8399_v11 = vld [vmem:[#allocation159_spill] sm:$0xff] }
 0x2ea   :  { %v7010_v20 = vpop.permute.xlu0 %1306  ;;  %v1552_v58 = vmul.f32 %v1489_v39, %v1489_v39  ;;  %v1117_v8 = vsub.f32 %v8398_v54, %v6945_v43  ;;  %v1118_v48 = vsub.f32 %v8399_v11, %v6945_v43  ;;  %v8400_v5 = vld [vmem:[#allocation161_spill] sm:$0xff] }
 0x2eb   :  { %v1607_v45 = vadd.f32 %v1606_v16, %v1545_v18  ;;  %v1115_v16 = vsub.f32 %v8396_v9, %v6945_v43  ;;  %v1492_v60 = vmul.f32 %v6943_v1, %v1114_v13  ;;  %v1553_v35 = vmul.f32 %v1490_v6, %v1490_v6 }
 0x2ec   :  { %v7028_v18 = vpop.permute.xlu1 %1321  ;;  %v1119_v39 = vsub.f32 %v8400_v5, %v6945_v43 }
 0x2ed   :  { %v1608_v3 = vadd.f32 %v1607_v45, %v1546_v0  ;;  %v8397_v0 = vld [vmem:[#allocation155_spill] sm:$0xff]  ;;  %v1493_v61 = vmul.f32 %v6947_v2, %v1115_v16 }
 0x2ee   :  { %v7023_v7 = vpop.permute.xlu0 %1316  ;;  %v1116_v45 = vsub.f32 %v8397_v0, %v6945_v43  ;;  %v8401_v2 = vld [vmem:[#allocation163_spill] sm:$0xff] }
 0x2ef   :  { %v1609_v41 = vadd.f32 %v1608_v3, %v1547_v30 }
 0x2f0   :  { %v7041_v21 = vpop.permute.xlu1 %1331 }
 0x2f1   :  { %v1610_v17 = vadd.f32 %v1609_v41, %v1548_v50  ;;  %v1554_v50 = vmul.f32 %v1491_v36, %v1491_v36 }
 0x2f2   :  { %v7036_v3 = vpop.permute.xlu0 %1326 }
 0x2f3   :  { %v1611_v26 = vadd.f32 %v1610_v17, %v1549_v14  ;;  %v1494_v14 = vmul.f32 %v6953_v29, %v1116_v45  ;;  %v1555_v17 = vmul.f32 %v1492_v60, %v1492_v60  ;;  %v8402_v29 = vld [vmem:[#allocation165_spill] sm:$0xff]  ;;  %v1497_v45 = vmul.f32 %v6971_v33, %v1119_v39  ;;  %v8405_v33 = vld [vmem:[#allocation171_spill] sm:$0xff] }
 0x2f4   :  { %v1124_v39 = vsub.f32 %v8405_v33, %v6945_v43 }
 0x2f5   :  { %v1612_v19 = vadd.f32 %v1611_v26, %v1550_v10  ;;  %v1495_v10 = vmul.f32 %v6959_v47, %v1117_v8  ;;  %v1556_v26 = vmul.f32 %v1493_v61, %v1493_v61  ;;  %v1557_v16 = vmul.f32 %v1494_v14, %v1494_v14  ;;  %v8403_v47 = vld [vmem:[#allocation167_spill] sm:$0xff] }
 0x2f6   :  { %v7049_v6 = vpop.permute.xlu0 %1336 }
 0x2f7   :  { %v1613_v12 = vadd.f32 %v1612_v19, %v1551_v57  ;;  %v1120_v57 = vsub.f32 %v8401_v2, %v6945_v43  ;;  %v1496_v19 = vmul.f32 %v6963_v15, %v1118_v48  ;;  %v1558_v60 = vmul.f32 %v1495_v10, %v1495_v10  ;;  %v8404_v15 = vld [vmem:[#allocation169_spill] sm:$0xff] }
 0x2f8   :  { %v1123_v48 = vsub.f32 %v8404_v15, %v6945_v43 }
 0x2f9   :  { %v1614_v30 = vadd.f32 %v1613_v12, %v1552_v58  ;;  %v1342_v58 = vpop.permute.xlu1 %1341  ;;  %v1121_v12 = vsub.f32 %v8402_v29, %v6945_v43  ;;  %v1498_v8 = vmul.f32 %v6976_v27, %v1120_v57  ;;  %v1559_v61 = vmul.f32 %v1496_v19, %v1496_v19  ;;  %v8406_v27 = vld [vmem:[#allocation173_spill] sm:$0xff] }
 0x2fa   :  { %v1125_v57 = vsub.f32 %v8406_v27, %v6945_v43  ;;  %v1501_v19 = vmul.f32 %v6997_v59, %v1123_v48  ;;  %v8409_v59 = vld [vmem:[#allocation114_spill] sm:$0xff] }
 0x2fb   :  { %v1615_v41 = vadd.f32 %v1614_v30, %v1553_v35  ;;  %v1122_v30 = vsub.f32 %v8403_v47, %v6945_v43  ;;  %v1499_v14 = vmul.f32 %v6984_v55, %v1121_v12  ;;  %v8407_v55 = vld [vmem:[#allocation47_spill] sm:$0xff]  ;;  %v1128_v48 = vsub.f32 %v8409_v59, %v6945_v43 }
 0x2fc   :  { %v1126_v12 = vsub.f32 %v8407_v55, %v6945_v43 }
 0x2fd   :  { %v1616_v1 = vadd.f32 %v1615_v41, %v1554_v50  ;;  %v1347_v41 = vpop.permute.xlu0 %1346  ;;  %v1500_v10 = vmul.f32 %v6989_v56, %v1122_v30  ;;  %v8408_v56 = vld [vmem:[#allocation40_spill] sm:$0xff] }
 0x2fe   :  { %v1127_v30 = vsub.f32 %v8408_v56, %v6945_v43 }
 0x2ff   :  { %v1617_v13 = vadd.f32 %v1616_v1, %v1555_v17  ;;  %v1560_v17 = vmul.f32 %v1497_v45, %v1497_v45  ;;  %v1502_v45 = vmul.f32 %v7002_v32, %v1124_v39  ;;  %v8410_v32 = vld [vmem:[#allocation117_spill] sm:$0xff] }
 0x300   :  { %v1129_v39 = vsub.f32 %v8410_v32, %v6945_v43 }
 0x301   :  { %v1618_v36 = vadd.f32 %v1617_v13, %v1556_v26  ;;  %v1352_v26 = vpop.permute.xlu1 %1351  ;;  %v1561_v13 = vmul.f32 %v1498_v8, %v1498_v8  ;;  %v1503_v8 = vmul.f32 %v7010_v20, %v1125_v57  ;;  %v8411_v20 = vld [vmem:[#allocation120_spill] sm:$0xff] }
 0x302   :  { %v1130_v57 = vsub.f32 %v8411_v20, %v6945_v43 }
 0x303   :  { %v1619_v35 = vadd.f32 %v1618_v36, %v1557_v16  ;;  %v1562_v36 = vmul.f32 %v1499_v14, %v1499_v14  ;;  %v1504_v14 = vmul.f32 %v7015_v38, %v1126_v12  ;;  %v8412_v38 = vld [vmem:[#allocation123_spill] sm:$0xff] }
 0x304   :  { %v1131_v12 = vsub.f32 %v8412_v38, %v6945_v43 }
 0x305   :  { %v1620_v50 = vadd.f32 %v1619_v35, %v1558_v60  ;;  %v1357_v35 = vpop.permute.xlu0 %1356  ;;  %v1362_v33 = vpop.permute.xlu1 %1361 }
 0x307   :  { %v1621_v1 = vadd.f32 %v1620_v50, %v1559_v61  ;;  %v1563_v61 = vmul.f32 %v1500_v10, %v1500_v10  ;;  %v1505_v10 = vmul.f32 %v7023_v7, %v1127_v30  ;;  %v8413_v7 = vld [vmem:[#allocation126_spill] sm:$0xff] }
 0x308   :  { %v1132_v30 = vsub.f32 %v8413_v7, %v6945_v43  ;;  %v8416_v7 = vld [vmem:[#allocation135_spill] sm:$0xff] }
 0x309   :  { %v1622_v16 = vadd.f32 %v1621_v1, %v1560_v17  ;;  %v1564_v17 = vmul.f32 %v1501_v19, %v1501_v19  ;;  %v1367_v55 = vpop.permute.xlu0 %1366  ;;  %v1372_v56 = vpop.permute.xlu1 %1371  ;;  %v1506_v19 = vmul.f32 %v7028_v18, %v1128_v48  ;;  %v8414_v18 = vld [vmem:[#allocation129_spill] sm:$0xff] }
 0x30a   :  { %v1133_v48 = vsub.f32 %v8414_v18, %v6945_v43  ;;  %v8417_v18 = vld [vmem:[#allocation138_spill] sm:$0xff] }
 0x30b   :  { %v1623_v60 = vadd.f32 %v1622_v16, %v1561_v13  ;;  %v1565_v13 = vmul.f32 %v1502_v45, %v1502_v45  ;;  %v1507_v45 = vmul.f32 %v7036_v3, %v1129_v39  ;;  %v8415_v3 = vld [vmem:[#allocation132_spill] sm:$0xff]  ;;  %v1136_v59 = vsub.f32 %v8417_v18, %v6945_v43 }
 0x30c   :  { %v1134_v39 = vsub.f32 %v8415_v3, %v6945_v43 }
 0x30d   :  { %v1624_v50 = vadd.f32 %v1623_v60, %v1562_v36  ;;  %v1566_v36 = vmul.f32 %v1503_v8, %v1503_v8  ;;  %v1377_v32 = vpop.permute.xlu0 %1376  ;;  %v1508_v8 = vmul.f32 %v7041_v21, %v1130_v57  ;;  %v1382_v20 = vpop.permute.xlu1 %1381  ;;  %v1135_v21 = vsub.f32 %v8416_v7, %v6945_v43 }
 0x30e   :  { %v1511_v57 = vmul.f32 %v1347_v41, %v1133_v48  ;;  %v1514_v41 = vmul.f32 %v1362_v33, %v1136_v59 }
 0x30f   :  { %v1625_v1 = vadd.f32 %v1624_v50, %v1563_v61  ;;  %v1567_v61 = vmul.f32 %v1504_v14, %v1504_v14  ;;  %v1509_v14 = vmul.f32 %v7049_v6, %v1131_v12  ;;  %v1512_v6 = vmul.f32 %v1352_v26, %v1134_v39 }
 0x311   :  { %v1626_v16 = vadd.f32 %v1625_v1, %v1564_v17  ;;  %v1568_v17 = vmul.f32 %v1505_v10, %v1505_v10  ;;  %v1510_v10 = vmul.f32 %v1342_v58, %v1132_v30  ;;  %v1387_v38 = vpop.permute.xlu0 %1386  ;;  %v1513_v58 = vmul.f32 %v1357_v35, %v1135_v21 }
 0x312   :  { %v1574_v30 = vmul.f32 %v1511_v57, %v1511_v57  ;;  %v1575_v48 = vmul.f32 %v1512_v6, %v1512_v6  ;;  %v1577_v21 = vmul.f32 %v1514_v41, %v1514_v41 }
 0x313   :  { %v1627_v60 = vadd.f32 %v1626_v16, %v1565_v13  ;;  %v1569_v13 = vmul.f32 %v1506_v19, %v1506_v19  ;;  %v1572_v19 = vmul.f32 %v1509_v14, %v1509_v14  ;;  %v1573_v12 = vmul.f32 %v1510_v10, %v1510_v10 }
 0x314   :  { %v1576_v39 = vmul.f32 %v1513_v58, %v1513_v58 }
 0x315   :  { %v1628_v50 = vadd.f32 %v1627_v60, %v1566_v36  ;;  %v1570_v36 = vmul.f32 %v1507_v45, %v1507_v45 }
 0x317   :  { %v1629_v1 = vadd.f32 %v1628_v50, %v1567_v61  ;;  %v1571_v61 = vmul.f32 %v1508_v8, %v1508_v8 }
 0x319   :  { %v1630_v16 = vadd.f32 %v1629_v1, %v1568_v17  ;;  %v1392_v1 = vpop.permute.xlu1 %1391 }
 0x31b   :  { %v1631_v60 = vadd.f32 %v1630_v16, %v1569_v13  ;;  %v8418_v13 = vld [vmem:[#allocation140_spill] sm:$0xff] }
 0x31c   :  { %v1137_v16 = vsub.f32 %v8418_v13, %v6945_v43 }
 0x31d   :  { %v1632_v50 = vadd.f32 %v1631_v60, %v1570_v36  ;;  %v1397_v36 = vpop.permute.xlu0 %1396  ;;  %v8419_v60 = vld [vmem:[#allocation142_spill] sm:$0xff] }
 0x31e   :  { %v1138_v7 = vsub.f32 %v8419_v60, %v6945_v43  ;;  %v1515_v26 = vmul.f32 %v1367_v55, %v1137_v16 }
 0x31f   :  { %v1633_v17 = vadd.f32 %v1632_v50, %v1571_v61  ;;  %v1402_v61 = vpop.permute.xlu1 %1401  ;;  %v8420_v50 = vld [vmem:[#allocation144_spill] sm:$0xff] }
 0x320   :  { %v1139_v18 = vsub.f32 %v8420_v50, %v6945_v43  ;;  %v1516_v35 = vmul.f32 %v1372_v56, %v1138_v7  ;;  %v1578_v59 = vmul.f32 %v1515_v26, %v1515_v26 }
 0x321   :  { %v1634_v45 = vadd.f32 %v1633_v17, %v1572_v19  ;;  %v8421_v19 = vld [vmem:[#allocation146_spill] sm:$0xff] }
 0x322   :  { %v1140_v17 = vsub.f32 %v8421_v19, %v6945_v43  ;;  %v1517_v33 = vmul.f32 %v1377_v32, %v1139_v18  ;;  %v1579_v16 = vmul.f32 %v1516_v35, %v1516_v35 }
 0x323   :  { %v1635_v8 = vadd.f32 %v1634_v45, %v1573_v12  ;;  %v1407_v12 = vpop.permute.xlu0 %1406  ;;  %v8422_v45 = vld [vmem:[#allocation148_spill] sm:$0xff] }
 0x324   :  { %v1141_v60 = vsub.f32 %v8422_v45, %v6945_v43  ;;  %v1518_v55 = vmul.f32 %v1382_v20, %v1140_v17  ;;  %v1580_v7 = vmul.f32 %v1517_v33, %v1517_v33 }
 0x325   :  { %v1636_v14 = vadd.f32 %v1635_v8, %v1574_v30  ;;  %v1412_v30 = vpop.permute.xlu1 %1411  ;;  %v8423_v8 = vld [vmem:[#allocation150_spill] sm:$0xff] }
 0x326   :  { %v1142_v50 = vsub.f32 %v8423_v8, %v6945_v43  ;;  %v1519_v56 = vmul.f32 %v1387_v38, %v1141_v60  ;;  %v1581_v18 = vmul.f32 %v1518_v55, %v1518_v55 }
 0x327   :  { %v1637_v10 = vadd.f32 %v1636_v14, %v1575_v48  ;;  %v8424_v48 = vld [vmem:[#allocation152_spill] sm:$0xff] }
 0x328   :  { %v1143_v14 = vsub.f32 %v8424_v48, %v6945_v43  ;;  %v1520_v32 = vmul.f32 %v1392_v1, %v1142_v50  ;;  %v1582_v17 = vmul.f32 %v1519_v56, %v1519_v56 }
 0x329   :  { %v1638_v57 = vadd.f32 %v1637_v10, %v1576_v39  ;;  %v1417_v39 = vpop.permute.xlu0 %1416  ;;  %v8425_v10 = vld [vmem:[#allocation154_spill] sm:$0xff] }
 0x32a   :  { %v1144_v45 = vsub.f32 %v8425_v10, %v6945_v43  ;;  %v1521_v20 = vmul.f32 %v1397_v36, %v1143_v14  ;;  %v1583_v60 = vmul.f32 %v1520_v32, %v1520_v32 }
 0x32b   :  { %v1639_v6 = vadd.f32 %v1638_v57, %v1577_v21  ;;  %v1422_v21 = vpop.permute.xlu1 %1421  ;;  %v8426_v57 = vld [vmem:[#allocation156_spill] sm:$0xff] }
 0x32c   :  { %v1145_v8 = vsub.f32 %v8426_v57, %v6945_v43  ;;  %v1522_v38 = vmul.f32 %v1402_v61, %v1144_v45  ;;  %v1584_v50 = vmul.f32 %v1521_v20, %v1521_v20 }
 0x32d   :  { %v1640_v58 = vadd.f32 %v1639_v6, %v1578_v59  ;;  %v8427_v59 = vld [vmem:[#allocation158_spill] sm:$0xff] }
 0x32e   :  { %v1146_v6 = vsub.f32 %v8427_v59, %v6945_v43  ;;  %v1523_v1 = vmul.f32 %v1407_v12, %v1145_v8  ;;  %v1585_v14 = vmul.f32 %v1522_v38, %v1522_v38 }
 0x32f   :  { %v1641_v41 = vadd.f32 %v1640_v58, %v1579_v16  ;;  %v1427_v16 = vpop.permute.xlu0 %1426  ;;  %v8428_v58 = vld [vmem:[#allocation160_spill] sm:$0xff] }
 0x330   :  { %v1147_v10 = vsub.f32 %v8428_v58, %v6945_v43  ;;  %v1524_v36 = vmul.f32 %v1412_v30, %v1146_v6  ;;  %v1586_v45 = vmul.f32 %v1523_v1, %v1523_v1  ;;  %v8432_v30 = vld [vmem:[#allocation168_spill] sm:$0xff] }
 0x331   :  { %v1642_v26 = vadd.f32 %v1641_v41, %v1580_v7  ;;  %v1432_v7 = vpop.permute.xlu1 %1431  ;;  %v8429_v41 = vld [vmem:[#allocation162_spill] sm:$0xff]  ;;  %v1151_v6 = vsub.f32 %v8432_v30, %v6945_v43 }
 0x332   :  { %v1148_v57 = vsub.f32 %v8429_v41, %v6945_v43  ;;  %v1525_v61 = vmul.f32 %v1417_v39, %v1147_v10  ;;  %v1587_v8 = vmul.f32 %v1524_v36, %v1524_v36  ;;  %v8433_v39 = vld [vmem:[#allocation170_spill] sm:$0xff] }
 0x333   :  { %v1643_v35 = vadd.f32 %v1642_v26, %v1581_v18  ;;  %v8430_v18 = vld [vmem:[#allocation164_spill] sm:$0xff]  ;;  %v1152_v10 = vsub.f32 %v8433_v39, %v6945_v43 }
 0x334   :  { %v1149_v26 = vsub.f32 %v8430_v18, %v6945_v43  ;;  %v1526_v12 = vmul.f32 %v1422_v21, %v1148_v57  ;;  %v1588_v59 = vmul.f32 %v1525_v61, %v1525_v61  ;;  %v8434_v21 = vld [vmem:[#allocation172_spill] sm:$0xff] }
 0x335   :  { %v1644_v33 = vadd.f32 %v1643_v35, %v1582_v17  ;;  %v1437_v17 = vpop.permute.xlu0 %1436  ;;  %v8431_v35 = vld [vmem:[#allocation166_spill] sm:$0xff]  ;;  %v1153_v57 = vsub.f32 %v8434_v21, %v6945_v43 }
 0x336   :  { %v1150_v58 = vsub.f32 %v8431_v35, %v6945_v43  ;;  %v1529_v35 = vmul.f32 %v1437_v17, %v1151_v6  ;;  %v8437_v6 = vld [vmem:[#allocation50_spill] sm:$0xff] }
 0x337   :  { %v1645_v55 = vadd.f32 %v1644_v33, %v1583_v60  ;;  %v1442_v60 = vpop.permute.xlu1 %1441  ;;  %v1527_v33 = vmul.f32 %v1427_v16, %v1149_v26 }
 0x338   :  { %v1528_v38 = vmul.f32 %v1432_v7, %v1150_v58  ;;  %v1530_v61 = vmul.f32 %v1442_v60, %v1152_v10  ;;  %v1592_v7 = vmul.f32 %v1529_v35, %v1529_v35  ;;  %v8438_v10 = vld [vmem:[#allocation42_spill] sm:$0xff] }
 0x339   :  { %v1646_v56 = vadd.f32 %v1645_v55, %v1584_v50  ;;  %v1589_v50 = vmul.f32 %v1526_v12, %v1526_v12  ;;  %v1447_v1 = vpop.permute.xlu0 %1446 }
 0x33a   :  { %v1591_v16 = vmul.f32 %v1528_v38, %v1528_v38 }
 0x33b   :  { %v1647_v32 = vadd.f32 %v1646_v56, %v1585_v14  ;;  %v1590_v14 = vmul.f32 %v1527_v33, %v1527_v33  ;;  %v1452_v36 = vpop.permute.xlu1 %1451 }
 0x33d   :  { %v1648_v20 = vadd.f32 %v1647_v32, %v1586_v45  ;;  %v8435_v45 = vld [vmem:[#allocation38_spill] sm:$0xff] }
 0x33e   :  { %v1154_v32 = vsub.f32 %v8435_v45, %v6945_v43 }
 0x33f   :  { %v1649_v41 = vadd.f32 %v1648_v20, %v1587_v8  ;;  %v1457_v8 = vpop.permute.xlu0 %1456  ;;  %v1593_v20 = vmul.f32 %v1530_v61, %v1530_v61 }
 0x340   :  { %v1532_v17 = vmul.f32 %v1452_v36, %v1154_v32 }
 0x341   :  { %v1650_v55 = vadd.f32 %v1649_v41, %v1588_v59  ;;  %v1531_v59 = vmul.f32 %v1447_v1, %v1153_v57  ;;  %v8436_v41 = vld [vmem:[#allocation174_spill] sm:$0xff]  ;;  %v8439_v57 = vld [vmem:[#allocation65_spill] sm:$0xff] }
 0x342   :  { %v1155_v12 = vsub.f32 %v8436_v41, %v6945_v43 }
 0x343   :  { %v1651_v56 = vadd.f32 %v1650_v55, %v1589_v50  ;;  %v1156_v50 = vsub.f32 %v8437_v6, %v6945_v43  ;;  %v1462_v55 = vpop.permute.xlu1 %1461  ;;  %v1467_v41 = vpop.permute.xlu0 %1466 }
 0x344   :  { %v1533_v60 = vmul.f32 %v1457_v8, %v1155_v12 }
 0x345   :  { %v1652_v26 = vadd.f32 %v1651_v56, %v1590_v14  ;;  %v1594_v14 = vmul.f32 %v1531_v59, %v1531_v59  ;;  %v1157_v56 = vsub.f32 %v8438_v10, %v6945_v43  ;;  %v1534_v1 = vmul.f32 %v1462_v55, %v1156_v50 }
 0x347   :  { %v1653_v58 = vadd.f32 %v1652_v26, %v1591_v16  ;;  %v1595_v16 = vmul.f32 %v1532_v17, %v1532_v17  ;;  %v1158_v26 = vsub.f32 %v8439_v57, %v6945_v43  ;;  %v1535_v36 = vmul.f32 %v1467_v41, %v1157_v56  ;;  %v1472_v32 = vpop.permute.xlu1 %1471 }
 0x349   :  { %v1654_v33 = vadd.f32 %v1653_v58, %v1592_v7  ;;  %v1596_v58 = vmul.f32 %v1533_v60, %v1533_v60  ;;  %v1597_v7 = vmul.f32 %v1534_v1, %v1534_v1  ;;  %v1536_v45 = vmul.f32 %v1472_v32, %v1158_v26  ;;  %v1669_v60 = vld [vmem:[#allocation11] sm:$0x1] }
 0x34a   :  { %v1598_v59 = vmul.f32 %v1535_v36, %v1535_v36  ;;  %v8443_v36 = vld [vmem:[#allocation40_spill] sm:$0xff]  ;;  %v8444_v32 = vld [vmem:[#allocation114_spill] sm:$0xff] }
 0x34b   :  { %v1655_v38 = vadd.f32 %v1654_v33, %v1593_v20  ;;  %v1599_v12 = vmul.f32 %v1536_v45, %v1536_v45  ;;  %v8440_v45 = vld [vmem:[#allocation28_spill] sm:$0xff] }
 0x34d   :  { %v1656_v35 = vadd.f32 %v1655_v38, %v1594_v14 }
 0x34f   :  { %v1657_v61 = vadd.f32 %v1656_v35, %v1595_v16  ;;  %v7143_v16 = vld [vmem:[#allocation11 + $0x1] sm:$0x1] }
 0x351   :  { %v1658_v6 = vadd.f32 %v1657_v61, %v1596_v58  ;;  %v8441_v61 = vld [vmem:[#allocation171_spill] sm:$0xff] }
 0x352   :  { %v8442_v58 = vld [vmem:[#allocation47_spill] sm:$0xff] }
 0x353   :  { %v1659_v20 = vadd.f32 %v1658_v6, %v1597_v7  ;;  %v8445_v7 = vld [vmem:[#allocation117_spill] sm:$0xff] }
 0x355   :  { %v1660_v8 = vadd.f32 %v1659_v20, %v1598_v59  ;;  %v8446_v59 = vld [vmem:[#allocation120_spill] sm:$0xff] }
 0x357   :  { %v1661_v33 = vadd.f32 %v1660_v8, %v1599_v12  ;;  %v8447_v12 = vld [vmem:[#allocation123_spill] sm:$0xff] }
 0x359   :  { %v1662_v10 = vrot.slane %v1661_v33, 4 }
 0x35b   :  { %v1663_v17 = vadd.f32 %v1662_v10, %v1661_v33  ;;  %v8448_v33 = vld [vmem:[#allocation126_spill] sm:$0xff]  ;;  %v8461_v10 = vld [vmem:[#allocation160_spill] sm:$0xff] }
 0x35d   :  { %v1664_v38 = vrot.slane %v1663_v17, 2 }
 0x35f   :  { %v1665_v50 = vadd.f32 %v1664_v38, %v1663_v17  ;;  %v8449_v38 = vld [vmem:[#allocation129_spill] sm:$0xff] }
 0x361   :  { %v1666_v55 = vrot.slane %v1665_v50, 1 }
 0x363   :  { %v1667_v14 = vadd.f32 %v1666_v55, %v1665_v50 }
 0x365   :  { %v1668_v57 = vmul.f32 0.007936508, %v1667_v14  ;;  %v8450_v14 = vld [vmem:[#allocation135_spill] sm:$0xff] }
 0x367   :  { %v1670_v21 = vadd.f32 1e-05, %v1668_v57 }
 0x369   :  { %4080 = vrsqrt.f32 %v1670_v21 }
 0x373   :  { %v4081_v41 = vpop.eup %4080 }
 0x374   :  { %v1672_v56 = vmul.f32 %v4081_v41, %v1669_v60  ;;  %v8451_v41 = vld [vmem:[#allocation138_spill] sm:$0xff] }
 0x376   :  { %v7146_v6 = vmul.f32 %v1672_v56, %v6945_v43  ;;  %v7149_v35 = vrot.slane %v1672_v56, %v8440_v45 }
 0x378   :  { %v7155_v1 = vmul.f32 %v7149_v35, %v8367_v22  ;;  %v7159_v21 = vmul.f32 %v7149_v35, %v8368_v25  ;;  %v7163_v57 = vmul.f32 %v7149_v35, %v8369_v63  ;;  %v7167_v43 = vmul.f32 %v7149_v35, %v8372_v62 }
 0x379   :  { %v7171_v26 = vmul.f32 %v7149_v35, %v8373_v51  ;;  %v7175_v22 = vmul.f32 %v7149_v35, %v8375_v44  ;;  %v7179_v25 = vmul.f32 %v7149_v35, %v8377_v42  ;;  %v7183_v63 = vmul.f32 %v7149_v35, %v8379_v49 }
 0x37a   :  { %v7187_v62 = vmul.f32 %v7149_v35, %v8381_v52  ;;  %v7191_v51 = vmul.f32 %v7149_v35, %v8383_v31  ;;  %v7195_v44 = vmul.f32 %v7149_v35, %v8385_v28  ;;  %v7199_v42 = vmul.f32 %v7149_v35, %v8387_v53 }
 0x37b   :  { %v7203_v49 = vmul.f32 %v7149_v35, %v8389_v46  ;;  %v7207_v52 = vmul.f32 %v7149_v35, %v8390_v24  ;;  %v7211_v31 = vmul.f32 %v7149_v35, %v8391_v40  ;;  %v7215_v28 = vmul.f32 %v7149_v35, %v8392_v37 }
 0x37c   :  { %v7219_v53 = vmul.f32 %v7149_v35, %v8393_v23  ;;  %v7223_v46 = vmul.f32 %v7149_v35, %v8394_v34  ;;  %v7227_v24 = vmul.f32 %v7149_v35, %v8395_v4  ;;  %v7231_v40 = vmul.f32 %v7149_v35, %v8396_v9 }
 0x37d   :  { %v7235_v37 = vmul.f32 %v7149_v35, %v8397_v0  ;;  %v7239_v23 = vmul.f32 %v7149_v35, %v8398_v54  ;;  %v7243_v34 = vmul.f32 %v7149_v35, %v8399_v11  ;;  %v7247_v4 = vmul.f32 %v7149_v35, %v8400_v5 }
 0x37e   :  { %v7251_v9 = vmul.f32 %v7149_v35, %v8401_v2  ;;  %v7255_v0 = vmul.f32 %v7149_v35, %v8402_v29  ;;  %v7259_v54 = vmul.f32 %v7149_v35, %v8403_v47  ;;  %v7263_v11 = vmul.f32 %v7149_v35, %v8404_v15 }
 0x37f   :  { %v7267_v5 = vmul.f32 %v7149_v35, %v8441_v61  ;;  %v7271_v2 = vmul.f32 %v7149_v35, %v8406_v27  ;;  %v7275_v29 = vmul.f32 %v7149_v35, %v8442_v58  ;;  %v7279_v47 = vmul.f32 %v7149_v35, %v8443_v36  ;;  %v8452_v58 = vld [vmem:[#allocation142_spill] sm:$0xff] }
 0x380   :  { %v7283_v15 = vmul.f32 %v7149_v35, %v8444_v32  ;;  %v7287_v20 = vmul.f32 %v7149_v35, %v8445_v7  ;;  %v7291_v27 = vmul.f32 %v7149_v35, %v8446_v59  ;;  %v7295_v8 = vmul.f32 %v7149_v35, %v8447_v12  ;;  %v8453_v32 = vld [vmem:[#allocation144_spill] sm:$0xff] }
 0x381   :  { %v7299_v17 = vmul.f32 %v7149_v35, %v8448_v33  ;;  %v7303_v50 = vmul.f32 %v7149_v35, %v8449_v38  ;;  %v7307_v55 = vmul.f32 %v7149_v35, %v8415_v3  ;;  %v7311_v60 = vmul.f32 %v7149_v35, %v8450_v14  ;;  %v8454_v59 = vld [vmem:[#allocation148_spill] sm:$0xff]  ;;  %v8455_v33 = vld [vmem:[#allocation150_spill] sm:$0xff] }
 0x382   :  { %v7315_v56 = vmul.f32 %v7149_v35, %v8451_v41  ;;  %v7319_v61 = vmul.f32 %v7149_v35, %v8418_v13  ;;  %v7323_v36 = vmul.f32 %v7149_v35, %v8452_v58  ;;  %v7327_v3 = vmul.f32 %v7149_v35, %v8453_v32  ;;  %v8457_v14 = vld [vmem:[#allocation154_spill] sm:$0xff]  ;;  %v8459_v58 = vld [vmem:[#allocation156_spill] sm:$0xff] }
 0x383   :  { %v7331_v7 = vmul.f32 %v7149_v35, %v8421_v19  ;;  %v7335_v12 = vmul.f32 %v7149_v35, %v8454_v59  ;;  %v7339_v13 = vmul.f32 %v7149_v35, %v8455_v33  ;;  %v7343_v38 = vmul.f32 %v7149_v35, %v8424_v48  ;;  %v8460_v32 = vld [vmem:[#allocation158_spill] sm:$0xff] }
 0x384   :  { %v7347_v41 = vmul.f32 %v7149_v35, %v8457_v14  ;;  %v7351_v19 = vmul.f32 %v7149_v35, %v8459_v58  ;;  %v7355_v59 = vmul.f32 %v7149_v35, %v8460_v32  ;;  %v7359_v33 = vmul.f32 %v7149_v35, %v8461_v10 }
 0x385   :  { %8456 = vst [vmem:[#allocation72_spill] sm:$0xff] %v7339_v13  ;;  %v8463_v13 = vld [vmem:[#allocation162_spill] sm:$0xff]  ;;  %v7367_v14 = vmul.f32 %v7149_v35, %v8430_v18  ;;  %v7375_v32 = vmul.f32 %v7149_v35, %v8432_v30  ;;  %v7379_v10 = vmul.f32 %v7149_v35, %v8433_v39 }
 0x386   :  { %8458 = vst [vmem:[#allocation89_spill] sm:$0xff] %v7347_v41  ;;  %8462 = vst [vmem:[#allocation75_spill] sm:$0xff] %v7359_v33  ;;  %v7363_v48 = vmul.f32 %v7149_v35, %v8463_v13  ;;  %v8466_v41 = vld [vmem:[#allocation166_spill] sm:$0xff]  ;;  %v8470_v33 = vld [vmem:[#allocation172_spill] sm:$0xff] }
 0x387   :  { %8465 = vst [vmem:[#allocation79_spill] sm:$0xff] %v7367_v14  ;;  %v7371_v58 = vmul.f32 %v7149_v35, %v8466_v41  ;;  %8468 = vst [vmem:[#allocation83_spill] sm:$0xff] %v7375_v32  ;;  %v7383_v13 = vmul.f32 %v7149_v35, %v8470_v33  ;;  %v8473_v14 = vld [vmem:[#allocation174_spill] sm:$0xff] }
 0x388   :  { %8464 = vst [vmem:[#allocation91_spill] sm:$0xff] %v7363_v48  ;;  %8469 = vst [vmem:[#allocation97_spill] sm:$0xff] %v7379_v10  ;;  %v8471_v48 = vld [vmem:[#allocation38_spill] sm:$0xff]  ;;  %v7391_v41 = vmul.f32 %v7149_v35, %v8473_v14  ;;  %v8476_v10 = vld [vmem:[#allocation65_spill] sm:$0xff] }
 0x389   :  { %8467 = vst [vmem:[#allocation94_spill] sm:$0xff] %v7371_v58  ;;  %v7387_v18 = vmul.f32 %v7149_v35, %v8471_v48  ;;  %v8474_v58 = vld [vmem:[#allocation50_spill] sm:$0xff]  ;;  %v7403_v33 = vmul.f32 %v7149_v35, %v8476_v10  ;;  %v8477_v48 = vsub.f32 %v7143_v16, %v7146_v6 }
 0x38a   :  { %v7395_v30 = vmul.f32 %v7149_v35, %v8474_v58  ;;  %v8475_v32 = vld [vmem:[#allocation42_spill] sm:$0xff] }
 0x38b   :  { %8472 = vst [vmem:[#allocation112_spill] sm:$0xff] %v7387_v18  ;;  %v7399_v39 = vmul.f32 %v7149_v35, %v8475_v32  ;;  %v7409_v18 = vrot.slane %v8477_v48, %v8440_v45 }
 0x38d   :  { %v7413_v14 = vadd.f32 %v7409_v18, %v7155_v1  ;;  %v7417_v58 = vadd.f32 %v7409_v18, %v7159_v21  ;;  %v7421_v32 = vadd.f32 %v7409_v18, %v7163_v57  ;;  %v7425_v35 = vadd.f32 %v7409_v18, %v7167_v43  ;;  %v8485_v10 = vld [vmem:[#allocation75_spill] sm:$0xff] }
 0x38e   :  { %v7429_v16 = vadd.f32 %v7409_v18, %v7171_v26  ;;  %v7433_v6 = vadd.f32 %v7409_v18, %v7175_v22  ;;  %v7437_v45 = vadd.f32 %v7409_v18, %v7179_v25  ;;  %v7441_v1 = vadd.f32 %v7409_v18, %v7183_v63 }
 0x38f   :  { %8478 = vst [vmem:[#allocation86_spill] sm:$0xff] %v7413_v14  ;;  %v7445_v21 = vadd.f32 %v7409_v18, %v7187_v62  ;;  %v7449_v57 = vadd.f32 %v7409_v18, %v7191_v51  ;;  %v7453_v43 = vadd.f32 %v7409_v18, %v7195_v44  ;;  %v7457_v26 = vadd.f32 %v7409_v18, %v7199_v42 }
 0x390   :  { %v7461_v22 = vadd.f32 %v7409_v18, %v7203_v49  ;;  %v7465_v25 = vadd.f32 %v7409_v18, %v7207_v52  ;;  %v7469_v63 = vadd.f32 %v7409_v18, %v7211_v31  ;;  %v7473_v62 = vadd.f32 %v7409_v18, %v7215_v28 }
 0x391   :  { %v7477_v51 = vadd.f32 %v7409_v18, %v7219_v53  ;;  %v7481_v44 = vadd.f32 %v7409_v18, %v7223_v46  ;;  %v7485_v42 = vadd.f32 %v7409_v18, %v7227_v24  ;;  %v7489_v49 = vadd.f32 %v7409_v18, %v7231_v40 }
 0x392   :  { %v7493_v52 = vadd.f32 %v7409_v18, %v7235_v37  ;;  %v7497_v31 = vadd.f32 %v7409_v18, %v7239_v23  ;;  %v7501_v28 = vadd.f32 %v7409_v18, %v7243_v34  ;;  %v7505_v53 = vadd.f32 %v7409_v18, %v7247_v4 }
 0x393   :  { %v7509_v46 = vadd.f32 %v7409_v18, %v7251_v9  ;;  %v7513_v24 = vadd.f32 %v7409_v18, %v7255_v0  ;;  %v7517_v40 = vadd.f32 %v7409_v18, %v7259_v54  ;;  %v7521_v37 = vadd.f32 %v7409_v18, %v7263_v11 }
 0x394   :  { %v7525_v23 = vadd.f32 %v7409_v18, %v7267_v5  ;;  %v7529_v34 = vadd.f32 %v7409_v18, %v7271_v2  ;;  %v7533_v4 = vadd.f32 %v7409_v18, %v7275_v29  ;;  %v7537_v9 = vadd.f32 %v7409_v18, %v7279_v47 }
 0x395   :  { %v7541_v0 = vadd.f32 %v7409_v18, %v7283_v15  ;;  %v7545_v54 = vadd.f32 %v7409_v18, %v7287_v20  ;;  %v7549_v11 = vadd.f32 %v7409_v18, %v7291_v27  ;;  %v7553_v5 = vadd.f32 %v7409_v18, %v7295_v8 }
 0x396   :  { %v7557_v2 = vadd.f32 %v7409_v18, %v7299_v17  ;;  %v7561_v29 = vadd.f32 %v7409_v18, %v7303_v50  ;;  %v7565_v47 = vadd.f32 %v7409_v18, %v7307_v55  ;;  %v7569_v15 = vadd.f32 %v7409_v18, %v7311_v60  ;;  %v8479_v60 = vld [vmem:[#allocation72_spill] sm:$0xff] }
 0x397   :  { %v7573_v20 = vadd.f32 %v7409_v18, %v7315_v56  ;;  %v7577_v27 = vadd.f32 %v7409_v18, %v7319_v61  ;;  %v7581_v8 = vadd.f32 %v7409_v18, %v7323_v36  ;;  %v7585_v17 = vadd.f32 %v7409_v18, %v7327_v3  ;;  %v8481_v36 = vld [vmem:[#allocation89_spill] sm:$0xff] }
 0x398   :  { %v7589_v50 = vadd.f32 %v7409_v18, %v7331_v7  ;;  %v7593_v55 = vadd.f32 %v7409_v18, %v7335_v12  ;;  %v7597_v56 = vadd.f32 %v7409_v18, %v8479_v60  ;;  %v7601_v61 = vadd.f32 %v7409_v18, %v7343_v38  ;;  %v8486_v60 = vld [vmem:[#allocation91_spill] sm:$0xff] }
 0x399   :  { %v7605_v3 = vadd.f32 %v7409_v18, %v8481_v36  ;;  %v7609_v7 = vadd.f32 %v7409_v18, %v7351_v19  ;;  %v7613_v12 = vadd.f32 %v7409_v18, %v7355_v59  ;;  %v7617_v48 = vadd.f32 %v7409_v18, %v8485_v10 }
 0x39a   :  { %8480 = vst [vmem:[#allocation115_spill] sm:$0xff] %v7601_v61  ;;  %v7621_v38 = vadd.f32 %v7409_v18, %v8486_v60  ;;  %v8488_v61 = vld [vmem:[#allocation79_spill] sm:$0xff]  ;;  %v7641_v60 = vadd.f32 %v7409_v18, %v7383_v13  ;;  %v7661_v13 = vadd.f32 %v7409_v18, %v7403_v33  ;;  %v1820_v33 = vmax.f32 %v7453_v43, 0.0 }
 0x39b   :  { %8482 = vst [vmem:[#allocation99_spill] sm:$0xff] %v7605_v3  ;;  %8483 = vst [vmem:[#allocation119_spill] sm:$0xff] %v7609_v7  ;;  %v7625_v36 = vadd.f32 %v7409_v18, %v8488_v61  ;;  %v8489_v3 = vld [vmem:[#allocation94_spill] sm:$0xff]  ;;  %v8490_v7 = vld [vmem:[#allocation83_spill] sm:$0xff]  ;;  %v1830_v43 = vmax.f32 %v7493_v52, 0.0  ;;  %v1840_v52 = vmax.f32 %v7533_v4, 0.0 }
 0x39c   :  { %8484 = vst [vmem:[#allocation121_spill] sm:$0xff] %v7613_v12  ;;  %8487 = vst [vmem:[#allocation104_spill] sm:$0xff] %v7621_v38  ;;  %v7629_v19 = vadd.f32 %v7409_v18, %v8489_v3  ;;  %v7633_v59 = vadd.f32 %v7409_v18, %v8490_v7  ;;  %v8492_v12 = vld [vmem:[#allocation97_spill] sm:$0xff]  ;;  %v8495_v38 = vld [vmem:[#allocation112_spill] sm:$0xff]  ;;  %v7649_v3 = vadd.f32 %v7409_v18, %v7391_v41  ;;  %v1813_v41 = vmax.f32 %v7425_v35, 0.0 }
 0x39d   :  { %v7637_v10 = vadd.f32 %v7409_v18, %v8492_v12  ;;  %8494 = vst [vmem:[#allocation107_spill] sm:$0xff] %v7641_v60  ;;  %v7645_v61 = vadd.f32 %v7409_v18, %v8495_v38  ;;  %v7653_v7 = vadd.f32 %v7409_v18, %v7395_v30  ;;  %v7657_v12 = vadd.f32 %v7409_v18, %v7399_v39 }
 0x39e   :  { %8491 = vst [vmem:[#allocation125_spill] sm:$0xff] %v7633_v59  ;;  %8497 = vst [vmem:[#allocation133_spill] sm:$0xff] %v7649_v3  ;;  %v1811_v38 = vmax.f32 %v7417_v58, 0.0  ;;  %v1814_v3 = vmax.f32 %v7429_v16, 0.0  ;;  %v1815_v30 = vmax.f32 %v7433_v6, 0.0  ;;  %v1817_v39 = vmax.f32 %v7441_v1, 0.0 }
 0x39f   :  { %8493 = vst [vmem:[#allocation127_spill] sm:$0xff] %v7637_v10  ;;  %8496 = vst [vmem:[#allocation131_spill] sm:$0xff] %v7645_v61  ;;  %v1812_v61 = vmax.f32 %v7421_v32, 0.0  ;;  %v1819_v18 = vmax.f32 %v7449_v57, 0.0  ;;  %v1821_v58 = vmax.f32 %v7457_v26, 0.0  ;;  %v1822_v32 = vmax.f32 %v7461_v22, 0.0 }
 0x3a0   :  { %8498 = vst [vmem:[#allocation111_spill] sm:$0xff] %v7653_v7  ;;  %8499 = vst [vmem:[#allocation137_spill] sm:$0xff] %v7657_v12  ;;  %v1816_v7 = vmax.f32 %v7437_v45, 0.0  ;;  %v1818_v12 = vmax.f32 %v7445_v21, 0.0  ;;  %v1823_v35 = vmax.f32 %v7465_v25, 0.0  ;;  %v1824_v16 = vmax.f32 %v7469_v63, 0.0 }
 0x3a1   :  { %8500 = vst [vmem:[#allocation113_spill] sm:$0xff] %v7661_v13  ;;  %v1825_v6 = vmax.f32 %v7473_v62, 0.0  ;;  %v1826_v45 = vmax.f32 %v7477_v51, 0.0  ;;  %v1827_v1 = vmax.f32 %v7481_v44, 0.0  ;;  %v1828_v21 = vmax.f32 %v7485_v42, 0.0  ;;  %v8501_v60 = vld [vmem:[#allocation115_spill] sm:$0xff] }
 0x3a2   :  { %v1829_v57 = vmax.f32 %v7489_v49, 0.0  ;;  %v1831_v26 = vmax.f32 %v7497_v31, 0.0  ;;  %v1832_v22 = vmax.f32 %v7501_v28, 0.0  ;;  %v1833_v25 = vmax.f32 %v7505_v53, 0.0  ;;  %v8502_v14 = vld [vmem:[#allocation99_spill] sm:$0xff] }
 0x3a3   :  { %v1834_v63 = vmax.f32 %v7509_v46, 0.0  ;;  %v1835_v62 = vmax.f32 %v7513_v24, 0.0  ;;  %v1836_v51 = vmax.f32 %v7517_v40, 0.0  ;;  %v1837_v44 = vmax.f32 %v7521_v37, 0.0  ;;  %v8503_v13 = vld [vmem:[#allocation119_spill] sm:$0xff]  ;;  %v8504_v10 = vld [vmem:[#allocation121_spill] sm:$0xff] }
 0x3a4   :  { %v1838_v42 = vmax.f32 %v7525_v23, 0.0  ;;  %v1839_v49 = vmax.f32 %v7529_v34, 0.0  ;;  %v1841_v31 = vmax.f32 %v7537_v9, 0.0  ;;  %v1842_v28 = vmax.f32 %v7541_v0, 0.0  ;;  %v8505_v59 = vld [vmem:[#allocation104_spill] sm:$0xff] }
 0x3a5   :  { %v1843_v53 = vmax.f32 %v7545_v54, 0.0  ;;  %v1844_v46 = vmax.f32 %v7549_v11, 0.0  ;;  %v1845_v24 = vmax.f32 %v7553_v5, 0.0  ;;  %v1846_v40 = vmax.f32 %v7557_v2, 0.0 }
 0x3a6   :  { %v1847_v37 = vmax.f32 %v7561_v29, 0.0  ;;  %v1848_v23 = vmax.f32 %v7565_v47, 0.0  ;;  %v1849_v34 = vmax.f32 %v7569_v15, 0.0  ;;  %v1850_v4 = vmax.f32 %v7573_v20, 0.0 }
 0x3a7   :  { %v1851_v9 = vmax.f32 %v7577_v27, 0.0  ;;  %v1852_v0 = vmax.f32 %v7581_v8, 0.0  ;;  %v1853_v54 = vmax.f32 %v7585_v17, 0.0  ;;  %v1854_v11 = vmax.f32 %v7589_v50, 0.0 }
 0x3a8   :  { %v1855_v5 = vmax.f32 %v7593_v55, 0.0  ;;  %v1856_v2 = vmax.f32 %v7597_v56, 0.0  ;;  %v1857_v29 = vmax.f32 %v8501_v60, 0.0  ;;  %v1858_v47 = vmax.f32 %v8502_v14, 0.0  ;;  %v8506_v55 = vld [vmem:[#allocation125_spill] sm:$0xff]  ;;  %v8507_v60 = vld [vmem:[#allocation127_spill] sm:$0xff] }
 0x3a9   :  { %v1859_v15 = vmax.f32 %v8503_v13, 0.0  ;;  %v1860_v20 = vmax.f32 %v8504_v10, 0.0  ;;  %v1861_v27 = vmax.f32 %v7617_v48, 0.0  ;;  %v1862_v8 = vmax.f32 %v8505_v59, 0.0  ;;  %v8508_v13 = vld [vmem:[#allocation107_spill] sm:$0xff] }
 0x3aa   :  { %v1863_v17 = vmax.f32 %v7625_v36, 0.0  ;;  %v1864_v50 = vmax.f32 %v7629_v19, 0.0  ;;  %v1865_v56 = vmax.f32 %v8506_v55, 0.0  ;;  %v1866_v14 = vmax.f32 %v8507_v60, 0.0  ;;  %v8509_v48 = vld [vmem:[#allocation131_spill] sm:$0xff]  ;;  %v8510_v36 = vld [vmem:[#allocation133_spill] sm:$0xff] }
 0x3ab   :  { %v1867_v10 = vmax.f32 %v8508_v13, 0.0  ;;  %v1868_v59 = vmax.f32 %v8509_v48, 0.0  ;;  %v1869_v19 = vmax.f32 %v8510_v36, 0.0  ;;  %v8511_v55 = vld [vmem:[#allocation111_spill] sm:$0xff]  ;;  %v8512_v13 = vld [vmem:[#allocation137_spill] sm:$0xff] }
 0x3ac   :  { %v1870_v60 = vmax.f32 %v8511_v55, 0.0  ;;  %v1871_v48 = vmax.f32 %v8512_v13, 0.0  ;;  %v8513_v36 = vld [vmem:[#allocation113_spill] sm:$0xff]  ;;  %v8514_v13 = vld [vmem:[#allocation86_spill] sm:$0xff] }
 0x3ad   :  { %v1872_v55 = vmax.f32 %v8513_v36, 0.0  ;;  %v8515_v36 = vmax.f32 %v8514_v13, 0.0 }
 0x3af   :  { %v3730_v13 = vpack.c.bf16 %v1811_v38, %v8515_v36  ;;  %v3735_v36 = vpack.c.bf16 %v1813_v41, %v1812_v61  ;;  %v3740_v38 = vpack.c.bf16 %v1815_v30, %v1814_v3  ;;  %v3745_v41 = vpack.c.bf16 %v1817_v39, %v1816_v7 }
 0x3b0   :  { %v3750_v61 = vpack.c.bf16 %v1819_v18, %v1818_v12  ;;  %v3755_v3 = vpack.c.bf16 %v1821_v58, %v1820_v33  ;;  %v3725_v30 = vpack.c.bf16 %v1872_v55, %v1872_v55  ;;  %v3760_v7 = vpack.c.bf16 %v1823_v35, %v1822_v32 }
 0x3b1   :  { %3731 = vst [vmem:[#allocation4] sm:$0xff] %v3730_v13   ;;  %3882 = vst [vmem:[#allocation4 + $0x8] sm:$0xff] %v3735_v36   ;;  %v3765_v39 = vpack.c.bf16 %v1825_v6, %v1824_v16  ;;  %v3770_v12 = vpack.c.bf16 %v1827_v1, %v1826_v45  ;;  %v3775_v18 = vpack.c.bf16 %v1829_v57, %v1828_v21 }
 0x3b2   :  { %3883 = vst [vmem:[#allocation4 + $0x10] sm:$0xff] %v3740_v38   ;;  %3884 = vst [vmem:[#allocation4 + $0x18] sm:$0xff] %v3745_v41   ;;  %v3780_v33 = vpack.c.bf16 %v1831_v26, %v1830_v43  ;;  %v3785_v58 = vpack.c.bf16 %v1833_v25, %v1832_v22  ;;  %v3790_v55 = vpack.c.bf16 %v1835_v62, %v1834_v63 }
 0x3b3   :  { %3885 = vst [vmem:[#allocation4 + $0x20] sm:$0xff] %v3750_v61   ;;  %3886 = vst [vmem:[#allocation4 + $0x28] sm:$0xff] %v3755_v3   ;;  %v3795_v13 = vpack.c.bf16 %v1837_v44, %v1836_v51  ;;  %v3800_v36 = vpack.c.bf16 %v1839_v49, %v1838_v42  ;;  %v3805_v32 = vpack.c.bf16 %v1841_v31, %v1840_v52 }
 0x3b4   :  { %3887 = vst [vmem:[#allocation4 + $0x30] sm:$0xff] %v3760_v7   ;;  %3888 = vst [vmem:[#allocation4 + $0x38] sm:$0xff] %v3765_v39   ;;  %v3810_v35 = vpack.c.bf16 %v1843_v53, %v1842_v28  ;;  %v3815_v16 = vpack.c.bf16 %v1845_v24, %v1844_v46  ;;  %v3820_v6 = vpack.c.bf16 %v1847_v37, %v1846_v40 }
 0x3b5   :  { %3889 = vst [vmem:[#allocation4 + $0x40] sm:$0xff] %v3770_v12   ;;  %2188 = vst [vmem:[#allocation4 + $0xf8] sm:$0xf] %v3725_v30  ;;  %v3825_v45 = vpack.c.bf16 %v1849_v34, %v1848_v23  ;;  %v3830_v1 = vpack.c.bf16 %v1851_v9, %v1850_v4  ;;  %v3835_v21 = vpack.c.bf16 %v1853_v54, %v1852_v0 }
 0x3b6   :  { %3890 = vst [vmem:[#allocation4 + $0x48] sm:$0xff] %v3775_v18   ;;  %3891 = vst [vmem:[#allocation4 + $0x50] sm:$0xff] %v3780_v33   ;;  %v3840_v57 = vpack.c.bf16 %v1855_v5, %v1854_v11  ;;  %v3845_v43 = vpack.c.bf16 %v1857_v29, %v1856_v2  ;;  %v3850_v26 = vpack.c.bf16 %v1859_v15, %v1858_v47 }
 0x3b7   :  { %3892 = vst [vmem:[#allocation4 + $0x58] sm:$0xff] %v3785_v58   ;;  %3893 = vst [vmem:[#allocation4 + $0x60] sm:$0xff] %v3790_v55   ;;  %v3855_v22 = vpack.c.bf16 %v1861_v27, %v1860_v20  ;;  %v3860_v25 = vpack.c.bf16 %v1863_v17, %v1862_v8  ;;  %v3865_v63 = vpack.c.bf16 %v1865_v56, %v1864_v50 }
 0x3b8   :  { %3894 = vst [vmem:[#allocation4 + $0x68] sm:$0xff] %v3795_v13   ;;  %3895 = vst [vmem:[#allocation4 + $0x70] sm:$0xff] %v3800_v36   ;;  %v3870_v62 = vpack.c.bf16 %v1867_v10, %v1866_v14  ;;  %v3875_v51 = vpack.c.bf16 %v1869_v19, %v1868_v59  ;;  %v3880_v44 = vpack.c.bf16 %v1871_v48, %v1870_v60 }
 0x3b9   :  { %3896 = vst [vmem:[#allocation4 + $0x78] sm:$0xff] %v3805_v32   ;;  %3897 = vst [vmem:[#allocation4 + $0x80] sm:$0xff] %v3810_v35  }
 0x3ba   :  { %3898 = vst [vmem:[#allocation4 + $0x88] sm:$0xff] %v3815_v16   ;;  %3899 = vst [vmem:[#allocation4 + $0x90] sm:$0xff] %v3820_v6  }
 0x3bb   :  { %3900 = vst [vmem:[#allocation4 + $0x98] sm:$0xff] %v3825_v45   ;;  %3901 = vst [vmem:[#allocation4 + $0xa0] sm:$0xff] %v3830_v1  }
 0x3bc   :  { %3902 = vst [vmem:[#allocation4 + $0xa8] sm:$0xff] %v3835_v21   ;;  %3903 = vst [vmem:[#allocation4 + $0xb0] sm:$0xff] %v3840_v57  }
 0x3bd   :  { %3904 = vst [vmem:[#allocation4 + $0xb8] sm:$0xff] %v3845_v43   ;;  %3905 = vst [vmem:[#allocation4 + $0xc0] sm:$0xff] %v3850_v26  }
 0x3be   :  { %3906 = vst [vmem:[#allocation4 + $0xc8] sm:$0xff] %v3855_v22   ;;  %3907 = vst [vmem:[#allocation4 + $0xd0] sm:$0xff] %v3860_v25  }
 0x3bf   :  { %3908 = vst [vmem:[#allocation4 + $0xd8] sm:$0xff] %v3865_v63   ;;  %3909 = vst [vmem:[#allocation4 + $0xe0] sm:$0xff] %v3870_v62  }
 0x3c0   :  { %3910 = vst [vmem:[#allocation4 + $0xe8] sm:$0xff] %v3875_v51   ;;  %3911 = vst [vmem:[#allocation4 + $0xf0] sm:$0xff] %v3880_v44  }
 0x3c1   :  { %4288 = dma.done.wait [#allocation3], 129024 }
 0x3c2   :  { %4289 = vsyncadd [#allocation3], 4294838272  ;;  %v7728_v42 = vmov 0.0   ;;  %v7730_v49 = vmov 0.0   ;;  %v7732_v52 = vmov 0.0   ;;  %s7734_s28 = smov 0  }
 0x3c3 LB: > { %v4325_v31 = vmov 0   ;;  %s3726_s4 = sshll.u32 %s4304_s28, 7  ;;  %s3653_s30 = sshll.u32 %s4304_s28, 3  ;;  %s4304_s28 = sphi %s7734_s28, %s3304_s28   ;;  %v4300_v52 = vphi %v7732_v52, %v8518_v52   ;;  %v4296_v49 = vphi %v7730_v49, %v8517_v49   ;;  %v4292_v42 = vphi %v7728_v42, %v8516_v42  }
 0x3c4   : > { %3365 = vmatprep.mubr.bf16.mxu0 %v4325_v31  ;;  %4089 = vset.pattern.permute.xlu0 %v4325_v31  ;;  %s7743_s29 = scalar_lea.vmem [#allocation2], %s3726_s4  ;;  %s3376_s13 = scalar_lea.vmem [#allocation5], %s3653_s30 }
 0x3c5   : > { %v3318_v28 = vld [vmem:[%s7743_s29 + $0x8] sm:$0xff]  ;;  %v3317_v53 = vld [vmem:[%s7743_s29] sm:$0xff]  ;;  %v3320_v46 = vld [vmem:[%s7743_s29 + $0x18] sm:$0xff]  ;;  %s3309_s6 = sshra.s32 %s3653_s30, 3  ;;  %s3378_s0 = scalar_lea.vmem [#allocation14], %s4304_s28 }
 0x3c6   : > { %3333 = vmatprep.subr.bf16.mxu0 %v3318_v28  ;;  %v3319_v24 = vld [vmem:[%s7743_s29 + $0x10] sm:$0xff]  ;;  %v3322_v40 = vld [vmem:[%s7743_s29 + $0x28] sm:$0xff]  ;;  %v3377_v37 = vld [vmem:[%s3376_s13] sm:$0xff]  ;;  %s3654_s9 = sshll.u32 %s3309_s6, 2  ;;  %s3304_s28 = sadd.s32 1, %s4304_s28  }
 0x3c7   : > { %3334 = vmatpush1.bf16.msra.mxu0 %v3317_v53  ;;  %3382 = vperm.xlu0 %4089, %v3377_v37   ;;  %v3321_v23 = vld [vmem:[%s7743_s29 + $0x20] sm:$0xff]  ;;  %v3324_v34 = vld [vmem:[%s7743_s29 + $0x38] sm:$0xff]  ;;  %v3323_v4 = vld [vmem:[%s7743_s29 + $0x30] sm:$0xff]  ;;  %s3312_s20 = scalar_lea.vmem [#allocation4], %s3654_s9  ;;  %p3301_p3 = scmp.ge.s32.totalorder %s3304_s28, 63  }
 0x3c8   : > { %3335 = vmatprep.subr.bf16.mxu0 %v3320_v46  ;;  %v3326_v9 = vld [vmem:[%s7743_s29 + $0x48] sm:$0xff]  ;;  %v3325_v0 = vld [vmem:[%s7743_s29 + $0x40] sm:$0xff]  ;;  %v3328_v54 = vld [vmem:[%s7743_s29 + $0x58] sm:$0xff]  ;;  %vm3407_vm1 = vcmask (%p3301_p3), 1041408   ;;  %vm3444_vm2 = vcmask (%p3301_p3), 508928   ;;  %s3660_s14 = sld [smem:[#allocation18 + $0x2]] (%p3301_p3)  ;;  %v8522_v44 = vlaneseq (%p3301_p3) }
 0x3c9   : > { %v3327_v11 = vld [vmem:[%s7743_s29 + $0x50] sm:$0xff]  ;;  %v3330_v5 = vld [vmem:[%s7743_s29 + $0x68] sm:$0xff]  ;;  %v3329_v2 = vld [vmem:[%s7743_s29 + $0x60] sm:$0xff] }
 0x3ca   : > { %v3332_v29 = vld [vmem:[%s7743_s29 + $0x78] sm:$0xff]  ;;  %v3331_v47 = vld [vmem:[%s7743_s29 + $0x70] sm:$0xff]  ;;  %v3313_v15 = vld [vmem:[%s3312_s20] sm:$0xf] }
 0x3cb   : > { %3336 = vmatpush1.bf16.msra.mxu0 %v3319_v24  ;;  %v3657_v20 = vld [vmem:[%s3378_s0] ss:$0 sm:$0xff]  ;;  %v3393_v60 = vld [vmem:[#allocation12] sm:$0x3] (%p3301_p3)  ;;  %v8519_v48 = vld [vmem:[#allocation28_spill] sm:$0xff] (%p3301_p3) }
 0x3cc   : > { %3337 = vmatprep.subr.bf16.mxu0 %v3322_v40  ;;  %v3398_v38 = vrot.slane (%p3301_p3), %v3393_v60, %v8519_v48  ;;  %v8520_v41 = vld [vmem:[#allocation27_spill] sm:$0xff] (%p3301_p3)  ;;  %v3658_v33 = vld [vmem:[#allocation15] ss:$0 sm:$0xff] (%p3301_p3)  ;;  %v3659_v55 = vld [vmem:[#allocation17] ss:$0 sm:$0xff] (%p3301_p3) }
 0x3cd   :  { %v8521_v61 = vsub.s32 (%p3301_p3), 1, %v8520_v41 }
 0x3ce   :  { %v3449_v25 = vstv (%p3301_p3), %s3660_s14 }
 0x3cf   : > { %3338 = vmatpush1.bf16.msra.mxu0 %v3321_v23  ;;  %v3402_v3 = vrot.slane (%p3301_p3), %v3393_v60, %v8521_v61 }
 0x3d0   : > { %3339 = vmatprep.subr.bf16.mxu0 %v3324_v34 }
 0x3d3   : > { %3340 = vmatpush1.bf16.msra.mxu0 %v3323_v4 }
 0x3d4   : > { %3341 = vmatprep.subr.bf16.mxu0 %v3326_v9 }
 0x3d7   : > { %3342 = vmatpush1.bf16.msra.mxu0 %v3325_v0 }
 0x3d8   : > { %3343 = vmatprep.subr.bf16.mxu0 %v3328_v54 }
 0x3db   : > { %3344 = vmatpush1.bf16.msra.mxu0 %v3327_v11 }
 0x3dc   : > { %3345 = vmatprep.subr.bf16.mxu0 %v3330_v5 }
 0x3df   : > { %3346 = vmatpush1.bf16.msra.mxu0 %v3329_v2 }
 0x3e0   : > { %3347 = vmatprep.subr.bf16.mxu0 %v3332_v29 }
 0x3e3   : > { %3348 = vmatpush1.bf16.msra.mxu0 %v3331_v47 }
 0x3e6   : > { %3366 = vmatmul.mubr.bf16.vlgmr.msra.gmra.mrb[0].mxu0 %v3313_v15 }
 0x446   : > { %v3383_v27 = vpop.permute.xlu0 %3382 }
 0x447   : > { %v3391_v8 = vmul.f32 %v3657_v20, %v3383_v27 }
 0x449   : > { %v3392_v17 = vadd.f32 %v4292_v42, %v3391_v8  }
 0x44b   : > { %v8516_v42 = vmov %v3392_v17  ;;  %v3434_v58 = vadd.f32 (%p3301_p3), %v3658_v33, %v3392_v17 }
 0x44c   :  { %v3453_v42 = vand.u32 (%p3301_p3), 127, %v8522_v44 }
 0x44d   :  { %v3435_v13 = vmax.f32 (%p3301_p3), %v3434_v58, 0.0 }
 0x44f   :  { %v3443_v36 = vmul.f32 (%p3301_p3), %v3659_v55, %v3435_v13 }
 0x451   :  { %v3445_v32 = vsel (%p3301_p3), %vm3444_vm2, %v3443_v36, 0.0 }
 0x452   :  { %3446 = vadd.xlane.f32.xlu1 (%p3301_p3), %v3445_v32 }
 0x4b7   :  { %3303 = sbr.rel (!%p3301_p3) target bundleno = 963 (0x3c3), region = 111 }
 0x4b9   : > { %v3367_v50 = vpop.f32.mrb[0].mxu0 }
 0x4ba   : > { %v3374_v56 = vadd.f32 %v4300_v52, %v3367_v50   ;;  %v3369_v14 = vpop.f32.mrb[1].mxu0 }
 0x4bb   : > { %v3375_v10 = vadd.f32 %v4296_v49, %v3369_v14   ;;  %v3371_v59 = vpop.f32.mrb[2].mxu0 }
 0x4bc   : > { %v3372_v19 = vpop.f32.mrb[3].mxu0  ;;  %v8518_v52 = vmov %v3374_v56  ;;  %v3405_v30 = vadd.f32 (%p3301_p3), %v3398_v38, %v3374_v56 }
 0x4bd   : > { %v8517_v49 = vmov %v3375_v10  ;;  %v3406_v7 = vadd.f32 (%p3301_p3), %v3402_v3, %v3375_v10 }
 0x4be   :  { %v3408_v39 = vsel %vm3407_vm1, %v3405_v30, -inf  ;;  %v3454_v49 = vadd.s32 128, %v3453_v42 }
 0x4bf   :  { %v3409_v12 = vsel %vm3407_vm1, %v3406_v7, -inf }
 0x4c0   :  { %v3410_v18 = vmax.f32 %v3408_v39, %v3409_v12  ;;  %vm3456_vm3 = vcmp.eq.s32.totalorder %v3454_v49, 252 }
 0x4c2   :  { %3411 = vmax.xlane.f32.xlu0 %v3410_v18 }
 0x4df   :  { %v3447_v63 = vpop.xlane.xlu1 %3446 }
 0x4e0   :  { %v3450_v62 = vadd.f32 %v3449_v25, %v3447_v63 }
 0x54f   :  { %v3412_v35 = vpop.xlane.xlu0 %3411 }
 0x550   :  { %v3413_v16 = vsub.f32 %v3405_v30, %v3412_v35  ;;  %v3414_v6 = vsub.f32 %v3406_v7, %v3412_v35 }
 0x552   :  { %v3415_v45 = vmul.f32 1.442695, %v3413_v16  ;;  %v3417_v1 = vmul.f32 1.442695, %v3414_v6 }
 0x554   :  { %4090 = vpow2.f32 %v3415_v45 }
 0x555   :  { %4092 = vpow2.f32 %v3417_v1 }
 0x556   :  { %4094 = vtanh.f32 %v3450_v62 }
 0x55e   :  { %v4091_v21 = vpop.eup %4090 }
 0x55f   :  { %v4093_v57 = vpop.eup %4092  ;;  %v3419_v43 = vsel %vm3407_vm1, %v4091_v21, 0.0 }
 0x560   :  { %v3420_v26 = vsel %vm3407_vm1, %v4093_v57, 0.0  ;;  %v4095_v52 = vpop.eup %4094 }
 0x561   :  { %v3421_v22 = vadd.f32 %v3420_v26, %v3419_v43 }
 0x563   :  { %3422 = vadd.xlane.f32.xlu0 %v3421_v22 }
 0x5f0   :  { %v3423_v51 = vpop.xlane.xlu0 %3422 }
 0x5f1   :  { %4096 = vrcp.f32 %v3423_v51 }
 0x5fb   :  { %v4097_v31 = vpop.eup %4096 }
 0x5fc   :  { %v3425_v28 = vmul.f32 %v4097_v31, %v4091_v21  ;;  %v3426_v53 = vmul.f32 %v4097_v31, %v4093_v57 }
 0x5fe   :  { %v3458_v46 = vsel %vm3456_vm3, %v4095_v52, %v3426_v53 }
 0x5ff   :  { %v3461_v24 = vcombine.low %v3425_v28, %v3458_v46 }
 0x601   :  { %3661 = vst.sshfl [vmem:[%s7794_s11] sm:$0x33 pattern:$0x76325410] %v3461_v24 }
 0x602   :  { %3475 = vsyncpa [#allocation7], 1 }
 0x603   :  { %3476 = vsyncpa [#allocation10], 1 }
 0x604   :  { %3477 = vsyncpa [#allocation13], 1 }
 0x605   :  { %3478 = vsyncpa [#allocation16], 1 }
 0x606   :  { %3479 = vsyncpa [#allocation8], 1 }
 0x607   :  { %3480 = vsyncmov [#allocation3] }
 0x60a   :  { %s3481_s16 = vpop.sfrf %3480 }
 0x60b   :  { %p3662_p4 = scmp.ne.s32.totalorder %s3481_s16, 0 }
 0x60d   :  { %3485 = shalt.err (%p3662_p4)  }

</bundles_post_ra>
